<compile_context>
chip_gen: v7x
topology: tpu7x:2x2x1
jax: 0.10.0
libtpu: 0.0.40
codegen_flags: <defaults>
</compile_context>

<pallas_src>
import jax
import jax.numpy as jnp
from jax.experimental import pallas as pl
from jax.experimental.pallas import tpu as pltpu

EPS = 1e-5


def spade_kernel(x_ref, seg_ref, mean_ref, inv_ref,
                 w1_ref, b1_ref, wgb_ref, bgb_ref, out_ref):
    """One (batch, row-tile) block of the SPADE forward pass.

    x_ref   : (TH, W, C)         f32   input feature-map tile
    seg_ref : (TH+4, W+2, cin)   bf16  zero-padded segmap window (2-row / 1-col halo)
    mean_ref, inv_ref : (1, C)   f32   hoisted BatchNorm statistics
    w1_ref  : (3, 3, cin, nhid)  bf16  mlp_shared conv weight (HWIO)
    b1_ref  : (1, nhid)          f32
    wgb_ref : (3, 3, nhid, 2*C)  bf16  fused [gamma | beta] conv weight
    bgb_ref : (1, 2*C)           f32
    out_ref : (TH, W, C)
    """
    TH, W, C = out_ref.shape
    HB = TH + 2                      # actv rows needed: tile + 1-row halo each side
    cin = seg_ref.shape[-1]
    nhid = w1_ref.shape[-1]

    i = pl.program_id(1)
    n_tiles = pl.num_programs(1)

    # ---- stage 1: mlp_shared 3x3 conv + ReLU (bf16 MXU operands, f32 accumulation) ----
    seg = seg_ref[...]                               # (TH+4, W+2, cin) bf16
    acc1 = jnp.zeros((HB * W, nhid), jnp.float32)
    for ky in range(3):
        for kx in range(3):
            patch = seg[ky:ky + HB, kx:kx + W, :].reshape(HB * W, cin)
            acc1 = acc1 + jnp.dot(patch, w1_ref[ky, kx],
                                  preferred_element_type=jnp.float32)
    actv = jnp.maximum(acc1 + b1_ref[...], 0.0).reshape(HB, W, nhid)

    # Halo rows that fall outside the image must be the conv zero-padding of actv
    # (NOT relu(conv(zero segmap))): zero them on image-boundary tiles.
    row_iota = jax.lax.broadcasted_iota(jnp.int32, (HB, 1, 1), 0)
    keep = jnp.logical_and(jnp.logical_or(i > 0, row_iota > 0),
                           jnp.logical_or(i < n_tiles - 1, row_iota < HB - 1))
    actv = jnp.where(keep, actv, 0.0)

    # One-column zero halo for the second conv's width padding; keep bf16 for the MXU.
    zcol = jnp.zeros((HB, 1, nhid), jnp.float32)
    actv_p = jnp.concatenate([zcol, actv, zcol], axis=1).astype(jnp.bfloat16)

    # ---- stage 2: fused mlp_gamma / mlp_beta 3x3 conv (one 2C-wide matmul per tap) ----
    C2 = wgb_ref.shape[-1]           # 2 * C
    acc2 = jnp.zeros((TH * W, C2), jnp.float32)
    for ky in range(3):
        for kx in range(3):
            patch = actv_p[ky:ky + TH, kx:kx + W, :].reshape(TH * W, nhid)
            acc2 = acc2 + jnp.dot(patch, wgb_ref[ky, kx],
                                  preferred_element_type=jnp.float32)
    gb = (acc2 + bgb_ref[...]).reshape(TH, W, C2)
    gamma = gb[:, :, :C]
    beta = gb[:, :, C:]

    # ---- deferred BatchNorm + SPADE modulation (f32 VPU math) ----
    xn = (x_ref[...].astype(jnp.float32) - mean_ref[...].reshape(1, 1, C)) \
        * inv_ref[...].reshape(1, 1, C)
    out_ref[...] = (xn * (1.0 + gamma) + beta).astype(out_ref.dtype)


def _pick_row_tile(H, max_rows=32):
    """Largest divisor of H <= max_rows; forces >=2 tiles when H is even so the
    pipeline (and the halo logic) is actually exercised."""
    cap = min(max_rows, H)
    if cap == H and H % 2 == 0 and H >= 4:
        cap = H // 2
    best = 1
    for t in range(1, cap + 1):
        if H % t == 0:
            best = t
    return best


def nearest_resize_nchw(seg_nchw, out_h, out_w):
    """Matches torch F.interpolate(mode='nearest'): src = floor(dst * in/out)."""
    _, _, h, w = seg_nchw.shape
    row_idx = (jnp.arange(out_h) * h) // out_h
    col_idx = (jnp.arange(out_w) * w) // out_w
    return seg_nchw[:, :, row_idx[:, None], col_idx[None, :]]


def spade_forward(x_nchw, seg_nchw, params, row_tile=None):
    """x_nchw: (N, norm_nc, H, W); seg_nchw: (N, label_nc, h, w) -> (N, norm_nc, H, W)."""
    N, C, H, W = x_nchw.shape
    cin = seg_nchw.shape[1]
    nhid = params["w1"].shape[-1]

    TH = _pick_row_tile(H) if row_tile is None else row_tile
    assert H % TH == 0, "row tile must divide H"
    n_tiles = H // TH

    # ---- glue (plain XLA): nearest resize, NHWC layout, hoisted global BN stats ----
    x_nhwc = jnp.transpose(x_nchw, (0, 2, 3, 1)).astype(jnp.float32)
    seg_rs = nearest_resize_nchw(seg_nchw, H, W)
    seg_nhwc = jnp.transpose(seg_rs, (0, 2, 3, 1)).astype(jnp.bfloat16)

    mean = jnp.mean(x_nhwc, axis=(0, 1, 2))                        # (C,)
    var = jnp.mean(jnp.square(x_nhwc - mean), axis=(0, 1, 2))      # biased var (PyTorch BN)
    inv_std = jax.lax.rsqrt(var + EPS)
    mean = mean.reshape(1, C)
    inv_std = inv_std.reshape(1, C)

    # Segmap zero-padded by 2 rows / 1 col per side, then cut into overlapping
    # TH+4 row windows (cheap: label_nc channels) so each tile is self-contained.
    seg_pad = jnp.pad(seg_nhwc, ((0, 0), (2, 2), (1, 1), (0, 0)))
    row_idx = (jnp.arange(n_tiles) * TH)[:, None] + jnp.arange(TH + 4)[None, :]
    seg_tiles = seg_pad[:, row_idx]               # (N, n_tiles, TH+4, W+2, cin)

    # bf16 MXU operands; biases / accumulation stay f32.  Fuse gamma & beta convs.
    w1 = params["w1"].astype(jnp.bfloat16)
    b1 = params["b1"].astype(jnp.float32)
    wgb = jnp.concatenate([params["wg"], params["wb"]], axis=-1).astype(jnp.bfloat16)
    bgb = jnp.concatenate([params["bg"], params["bb"]], axis=-1).astype(jnp.float32)

    out_nhwc = pl.pallas_call(
        spade_kernel,
        out_shape=jax.ShapeDtypeStruct((N, H, W, C), jnp.float32),
        grid=(N, n_tiles),
        in_specs=[
            pl.BlockSpec((None, TH, W, C), lambda n, i: (n, i, 0, 0)),              # x
            pl.BlockSpec((None, None, TH + 4, W + 2, cin),
                         lambda n, i: (n, i, 0, 0, 0)),                             # seg tiles
            pl.BlockSpec((1, C), lambda n, i: (0, 0)),                              # mean
            pl.BlockSpec((1, C), lambda n, i: (0, 0)),                              # inv_std
            pl.BlockSpec((3, 3, cin, nhid), lambda n, i: (0, 0, 0, 0)),             # w1
            pl.BlockSpec((1, nhid), lambda n, i: (0, 0)),                           # b1
            pl.BlockSpec((3, 3, nhid, 2 * C), lambda n, i: (0, 0, 0, 0)),           # wgb
            pl.BlockSpec((1, 2 * C), lambda n, i: (0, 0)),                          # bgb
        ],
        out_specs=pl.BlockSpec((None, TH, W, C), lambda n, i: (n, i, 0, 0)),
        compiler_params=pltpu.CompilerParams(
            dimension_semantics=("parallel", "parallel"),
            vmem_limit_bytes=64 * 1024 * 1024,
        ),
    )(x_nhwc, seg_tiles, mean, inv_std, w1, b1, wgb, bgb)

    # TODO(synk): for norm_nc < 128 a lane-dense (N*H, W*C) output layout would avoid
    # masked vst on the writeback; skipped here to keep NCHW round-trip simple.
    return jnp.transpose(out_nhwc, (0, 3, 1, 2)).astype(x_nchw.dtype)


# ---------------- pure-JAX reference (for correctness check) ----------------
def _conv3x3_ref(x_nhwc, w_hwio, b):
    y = jax.lax.conv_general_dilated(
        x_nhwc, w_hwio, window_strides=(1, 1), padding="SAME",
        dimension_numbers=("NHWC", "HWIO", "NHWC"))
    return y + b.reshape(1, 1, 1, -1)


def spade_reference(x_nchw, seg_nchw, params):
    seg_rs = nearest_resize_nchw(seg_nchw, x_nchw.shape[2], x_nchw.shape[3])
    x = jnp.transpose(x_nchw, (0, 2, 3, 1))
    seg = jnp.transpose(seg_rs, (0, 2, 3, 1))
    mean = jnp.mean(x, axis=(0, 1, 2), keepdims=True)
    var = jnp.mean((x - mean) ** 2, axis=(0, 1, 2), keepdims=True)
    normalized = (x - mean) / jnp.sqrt(var + EPS)
    actv = jax.nn.relu(_conv3x3_ref(seg, params["w1"], params["b1"]))
    gamma = _conv3x3_ref(actv, params["wg"], params["bg"])
    beta = _conv3x3_ref(actv, params["wb"], params["bb"])
    out = normalized * (1.0 + gamma) + beta
    return jnp.transpose(out, (0, 3, 1, 2))


if __name__ == "__main__":
    norm_nc, label_nc, nhidden = 4, 3, 128
    N, H, W = 2, 16, 16
    seg_h, seg_w = 8, 8            # smaller than (H, W) to exercise nearest interpolation

    key = jax.random.PRNGKey(0)
    kx, ks, k1, k2, k3, k4, k5, k6 = jax.random.split(key, 8)

    x = jax.random.normal(kx, (N, norm_nc, H, W), jnp.float32)
    segmap = jax.random.normal(ks, (N, label_nc, seg_h, seg_w), jnp.float32)

    params = {
        "w1": jax.random.normal(k1, (3, 3, label_nc, nhidden), jnp.float32) * 0.10,
        "b1": jax.random.normal(k2, (1, nhidden), jnp.float32) * 0.10,
        "wg": jax.random.normal(k3, (3, 3, nhidden, norm_nc), jnp.float32) * 0.05,
        "bg": jax.random.normal(k4, (1, norm_nc), jnp.float32) * 0.05,
        "wb": jax.random.normal(k5, (3, 3, nhidden, norm_nc), jnp.float32) * 0.05,
        "bb": jax.random.normal(k6, (1, norm_nc), jnp.float32) * 0.05,
    }

    spade_jit = jax.jit(spade_forward)
    out = jax.block_until_ready(spade_jit(x, segmap, params))
    ref = jax.block_until_ready(spade_reference(x, segmap, params))

    assert out.shape == (N, norm_nc, H, W)
    err = float(jnp.max(jnp.abs(out - ref)))
    # bf16 MXU operands with f32 accumulation -> small numeric drift vs f32 reference.
    assert jnp.allclose(out, ref, rtol=2e-2, atol=3e-2), f"mismatch vs reference (max abs err {err})"

    print("KERNEL_OK")
</pallas_src>

<mosaic_0001>
module attributes {stable_mosaic.version = 11 : i64} {
  func.func @spade_kernel(%arg0: i32, %arg1: i32, %arg2: memref<1x8x16x4xf32, #tpu.memory_space<vmem>>, %arg3: memref<1x1x12x18x3xbf16, #tpu.memory_space<vmem>>, %arg4: memref<1x4xf32, #tpu.memory_space<vmem>>, %arg5: memref<1x4xf32, #tpu.memory_space<vmem>>, %arg6: memref<3x3x3x128xbf16, #tpu.memory_space<vmem>>, %arg7: memref<1x128xf32, #tpu.memory_space<vmem>>, %arg8: memref<3x3x128x8xbf16, #tpu.memory_space<vmem>>, %arg9: memref<1x8xf32, #tpu.memory_space<vmem>>, %arg10: memref<1x8x16x4xf32, #tpu.memory_space<vmem>>) attributes {dimension_semantics = [#tpu.dimension_semantics<parallel>, #tpu.dimension_semantics<parallel>], iteration_bounds = array<i64: 2, 2>, scalar_prefetch = 0 : i64, scratch_operands = 0 : i64, tpu.core_type = #tpu.core_type<tc>, window_params = [{transform_indices = @transform_0, window_bounds = array<i64: 1, 8, 16, 4>}, {transform_indices = @transform_1, window_bounds = array<i64: 1, 1, 12, 18, 3>}, {pipeline_mode = #tpu.pipeline_mode<synchronous>, transform_indices = @transform_2, window_bounds = array<i64: 1, 4>}, {pipeline_mode = #tpu.pipeline_mode<synchronous>, transform_indices = @transform_3, window_bounds = array<i64: 1, 4>}, {pipeline_mode = #tpu.pipeline_mode<synchronous>, transform_indices = @transform_4, window_bounds = array<i64: 3, 3, 3, 128>}, {pipeline_mode = #tpu.pipeline_mode<synchronous>, transform_indices = @transform_5, window_bounds = array<i64: 1, 128>}, {pipeline_mode = #tpu.pipeline_mode<synchronous>, transform_indices = @transform_6, window_bounds = array<i64: 3, 3, 128, 8>}, {pipeline_mode = #tpu.pipeline_mode<synchronous>, transform_indices = @transform_7, window_bounds = array<i64: 1, 8>}, {transform_indices = @transform_8, window_bounds = array<i64: 1, 8, 16, 4>}]} {
    %c0 = arith.constant 0 : index
    %c0_0 = arith.constant 0 : index
    %c0_1 = arith.constant 0 : index
    %c0_2 = arith.constant 0 : index
    %c0_3 = arith.constant 0 : index
    %0 = vector.load %arg3[%c0, %c0_0, %c0_1, %c0_2, %c0_3] : memref<1x1x12x18x3xbf16, #tpu.memory_space<vmem>>, vector<1x1x12x18x3xbf16>
    %1 = vector.shape_cast %0 : vector<1x1x12x18x3xbf16> to vector<12x18x3xbf16>
    %cst = arith.constant 0.000000e+00 : f32
    %2 = vector.broadcast %cst : f32 to vector<160x128xf32>
    %3 = vector.extract_strided_slice %1 {offsets = [0, 0, 0], sizes = [10, 16, 3], strides = [1, 1, 1]} : vector<12x18x3xbf16> to vector<10x16x3xbf16>
    %4 = vector.shape_cast %3 : vector<10x16x3xbf16> to vector<160x3xbf16>
    %c0_4 = arith.constant 0 : index
    %c0_5 = arith.constant 0 : index
    %c0_6 = arith.constant 0 : index
    %c0_7 = arith.constant 0 : index
    %5 = vector.load %arg6[%c0_4, %c0_5, %c0_6, %c0_7] : memref<3x3x3x128xbf16, #tpu.memory_space<vmem>>, vector<1x1x3x128xbf16>
    %6 = vector.shape_cast %5 : vector<1x1x3x128xbf16> to vector<3x128xbf16>
    %cst_8 = arith.constant dense<0.000000e+00> : vector<160x128xf32>
    %7 = tpu.matmul %4, %6, %cst_8 {dimension_numbers = #tpu.dot_dimension_numbers<[1], [0], [0], [1], [0, 0, 1, 1], [], []>} : vector<160x3xbf16>, vector<3x128xbf16>, vector<160x128xf32> -> vector<160x128xf32>
    %8 = arith.addf %2, %7 : vector<160x128xf32>
    %9 = vector.extract_strided_slice %1 {offsets = [0, 1, 0], sizes = [10, 16, 3], strides = [1, 1, 1]} : vector<12x18x3xbf16> to vector<10x16x3xbf16>
    %10 = vector.shape_cast %9 : vector<10x16x3xbf16> to vector<160x3xbf16>
    %c0_9 = arith.constant 0 : index
    %c1 = arith.constant 1 : index
    %c0_10 = arith.constant 0 : index
    %c0_11 = arith.constant 0 : index
    %11 = vector.load %arg6[%c0_9, %c1, %c0_10, %c0_11] : memref<3x3x3x128xbf16, #tpu.memory_space<vmem>>, vector<1x1x3x128xbf16>
    %12 = vector.shape_cast %11 : vector<1x1x3x128xbf16> to vector<3x128xbf16>
    %cst_12 = arith.constant dense<0.000000e+00> : vector<160x128xf32>
    %13 = tpu.matmul %10, %12, %cst_12 {dimension_numbers = #tpu.dot_dimension_numbers<[1], [0], [0], [1], [0, 0, 1, 1], [], []>} : vector<160x3xbf16>, vector<3x128xbf16>, vector<160x128xf32> -> vector<160x128xf32>
    %14 = arith.addf %8, %13 : vector<160x128xf32>
    %15 = vector.extract_strided_slice %1 {offsets = [0, 2, 0], sizes = [10, 16, 3], strides = [1, 1, 1]} : vector<12x18x3xbf16> to vector<10x16x3xbf16>
    %16 = vector.shape_cast %15 : vector<10x16x3xbf16> to vector<160x3xbf16>
    %c0_13 = arith.constant 0 : index
    %c2 = arith.constant 2 : index
    %c0_14 = arith.constant 0 : index
    %c0_15 = arith.constant 0 : index
    %17 = vector.load %arg6[%c0_13, %c2, %c0_14, %c0_15] : memref<3x3x3x128xbf16, #tpu.memory_space<vmem>>, vector<1x1x3x128xbf16>
    %18 = vector.shape_cast %17 : vector<1x1x3x128xbf16> to vector<3x128xbf16>
    %cst_16 = arith.constant dense<0.000000e+00> : vector<160x128xf32>
    %19 = tpu.matmul %16, %18, %cst_16 {dimension_numbers = #tpu.dot_dimension_numbers<[1], [0], [0], [1], [0, 0, 1, 1], [], []>} : vector<160x3xbf16>, vector<3x128xbf16>, vector<160x128xf32> -> vector<160x128xf32>
    %20 = arith.addf %14, %19 : vector<160x128xf32>
    %21 = vector.extract_strided_slice %1 {offsets = [1, 0, 0], sizes = [10, 16, 3], strides = [1, 1, 1]} : vector<12x18x3xbf16> to vector<10x16x3xbf16>
    %22 = vector.shape_cast %21 : vector<10x16x3xbf16> to vector<160x3xbf16>
    %c1_17 = arith.constant 1 : index
    %c0_18 = arith.constant 0 : index
    %c0_19 = arith.constant 0 : index
    %c0_20 = arith.constant 0 : index
    %23 = vector.load %arg6[%c1_17, %c0_18, %c0_19, %c0_20] : memref<3x3x3x128xbf16, #tpu.memory_space<vmem>>, vector<1x1x3x128xbf16>
    %24 = vector.shape_cast %23 : vector<1x1x3x128xbf16> to vector<3x128xbf16>
    %cst_21 = arith.constant dense<0.000000e+00> : vector<160x128xf32>
    %25 = tpu.matmul %22, %24, %cst_21 {dimension_numbers = #tpu.dot_dimension_numbers<[1], [0], [0], [1], [0, 0, 1, 1], [], []>} : vector<160x3xbf16>, vector<3x128xbf16>, vector<160x128xf32> -> vector<160x128xf32>
    %26 = arith.addf %20, %25 : vector<160x128xf32>
    %27 = vector.extract_strided_slice %1 {offsets = [1, 1, 0], sizes = [10, 16, 3], strides = [1, 1, 1]} : vector<12x18x3xbf16> to vector<10x16x3xbf16>
    %28 = vector.shape_cast %27 : vector<10x16x3xbf16> to vector<160x3xbf16>
    %c1_22 = arith.constant 1 : index
    %c1_23 = arith.constant 1 : index
    %c0_24 = arith.constant 0 : index
    %c0_25 = arith.constant 0 : index
    %29 = vector.load %arg6[%c1_22, %c1_23, %c0_24, %c0_25] : memref<3x3x3x128xbf16, #tpu.memory_space<vmem>>, vector<1x1x3x128xbf16>
    %30 = vector.shape_cast %29 : vector<1x1x3x128xbf16> to vector<3x128xbf16>
    %cst_26 = arith.constant dense<0.000000e+00> : vector<160x128xf32>
    %31 = tpu.matmul %28, %30, %cst_26 {dimension_numbers = #tpu.dot_dimension_numbers<[1], [0], [0], [1], [0, 0, 1, 1], [], []>} : vector<160x3xbf16>, vector<3x128xbf16>, vector<160x128xf32> -> vector<160x128xf32>
    %32 = arith.addf %26, %31 : vector<160x128xf32>
    %33 = vector.extract_strided_slice %1 {offsets = [1, 2, 0], sizes = [10, 16, 3], strides = [1, 1, 1]} : vector<12x18x3xbf16> to vector<10x16x3xbf16>
    %34 = vector.shape_cast %33 : vector<10x16x3xbf16> to vector<160x3xbf16>
    %c1_27 = arith.constant 1 : index
    %c2_28 = arith.constant 2 : index
    %c0_29 = arith.constant 0 : index
    %c0_30 = arith.constant 0 : index
    %35 = vector.load %arg6[%c1_27, %c2_28, %c0_29, %c0_30] : memref<3x3x3x128xbf16, #tpu.memory_space<vmem>>, vector<1x1x3x128xbf16>
    %36 = vector.shape_cast %35 : vector<1x1x3x128xbf16> to vector<3x128xbf16>
    %cst_31 = arith.constant dense<0.000000e+00> : vector<160x128xf32>
    %37 = tpu.matmul %34, %36, %cst_31 {dimension_numbers = #tpu.dot_dimension_numbers<[1], [0], [0], [1], [0, 0, 1, 1], [], []>} : vector<160x3xbf16>, vector<3x128xbf16>, vector<160x128xf32> -> vector<160x128xf32>
    %38 = arith.addf %32, %37 : vector<160x128xf32>
    %39 = vector.extract_strided_slice %1 {offsets = [2, 0, 0], sizes = [10, 16, 3], strides = [1, 1, 1]} : vector<12x18x3xbf16> to vector<10x16x3xbf16>
    %40 = vector.shape_cast %39 : vector<10x16x3xbf16> to vector<160x3xbf16>
    %c2_32 = arith.constant 2 : index
    %c0_33 = arith.constant 0 : index
    %c0_34 = arith.constant 0 : index
    %c0_35 = arith.constant 0 : index
    %41 = vector.load %arg6[%c2_32, %c0_33, %c0_34, %c0_35] : memref<3x3x3x128xbf16, #tpu.memory_space<vmem>>, vector<1x1x3x128xbf16>
    %42 = vector.shape_cast %41 : vector<1x1x3x128xbf16> to vector<3x128xbf16>
    %cst_36 = arith.constant dense<0.000000e+00> : vector<160x128xf32>
    %43 = tpu.matmul %40, %42, %cst_36 {dimension_numbers = #tpu.dot_dimension_numbers<[1], [0], [0], [1], [0, 0, 1, 1], [], []>} : vector<160x3xbf16>, vector<3x128xbf16>, vector<160x128xf32> -> vector<160x128xf32>
    %44 = arith.addf %38, %43 : vector<160x128xf32>
    %45 = vector.extract_strided_slice %1 {offsets = [2, 1, 0], sizes = [10, 16, 3], strides = [1, 1, 1]} : vector<12x18x3xbf16> to vector<10x16x3xbf16>
    %46 = vector.shape_cast %45 : vector<10x16x3xbf16> to vector<160x3xbf16>
    %c2_37 = arith.constant 2 : index
    %c1_38 = arith.constant 1 : index
    %c0_39 = arith.constant 0 : index
    %c0_40 = arith.constant 0 : index
    %47 = vector.load %arg6[%c2_37, %c1_38, %c0_39, %c0_40] : memref<3x3x3x128xbf16, #tpu.memory_space<vmem>>, vector<1x1x3x128xbf16>
    %48 = vector.shape_cast %47 : vector<1x1x3x128xbf16> to vector<3x128xbf16>
    %cst_41 = arith.constant dense<0.000000e+00> : vector<160x128xf32>
    %49 = tpu.matmul %46, %48, %cst_41 {dimension_numbers = #tpu.dot_dimension_numbers<[1], [0], [0], [1], [0, 0, 1, 1], [], []>} : vector<160x3xbf16>, vector<3x128xbf16>, vector<160x128xf32> -> vector<160x128xf32>
    %50 = arith.addf %44, %49 : vector<160x128xf32>
    %51 = vector.extract_strided_slice %1 {offsets = [2, 2, 0], sizes = [10, 16, 3], strides = [1, 1, 1]} : vector<12x18x3xbf16> to vector<10x16x3xbf16>
    %52 = vector.shape_cast %51 : vector<10x16x3xbf16> to vector<160x3xbf16>
    %c2_42 = arith.constant 2 : index
    %c2_43 = arith.constant 2 : index
    %c0_44 = arith.constant 0 : index
    %c0_45 = arith.constant 0 : index
    %53 = vector.load %arg6[%c2_42, %c2_43, %c0_44, %c0_45] : memref<3x3x3x128xbf16, #tpu.memory_space<vmem>>, vector<1x1x3x128xbf16>
    %54 = vector.shape_cast %53 : vector<1x1x3x128xbf16> to vector<3x128xbf16>
    %cst_46 = arith.constant dense<0.000000e+00> : vector<160x128xf32>
    %55 = tpu.matmul %52, %54, %cst_46 {dimension_numbers = #tpu.dot_dimension_numbers<[1], [0], [0], [1], [0, 0, 1, 1], [], []>} : vector<160x3xbf16>, vector<3x128xbf16>, vector<160x128xf32> -> vector<160x128xf32>
    %56 = arith.addf %50, %55 : vector<160x128xf32>
    %c0_47 = arith.constant 0 : index
    %c0_48 = arith.constant 0 : index
    %57 = vector.load %arg7[%c0_47, %c0_48] : memref<1x128xf32, #tpu.memory_space<vmem>>, vector<1x128xf32>
    %58 = vector.broadcast %57 : vector<1x128xf32> to vector<160x128xf32>
    %59 = arith.addf %56, %58 : vector<160x128xf32>
    %cst_49 = arith.constant 0.000000e+00 : f32
    %60 = vector.broadcast %cst_49 : f32 to vector<160x128xf32>
    %61 = arith.maximumf %59, %60 : vector<160x128xf32>
    %62 = vector.shape_cast %61 : vector<160x128xf32> to vector<10x16x128xf32>
    %63 = tpu.iota {dimensions = array<i32: 0>} : vector<10x1x1xi32>
    %c0_i32 = arith.constant 0 : i32
    %64 = arith.cmpi sgt, %arg1, %c0_i32 : i32
    %c0_i32_50 = arith.constant 0 : i32
    %65 = vector.broadcast %c0_i32_50 : i32 to vector<10x1x1xi32>
    %66 = arith.cmpi sgt, %63, %65 : vector<10x1x1xi32>
    %67 = vector.broadcast %64 : i1 to vector<10x1x1xi1>
    %68 = arith.ori %67, %66 : vector<10x1x1xi1>
    %c1_i32 = arith.constant 1 : i32
    %69 = arith.cmpi slt, %arg1, %c1_i32 : i32
    %c9_i32 = arith.constant 9 : i32
    %70 = vector.broadcast %c9_i32 : i32 to vector<10x1x1xi32>
    %71 = arith.cmpi slt, %63, %70 : vector<10x1x1xi32>
    %72 = vector.broadcast %69 : i1 to vector<10x1x1xi1>
    %73 = arith.ori %72, %71 : vector<10x1x1xi1>
    %74 = arith.andi %68, %73 : vector<10x1x1xi1>
    %cst_51 = arith.constant 0.000000e+00 : f32
    %75 = vector.shape_cast %74 : vector<10x1x1xi1> to vector<10x1x1xi1>
    %76 = vector.broadcast %75 : vector<10x1x1xi1> to vector<10x16x128xi1>
    %77 = vector.broadcast %cst_51 : f32 to vector<10x16x128xf32>
    %78 = arith.select %76, %62, %77 : vector<10x16x128xi1>, vector<10x16x128xf32>
    %cst_52 = arith.constant 0.000000e+00 : f32
    %79 = vector.broadcast %cst_52 : f32 to vector<10x1x128xf32>
    %80 = tpu.concatenate %79, %78, %79 in 1 : vector<10x1x128xf32>, vector<10x16x128xf32>, vector<10x1x128xf32> -> vector<10x18x128xf32>
    %81 = arith.truncf %80 : vector<10x18x128xf32> to vector<10x18x128xbf16>
    %cst_53 = arith.constant 0.000000e+00 : f32
    %82 = vector.broadcast %cst_53 : f32 to vector<128x8xf32>
    %83 = vector.extract_strided_slice %81 {offsets = [0, 0, 0], sizes = [8, 16, 128], strides = [1, 1, 1]} : vector<10x18x128xbf16> to vector<8x16x128xbf16>
    %84 = vector.shape_cast %83 : vector<8x16x128xbf16> to vector<128x128xbf16>
    %c0_54 = arith.constant 0 : index
    %c0_55 = arith.constant 0 : index
    %c0_56 = arith.constant 0 : index
    %c0_57 = arith.constant 0 : index
    %85 = vector.load %arg8[%c0_54, %c0_55, %c0_56, %c0_57] : memref<3x3x128x8xbf16, #tpu.memory_space<vmem>>, vector<1x1x128x8xbf16>
    %86 = vector.shape_cast %85 : vector<1x1x128x8xbf16> to vector<128x8xbf16>
    %cst_58 = arith.constant dense<0.000000e+00> : vector<128x8xf32>
    %87 = tpu.matmul %84, %86, %cst_58 {dimension_numbers = #tpu.dot_dimension_numbers<[1], [0], [0], [1], [0, 0, 1, 1], [], []>} : vector<128x128xbf16>, vector<128x8xbf16>, vector<128x8xf32> -> vector<128x8xf32>
    %88 = arith.addf %82, %87 : vector<128x8xf32>
    %89 = vector.extract_strided_slice %81 {offsets = [0, 1, 0], sizes = [8, 16, 128], strides = [1, 1, 1]} : vector<10x18x128xbf16> to vector<8x16x128xbf16>
    %90 = vector.shape_cast %89 : vector<8x16x128xbf16> to vector<128x128xbf16>
    %c0_59 = arith.constant 0 : index
    %c1_60 = arith.constant 1 : index
    %c0_61 = arith.constant 0 : index
    %c0_62 = arith.constant 0 : index
    %91 = vector.load %arg8[%c0_59, %c1_60, %c0_61, %c0_62] : memref<3x3x128x8xbf16, #tpu.memory_space<vmem>>, vector<1x1x128x8xbf16>
    %92 = vector.shape_cast %91 : vector<1x1x128x8xbf16> to vector<128x8xbf16>
    %cst_63 = arith.constant dense<0.000000e+00> : vector<128x8xf32>
    %93 = tpu.matmul %90, %92, %cst_63 {dimension_numbers = #tpu.dot_dimension_numbers<[1], [0], [0], [1], [0, 0, 1, 1], [], []>} : vector<128x128xbf16>, vector<128x8xbf16>, vector<128x8xf32> -> vector<128x8xf32>
    %94 = arith.addf %88, %93 : vector<128x8xf32>
    %95 = vector.extract_strided_slice %81 {offsets = [0, 2, 0], sizes = [8, 16, 128], strides = [1, 1, 1]} : vector<10x18x128xbf16> to vector<8x16x128xbf16>
    %96 = vector.shape_cast %95 : vector<8x16x128xbf16> to vector<128x128xbf16>
    %c0_64 = arith.constant 0 : index
    %c2_65 = arith.constant 2 : index
    %c0_66 = arith.constant 0 : index
    %c0_67 = arith.constant 0 : index
    %97 = vector.load %arg8[%c0_64, %c2_65, %c0_66, %c0_67] : memref<3x3x128x8xbf16, #tpu.memory_space<vmem>>, vector<1x1x128x8xbf16>
    %98 = vector.shape_cast %97 : vector<1x1x128x8xbf16> to vector<128x8xbf16>
    %cst_68 = arith.constant dense<0.000000e+00> : vector<128x8xf32>
    %99 = tpu.matmul %96, %98, %cst_68 {dimension_numbers = #tpu.dot_dimension_numbers<[1], [0], [0], [1], [0, 0, 1, 1], [], []>} : vector<128x128xbf16>, vector<128x8xbf16>, vector<128x8xf32> -> vector<128x8xf32>
    %100 = arith.addf %94, %99 : vector<128x8xf32>
    %101 = vector.extract_strided_slice %81 {offsets = [1, 0, 0], sizes = [8, 16, 128], strides = [1, 1, 1]} : vector<10x18x128xbf16> to vector<8x16x128xbf16>
    %102 = vector.shape_cast %101 : vector<8x16x128xbf16> to vector<128x128xbf16>
    %c1_69 = arith.constant 1 : index
    %c0_70 = arith.constant 0 : index
    %c0_71 = arith.constant 0 : index
    %c0_72 = arith.constant 0 : index
    %103 = vector.load %arg8[%c1_69, %c0_70, %c0_71, %c0_72] : memref<3x3x128x8xbf16, #tpu.memory_space<vmem>>, vector<1x1x128x8xbf16>
    %104 = vector.shape_cast %103 : vector<1x1x128x8xbf16> to vector<128x8xbf16>
    %cst_73 = arith.constant dense<0.000000e+00> : vector<128x8xf32>
    %105 = tpu.matmul %102, %104, %cst_73 {dimension_numbers = #tpu.dot_dimension_numbers<[1], [0], [0], [1], [0, 0, 1, 1], [], []>} : vector<128x128xbf16>, vector<128x8xbf16>, vector<128x8xf32> -> vector<128x8xf32>
    %106 = arith.addf %100, %105 : vector<128x8xf32>
    %107 = vector.extract_strided_slice %81 {offsets = [1, 1, 0], sizes = [8, 16, 128], strides = [1, 1, 1]} : vector<10x18x128xbf16> to vector<8x16x128xbf16>
    %108 = vector.shape_cast %107 : vector<8x16x128xbf16> to vector<128x128xbf16>
    %c1_74 = arith.constant 1 : index
    %c1_75 = arith.constant 1 : index
    %c0_76 = arith.constant 0 : index
    %c0_77 = arith.constant 0 : index
    %109 = vector.load %arg8[%c1_74, %c1_75, %c0_76, %c0_77] : memref<3x3x128x8xbf16, #tpu.memory_space<vmem>>, vector<1x1x128x8xbf16>
    %110 = vector.shape_cast %109 : vector<1x1x128x8xbf16> to vector<128x8xbf16>
    %cst_78 = arith.constant dense<0.000000e+00> : vector<128x8xf32>
    %111 = tpu.matmul %108, %110, %cst_78 {dimension_numbers = #tpu.dot_dimension_numbers<[1], [0], [0], [1], [0, 0, 1, 1], [], []>} : vector<128x128xbf16>, vector<128x8xbf16>, vector<128x8xf32> -> vector<128x8xf32>
    %112 = arith.addf %106, %111 : vector<128x8xf32>
    %113 = vector.extract_strided_slice %81 {offsets = [1, 2, 0], sizes = [8, 16, 128], strides = [1, 1, 1]} : vector<10x18x128xbf16> to vector<8x16x128xbf16>
    %114 = vector.shape_cast %113 : vector<8x16x128xbf16> to vector<128x128xbf16>
    %c1_79 = arith.constant 1 : index
    %c2_80 = arith.constant 2 : index
    %c0_81 = arith.constant 0 : index
    %c0_82 = arith.constant 0 : index
    %115 = vector.load %arg8[%c1_79, %c2_80, %c0_81, %c0_82] : memref<3x3x128x8xbf16, #tpu.memory_space<vmem>>, vector<1x1x128x8xbf16>
    %116 = vector.shape_cast %115 : vector<1x1x128x8xbf16> to vector<128x8xbf16>
    %cst_83 = arith.constant dense<0.000000e+00> : vector<128x8xf32>
    %117 = tpu.matmul %114, %116, %cst_83 {dimension_numbers = #tpu.dot_dimension_numbers<[1], [0], [0], [1], [0, 0, 1, 1], [], []>} : vector<128x128xbf16>, vector<128x8xbf16>, vector<128x8xf32> -> vector<128x8xf32>
    %118 = arith.addf %112, %117 : vector<128x8xf32>
    %119 = vector.extract_strided_slice %81 {offsets = [2, 0, 0], sizes = [8, 16, 128], strides = [1, 1, 1]} : vector<10x18x128xbf16> to vector<8x16x128xbf16>
    %120 = vector.shape_cast %119 : vector<8x16x128xbf16> to vector<128x128xbf16>
    %c2_84 = arith.constant 2 : index
    %c0_85 = arith.constant 0 : index
    %c0_86 = arith.constant 0 : index
    %c0_87 = arith.constant 0 : index
    %121 = vector.load %arg8[%c2_84, %c0_85, %c0_86, %c0_87] : memref<3x3x128x8xbf16, #tpu.memory_space<vmem>>, vector<1x1x128x8xbf16>
    %122 = vector.shape_cast %121 : vector<1x1x128x8xbf16> to vector<128x8xbf16>
    %cst_88 = arith.constant dense<0.000000e+00> : vector<128x8xf32>
    %123 = tpu.matmul %120, %122, %cst_88 {dimension_numbers = #tpu.dot_dimension_numbers<[1], [0], [0], [1], [0, 0, 1, 1], [], []>} : vector<128x128xbf16>, vector<128x8xbf16>, vector<128x8xf32> -> vector<128x8xf32>
    %124 = arith.addf %118, %123 : vector<128x8xf32>
    %125 = vector.extract_strided_slice %81 {offsets = [2, 1, 0], sizes = [8, 16, 128], strides = [1, 1, 1]} : vector<10x18x128xbf16> to vector<8x16x128xbf16>
    %126 = vector.shape_cast %125 : vector<8x16x128xbf16> to vector<128x128xbf16>
    %c2_89 = arith.constant 2 : index
    %c1_90 = arith.constant 1 : index
    %c0_91 = arith.constant 0 : index
    %c0_92 = arith.constant 0 : index
    %127 = vector.load %arg8[%c2_89, %c1_90, %c0_91, %c0_92] : memref<3x3x128x8xbf16, #tpu.memory_space<vmem>>, vector<1x1x128x8xbf16>
    %128 = vector.shape_cast %127 : vector<1x1x128x8xbf16> to vector<128x8xbf16>
    %cst_93 = arith.constant dense<0.000000e+00> : vector<128x8xf32>
    %129 = tpu.matmul %126, %128, %cst_93 {dimension_numbers = #tpu.dot_dimension_numbers<[1], [0], [0], [1], [0, 0, 1, 1], [], []>} : vector<128x128xbf16>, vector<128x8xbf16>, vector<128x8xf32> -> vector<128x8xf32>
    %130 = arith.addf %124, %129 : vector<128x8xf32>
    %131 = vector.extract_strided_slice %81 {offsets = [2, 2, 0], sizes = [8, 16, 128], strides = [1, 1, 1]} : vector<10x18x128xbf16> to vector<8x16x128xbf16>
    %132 = vector.shape_cast %131 : vector<8x16x128xbf16> to vector<128x128xbf16>
    %c2_94 = arith.constant 2 : index
    %c2_95 = arith.constant 2 : index
    %c0_96 = arith.constant 0 : index
    %c0_97 = arith.constant 0 : index
    %133 = vector.load %arg8[%c2_94, %c2_95, %c0_96, %c0_97] : memref<3x3x128x8xbf16, #tpu.memory_space<vmem>>, vector<1x1x128x8xbf16>
    %134 = vector.shape_cast %133 : vector<1x1x128x8xbf16> to vector<128x8xbf16>
    %cst_98 = arith.constant dense<0.000000e+00> : vector<128x8xf32>
    %135 = tpu.matmul %132, %134, %cst_98 {dimension_numbers = #tpu.dot_dimension_numbers<[1], [0], [0], [1], [0, 0, 1, 1], [], []>} : vector<128x128xbf16>, vector<128x8xbf16>, vector<128x8xf32> -> vector<128x8xf32>
    %136 = arith.addf %130, %135 : vector<128x8xf32>
    %c0_99 = arith.constant 0 : index
    %c0_100 = arith.constant 0 : index
    %137 = vector.load %arg9[%c0_99, %c0_100] : memref<1x8xf32, #tpu.memory_space<vmem>>, vector<1x8xf32>
    %138 = vector.broadcast %137 : vector<1x8xf32> to vector<128x8xf32>
    %139 = arith.addf %136, %138 : vector<128x8xf32>
    %140 = vector.shape_cast %139 : vector<128x8xf32> to vector<8x16x8xf32>
    %141 = vector.extract_strided_slice %140 {offsets = [0, 0, 0], sizes = [8, 16, 4], strides = [1, 1, 1]} : vector<8x16x8xf32> to vector<8x16x4xf32>
    %142 = vector.extract_strided_slice %140 {offsets = [0, 0, 4], sizes = [8, 16, 4], strides = [1, 1, 1]} : vector<8x16x8xf32> to vector<8x16x4xf32>
    %c0_101 = arith.constant 0 : index
    %c0_102 = arith.constant 0 : index
    %c0_103 = arith.constant 0 : index
    %c0_104 = arith.constant 0 : index
    %143 = vector.load %arg2[%c0_101, %c0_102, %c0_103, %c0_104] : memref<1x8x16x4xf32, #tpu.memory_space<vmem>>, vector<1x8x16x4xf32>
    %144 = vector.shape_cast %143 : vector<1x8x16x4xf32> to vector<8x16x4xf32>
    %c0_105 = arith.constant 0 : index
    %c0_106 = arith.constant 0 : index
    %145 = vector.load %arg4[%c0_105, %c0_106] : memref<1x4xf32, #tpu.memory_space<vmem>>, vector<1x4xf32>
    %146 = vector.shape_cast %145 : vector<1x4xf32> to vector<1x1x4xf32>
    %147 = vector.broadcast %146 : vector<1x1x4xf32> to vector<8x16x4xf32>
    %148 = arith.subf %144, %147 : vector<8x16x4xf32>
    %c0_107 = arith.constant 0 : index
    %c0_108 = arith.constant 0 : index
    %149 = vector.load %arg5[%c0_107, %c0_108] : memref<1x4xf32, #tpu.memory_space<vmem>>, vector<1x4xf32>
    %150 = vector.shape_cast %149 : vector<1x4xf32> to vector<1x1x4xf32>
    %151 = vector.broadcast %150 : vector<1x1x4xf32> to vector<8x16x4xf32>
    %152 = arith.mulf %148, %151 : vector<8x16x4xf32>
    %cst_109 = arith.constant 1.000000e+00 : f32
    %153 = vector.broadcast %cst_109 : f32 to vector<8x16x4xf32>
    %154 = arith.addf %153, %141 : vector<8x16x4xf32>
    %155 = arith.mulf %152, %154 : vector<8x16x4xf32>
    %156 = arith.addf %155, %142 : vector<8x16x4xf32>
    %c0_110 = arith.constant 0 : index
    %c0_111 = arith.constant 0 : index
    %c0_112 = arith.constant 0 : index
    %c0_113 = arith.constant 0 : index
    %157 = vector.load %arg10[%c0_110, %c0_111, %c0_112, %c0_113] : memref<1x8x16x4xf32, #tpu.memory_space<vmem>>, vector<1x8x16x4xf32>
    %158 = vector.shape_cast %157 : vector<1x8x16x4xf32> to vector<8x16x4xf32>
    %159 = vector.shape_cast %156 : vector<8x16x4xf32> to vector<1x8x16x4xf32>
    tpu.vector_store %arg10[%c0_110, %c0_111, %c0_112, %c0_113], %159 {strides = array<i32>} : memref<1x8x16x4xf32, #tpu.memory_space<vmem>>, vector<1x8x16x4xf32>,
    return
  }
  func.func @transform_0(%arg0: i32, %arg1: i32) -> (i32, i32, i32, i32) {
    %c0_i32 = arith.constant 0 : i32
    %c0_i32_0 = arith.constant 0 : i32
    %c0_i32_1 = arith.constant 0 : i32
    return %arg0, %arg1, %c0_i32, %c0_i32_0 : i32, i32, i32, i32
  }
  func.func @transform_1(%arg0: i32, %arg1: i32) -> (i32, i32, i32, i32, i32) {
    %c0_i32 = arith.constant 0 : i32
    %c0_i32_0 = arith.constant 0 : i32
    %c0_i32_1 = arith.constant 0 : i32
    %c0_i32_2 = arith.constant 0 : i32
    return %arg0, %arg1, %c0_i32, %c0_i32_0, %c0_i32_1 : i32, i32, i32, i32, i32
  }
  func.func @transform_2(%arg0: i32, %arg1: i32) -> (i32, i32) {
    %c0_i32 = arith.constant 0 : i32
    %c0_i32_0 = arith.constant 0 : i32
    %c0_i32_1 = arith.constant 0 : i32
    return %c0_i32, %c0_i32_0 : i32, i32
  }
  func.func @transform_3(%arg0: i32, %arg1: i32) -> (i32, i32) {
    %c0_i32 = arith.constant 0 : i32
    %c0_i32_0 = arith.constant 0 : i32
    %c0_i32_1 = arith.constant 0 : i32
    return %c0_i32, %c0_i32_0 : i32, i32
  }
  func.func @transform_4(%arg0: i32, %arg1: i32) -> (i32, i32, i32, i32) {
    %c0_i32 = arith.constant 0 : i32
    %c0_i32_0 = arith.constant 0 : i32
    %c0_i32_1 = arith.constant 0 : i32
    %c0_i32_2 = arith.constant 0 : i32
    %c0_i32_3 = arith.constant 0 : i32
    return %c0_i32, %c0_i32_0, %c0_i32_1, %c0_i32_2 : i32, i32, i32, i32
  }
  func.func @transform_5(%arg0: i32, %arg1: i32) -> (i32, i32) {
    %c0_i32 = arith.constant 0 : i32
    %c0_i32_0 = arith.constant 0 : i32
    %c0_i32_1 = arith.constant 0 : i32
    return %c0_i32, %c0_i32_0 : i32, i32
  }
  func.func @transform_6(%arg0: i32, %arg1: i32) -> (i32, i32, i32, i32) {
    %c0_i32 = arith.constant 0 : i32
    %c0_i32_0 = arith.constant 0 : i32
    %c0_i32_1 = arith.constant 0 : i32
    %c0_i32_2 = arith.constant 0 : i32
    %c0_i32_3 = arith.constant 0 : i32
    return %c0_i32, %c0_i32_0, %c0_i32_1, %c0_i32_2 : i32, i32, i32, i32
  }
  func.func @transform_7(%arg0: i32, %arg1: i32) -> (i32, i32) {
    %c0_i32 = arith.constant 0 : i32
    %c0_i32_0 = arith.constant 0 : i32
    %c0_i32_1 = arith.constant 0 : i32
    return %c0_i32, %c0_i32_0 : i32, i32
  }
  func.func @transform_8(%arg0: i32, %arg1: i32) -> (i32, i32, i32, i32) {
    %c0_i32 = arith.constant 0 : i32
    %c0_i32_0 = arith.constant 0 : i32
    %c0_i32_1 = arith.constant 0 : i32
    return %arg0, %arg1, %c0_i32, %c0_i32_0 : i32, i32, i32, i32
  }
}

</mosaic_0001>

<bundles_post_ra>
// kernel: spade_forward.1
= control target key start
LH: loop header
LB: loop body
LE: loop exit
PB: predicated region body
PF: predicated region fallthrough
CT: control target
= control target key end

     0   :  { %s8439_s0 = inlined_call_operand.hbm [shape: f32[2,16,16,4], index: 0, kind: input, shape index: {}]   ;;  %s8440_s1 = inlined_call_operand.hbm [shape: bf16[2,2,12,18,3], index: 1, kind: input, shape index: {}]   ;;  %s8441_s2 = inlined_call_operand.hbm [shape: f32[1,4], index: 2, kind: input, shape index: {}]   ;;  %s8442_s3 = inlined_call_operand.hbm [shape: f32[1,4], index: 3, kind: input, shape index: {}]   ;;  %s8443_s4 = inlined_call_operand.hbm [shape: bf16[3,3,3,128], index: 4, kind: input, shape index: {}]   ;;  %s8444_s5 = inlined_call_operand.hbm [shape: f32[1,128], index: 5, kind: input, shape index: {}]   ;;  %s8445_s6 = inlined_call_operand.hbm [shape: bf16[3,3,128,8], index: 6, kind: input, shape index: {}]   ;;  %s8446_s7 = inlined_call_operand.hbm [shape: f32[1,8], index: 7, kind: input, shape index: {}]   ;;  %s8447_s8 = inlined_call_operand.hbm [shape: f32[2,16,16,4], index: 8, kind: output, shape index: {}]  }
   0x1   :  { %8467 = sst [smem:[#allocation34_spill]] %s8439_s0 }
   0x2   :  { %8468 = sst [smem:[#allocation35_spill]] %s8441_s2 }
   0x3   :  { %8469 = sst [smem:[#allocation36_spill]] %s8442_s3 }
   0x4   :  { %8470 = sst [smem:[#allocation37_spill]] %s8443_s4 }
   0x5   :  { %8471 = sst [smem:[#allocation38_spill]] %s8444_s5 }
   0x6   :  { %8472 = sst [smem:[#allocation39_spill]] %s8445_s6 }
   0x7   :  { %8473 = sst [smem:[#allocation40_spill]] %s8446_s7 }
   0x8   :  { %8474 = sst [smem:[#allocation41_spill]] %s8447_s8 }
   0x9   :  { %13 = vsyncpa [#allocation3], 0 }
   0xa   :  { %15 = vsyncpa [#allocation3 + $0x1], 0 }
   0xb   :  { %16 = vsyncpa [#allocation6], 0 }
   0xc   :  { %18 = vsyncpa [#allocation6 + $0x1], 0 }
   0xd   :  { %19 = vsyncpa [#allocation9], 0 }
   0xe   :  { %20 = vsyncpa [#allocation12], 0 }
   0xf   :  { %21 = vsyncpa [#allocation15], 0 }
  0x10   :  { %22 = vsyncpa [#allocation4], 0 }
  0x11   :  { %24 = vsyncpa [#allocation4 + $0x1], 0  ;;  %s6722_s27 = smov 0   ;;  %s6724_s28 = smov 0  }
  0x12   :  { %s6726_s29 = smov 0   ;;  %s6728_s30 = smov 0  }
  0x13   :  { %s6730_s9 = smov 0   ;;  %s6732_s10 = smov 0  }
  0x14   :  { %s6734_s11 = smov 0   ;;  %s6736_s12 = smov 0  }
  0x15 LB: > { %8475 = sst [smem:[#allocation24_spill]] %s6643_s9  ;;  %s6763_s13 = sadd.s32 4294967295, %s6655_s12   ;;  %s6655_s12 = sphi %s6736_s12, %s30_s12   ;;  %s6651_s11 = sphi %s6734_s11, %s8564_s11   ;;  %s6647_s10 = sphi %s6732_s10, %s8563_s10   ;;  %s6643_s9 = sphi %s6730_s9, %s8562_s9   ;;  %s6639_s30 = sphi %s6728_s30, %s8561_s30   ;;  %s6635_s29 = sphi %s6726_s29, %s8560_s29   ;;  %s6631_s28 = sphi %s6724_s28, %s8559_s28   ;;  %s6627_s27 = sphi %s6722_s27, %s8558_s27  }
  0x16   : > { %p4707_p0 = scmp.ge.s32.totalorder %s6655_s12, 1  ;;  %p8448_p1 = scmp.eq.s32.totalorder %s6763_s13, 0 }
  0x17   : > { %p257_p2 = scmp.lt.s32.totalorder %s6655_s12, 5  ;;  %s6657_s15 = smov [#allocation7]  }
  0x18   : > { %s270_s16 = sshll.u32 %s6657_s15, 4  ;;  %s6658_s17 = smov [#allocation8]   ;;  %s271_s16 = int_to_ptr.vmem [resolvable:$true] %s270_s16 }
  0x19   : > { %p6768_p3 = pnand %p4707_p0, %p257_p2  ;;  %s281_s18 = sshll.u32 %s6658_s17, 4  ;;  %s6780_s18 = int_to_ptr.vmem [resolvable:$true] %s281_s18 }
  0x1a   : > { %s6659_s20 = smov [#allocation11]   ;;  %s8478_s2 = sld [smem:[#allocation35_spill]] }
  0x1b   : > { %s8476_s14 = scalar_select %p6768_p3, 1, 0 }
  0x1c   : > { %p6100_p4 = pneg %p6768_p3  ;;  %s305_s21 = sshll.u32 %s6659_s20, 4  ;;  %s6782_s21 = int_to_ptr.vmem [resolvable:$true] %s305_s21 }
  0x1e   : > { %p6776_p5 = pnand %p6100_p4, %p8448_p1 }
  0x20   : > { %s6309_s24 = scalar_lea.hbm %s8478_s2, 16  ;;  %p6792_p7 = pneg %p6776_p5 }
  0x21   : > { %p6310_p6 = scmp.ne.s32.totalorder %s8478_s2, %s6309_s24  ;;  %p6316_p10 = scmp.lt.u32.totalorder %s6309_s24, %s8478_s2 }
  0x23   : > { %p6312_p8 = pnand %p6792_p7, %p6310_p6 }
  0x25   : > { %p6313_p9 = pneg %p6312_p8 }
  0x27   : > { %p6318_p11 = pnand %p6316_p10, %p6313_p9 }
  0x29   : > { %6321 = shalt.err (!%p6318_p11)
}
  0x2a   : > { %s6322_s22 = scalar_lea.vmem %s271_s16, 16  ;;  %s6329_s23 = scalar_lea.vmem %s271_s16, 32 }
  0x2b   : > { %p6323_p12 = scmp.ne.s32.totalorder %s271_s16, %s6322_s22  ;;  %p6330_p2 = scmp.lt.s32.totalorder %s271_s16, %s271_s16 }
  0x2c   : > { %p6331_p4 = scmp.lt.s32.totalorder %s6329_s23, %s6322_s22 }
  0x2d   : > { %p6325_p13 = pnand %p6323_p12, %p6792_p7 }
  0x2e   : > { %p6332_p1 = por %p6331_p4, %p6330_p2 }
  0x2f   : > { %p6326_p0 = pneg %p6325_p13 }
  0x31   : > { %p6333_p3 = pnand %p6332_p1, %p6326_p0 }
  0x33   : > { %6336 = shalt.err (!%p6333_p3)
}
  0x34   : > { %6103 = dma.hbm_to_vmem [thread:$0]  (!%p6776_p5), %s8478_s2, 16, %s271_s16, [#allocation6]  }
  0x35   : > { %s8480_s3 = sld [smem:[#allocation36_spill]] }
  0x3b   : > { %s6337_s20 = scalar_lea.hbm %s8480_s3, 16 }
  0x3c   : > { %p6338_p6 = scmp.ne.s32.totalorder %s8480_s3, %s6337_s20  ;;  %p6344_p1 = scmp.lt.u32.totalorder %s6337_s20, %s8480_s3 }
  0x3e   : > { %p6340_p8 = pnand %p6338_p6, %p6792_p7 }
  0x40   : > { %p6341_p9 = pneg %p6340_p8 }
  0x42   : > { %p6346_p3 = pnand %p6344_p1, %p6341_p9 }
  0x44   : > { %6349 = shalt.err (!%p6346_p3)
}
  0x45   : > { %s6350_s16 = scalar_lea.vmem %s6780_s18, 16  ;;  %s6357_s8 = scalar_lea.vmem %s6780_s18, 32 }
  0x46   : > { %p6351_p10 = scmp.ne.s32.totalorder %s6780_s18, %s6350_s16  ;;  %p6358_p13 = scmp.lt.s32.totalorder %s6780_s18, %s6780_s18 }
  0x47   : > { %p6359_p0 = scmp.lt.s32.totalorder %s6357_s8, %s6350_s16 }
  0x48   : > { %p6353_p11 = pnand %p6351_p10, %p6792_p7 }
  0x49   : > { %p6360_p2 = por %p6359_p0, %p6358_p13 }
  0x4a   : > { %p6354_p12 = pneg %p6353_p11 }
  0x4c   : > { %p6361_p4 = pnand %p6360_p2, %p6354_p12 }
  0x4e   : > { %6364 = shalt.err (!%p6361_p4)
}
  0x4f   : > { %6106 = dma.hbm_to_vmem [thread:$0]  (!%p6776_p5), %s8480_s3, 16, %s6780_s18, [#allocation9]  }
  0x50   : > { %s8481_s5 = sld [smem:[#allocation38_spill]] }
  0x56   : > { %s6365_s17 = scalar_lea.hbm %s8481_s5, 16 }
  0x57   : > { %p6366_p6 = scmp.ne.s32.totalorder %s8481_s5, %s6365_s17  ;;  %p6372_p1 = scmp.lt.u32.totalorder %s6365_s17, %s8481_s5 }
  0x59   : > { %p6368_p8 = pnand %p6366_p6, %p6792_p7 }
  0x5b   : > { %p6369_p9 = pneg %p6368_p8 }
  0x5d   : > { %p6374_p3 = pnand %p6372_p1, %p6369_p9 }
  0x5f   : > { %6377 = shalt.err (!%p6374_p3)
}
  0x60   : > { %s6378_s18 = scalar_lea.vmem %s6782_s21, 16  ;;  %s6385_s8 = scalar_lea.vmem %s6782_s21, 32 }
  0x61   : > { %p6379_p10 = scmp.ne.s32.totalorder %s6782_s21, %s6378_s18  ;;  %p6386_p13 = scmp.lt.s32.totalorder %s6782_s21, %s6782_s21 }
  0x62   : > { %p6387_p0 = scmp.lt.s32.totalorder %s6385_s8, %s6378_s18 }
  0x63   : > { %p6381_p11 = pnand %p6379_p10, %p6792_p7 }
  0x64   : > { %p6388_p2 = por %p6387_p0, %p6386_p13 }
  0x65   : > { %p6382_p12 = pneg %p6381_p11 }
  0x67   : > { %p6389_p4 = pnand %p6388_p2, %p6382_p12 }
  0x69   : > { %6392 = shalt.err (!%p6389_p4)
}
  0x6a   : > { %6112 = dma.hbm_to_vmem [thread:$0]  (!%p6776_p5), %s8481_s5, 16, %s6782_s21, [#allocation12]  }
  0x6b   : > { %s6660_s26 = smov [#allocation10]   ;;  %s8482_s4 = sld [smem:[#allocation37_spill]] }
  0x6c   : > { %s291_s24 = sshll.u32 %s6660_s26, 4  ;;  %s292_s24 = int_to_ptr.vmem [resolvable:$true] %s291_s24 }
  0x71   : > { %s6393_s22 = scalar_lea.hbm %s8482_s4, 288 }
  0x72   : > { %p6394_p6 = scmp.ne.s32.totalorder %s8482_s4, %s6393_s22  ;;  %p6400_p1 = scmp.lt.u32.totalorder %s6393_s22, %s8482_s4 }
  0x74   : > { %p6396_p8 = pnand %p6394_p6, %p6792_p7 }
  0x76   : > { %p6397_p9 = pneg %p6396_p8 }
  0x78   : > { %p6402_p3 = pnand %p6400_p1, %p6397_p9 }
  0x7a   : > { %6405 = shalt.err (!%p6402_p3)
}
  0x7b   : > { %s6406_s21 = scalar_lea.vmem %s292_s24, 288  ;;  %p6414_p13 = scmp.lt.s32.totalorder %s292_s24, %s292_s24 }
  0x7c   : > { %p6407_p10 = scmp.ne.s32.totalorder %s292_s24, %s6406_s21  ;;  %p6415_p0 = scmp.lt.s32.totalorder %s6406_s21, %s6406_s21 }
  0x7e   : > { %p6409_p11 = pnand %p6407_p10, %p6792_p7  ;;  %p6416_p2 = por %p6415_p0, %p6414_p13 }
  0x80   : > { %p6410_p12 = pneg %p6409_p11 }
  0x82   : > { %p6417_p4 = pnand %p6416_p2, %p6410_p12 }
  0x84   : > { %6420 = shalt.err (!%p6417_p4)
}
  0x85   : > { %s6661_s9 = smov 32   ;;  %s6662_s25 = smov 2  }
  0x86   : > { %6109 = dma.hbm_to_vmem [thread:$0]  (!%p6776_p5), %s8482_s4, 288, %s292_s24, [#allocation9], %s6661_s9, %s6661_s9, %s6662_s25  }
  0x87   : > { %s6663_s20 = smov [#allocation13]   ;;  %s8483_s6 = sld [smem:[#allocation39_spill]] }
  0x88   : > { %s315_s22 = sshll.u32 %s6663_s20, 4  ;;  %s316_s22 = int_to_ptr.vmem [resolvable:$true] %s315_s22 }
  0x8d   : > { %s6421_s18 = scalar_lea.hbm %s8483_s6, 9216 }
  0x8e   : > { %p6422_p6 = scmp.ne.s32.totalorder %s8483_s6, %s6421_s18  ;;  %p6428_p1 = scmp.lt.u32.totalorder %s6421_s18, %s8483_s6 }
  0x90   : > { %p6424_p8 = pnand %p6422_p6, %p6792_p7 }
  0x92   : > { %p6425_p9 = pneg %p6424_p8 }
  0x94   : > { %p6430_p3 = pnand %p6428_p1, %p6425_p9 }
  0x96   : > { %6433 = shalt.err (!%p6430_p3)
}
  0x97   : > { %s6434_s24 = scalar_lea.vmem %s316_s22, 9216  ;;  %p6442_p13 = scmp.lt.s32.totalorder %s316_s22, %s316_s22 }
  0x98   : > { %p6435_p10 = scmp.ne.s32.totalorder %s316_s22, %s6434_s24  ;;  %p6443_p0 = scmp.lt.s32.totalorder %s6434_s24, %s6434_s24 }
  0x9a   : > { %p6437_p11 = pnand %p6435_p10, %p6792_p7  ;;  %p6444_p2 = por %p6443_p0, %p6442_p13 }
  0x9c   : > { %p6438_p12 = pneg %p6437_p11 }
  0x9e   : > { %p6445_p4 = pnand %p6444_p2, %p6438_p12 }
  0xa0   : > { %6448 = shalt.err (!%p6445_p4)
}
  0xa1   : > { %s8451_s9 = smov 64   ;;  %s8452_s25 = smov 4  }
  0xa2   : > { %6115 = dma.hbm_to_vmem [thread:$0]  (!%p6776_p5), %s8483_s6, 9216, %s316_s22, [#allocation12], %s8451_s9, %s8451_s9, %s8452_s25  }
  0xa3   : > { %s6666_s26 = smov [#allocation14]   ;;  %s8484_s7 = sld [smem:[#allocation40_spill]] }
  0xa4   : > { %s329_s17 = sshll.u32 %s6666_s26, 4  ;;  %s330_s17 = int_to_ptr.vmem [resolvable:$true] %s329_s17 }
  0xa9   : > { %s6449_s16 = scalar_lea.hbm %s8484_s7, 16 }
  0xaa   : > { %p6450_p6 = scmp.ne.s32.totalorder %s8484_s7, %s6449_s16  ;;  %p6456_p1 = scmp.lt.u32.totalorder %s6449_s16, %s8484_s7 }
  0xac   : > { %p6452_p8 = pnand %p6450_p6, %p6792_p7 }
  0xae   : > { %p6453_p9 = pneg %p6452_p8 }
  0xb0   : > { %p6458_p3 = pnand %p6456_p1, %p6453_p9 }
  0xb2   : > { %6461 = shalt.err (!%p6458_p3)
}
  0xb3   : > { %s6462_s22 = scalar_lea.vmem %s330_s17, 16  ;;  %s6469_s2 = scalar_lea.vmem %s330_s17, 32 }
  0xb4   : > { %p6463_p10 = scmp.ne.s32.totalorder %s330_s17, %s6462_s22  ;;  %p6470_p13 = scmp.lt.s32.totalorder %s330_s17, %s330_s17 }
  0xb5   : > { %p6471_p0 = scmp.lt.s32.totalorder %s6469_s2, %s6462_s22 }
  0xb6   : > { %p6465_p11 = pnand %p6463_p10, %p6792_p7 }
  0xb7   : > { %p6472_p2 = por %p6471_p0, %p6470_p13 }
  0xb8   : > { %p6466_p12 = pneg %p6465_p11 }
  0xba   : > { %p6473_p4 = pnand %p6472_p2, %p6466_p12 }
  0xbc   : > { %6476 = shalt.err (!%p6473_p4)
}
  0xbd   : > { %6118 = dma.hbm_to_vmem [thread:$0]  (!%p6776_p5), %s8484_s7, 16, %s330_s17, [#allocation15]  }
  0xbe   : > { %s4706_s15 = sadd.s32 4294967294, %s6655_s12   ;;  %s39_s20 = sadd.s32 1, %s6647_s10 }
  0xbf   : > { %p40_p7 = scmp.ge.s32.totalorder %s39_s20, 2  ;;  %s42_s19 = sadd.s32 1, %s6651_s11 }
  0xc0   : > { %s51_s23 = sadd.s32 1, %s6635_s29  ;;  %p58_p6 = scmp.ne.s32.totalorder %s6635_s29, %s6631_s28 }
  0xc1   : > { %s8566_s20 = smov (%p40_p7, %s39_s20), 0  ;;  %s8568_s19 = smov (!%p40_p7, %s42_s19), %s6651_s11 }
  0xc2   : > { %8485 = sst [smem:[#allocation25_spill]] %s8566_s20  ;;  %s47_s16 = ssub.s32 %s6647_s10, %s8566_s20 }
  0xc3   : > { %p59_p8 = scmp.eq.s32.totalorder %s6655_s12, 0  ;;  %p44_p9 = scmp.ge.s32.totalorder %s8568_s19, 2 }
  0xc4   : > { %p64_p5 = scmp.ne.s32.totalorder %s6631_s28, %s6627_s27  ;;  %p244_p3 = scmp.eq.s32.totalorder %s6763_s13, 3 }
  0xc5   : > { %p6927_p1 = por %p59_p8, %p58_p6  ;;  %s8570_s19 = smov (%p44_p9, %s8568_s19), 0 }
  0xc6   : > { %8487 = sst [smem:[#allocation26_spill]] %s8570_s19  ;;  %p8488_p10 = scmp.eq.s32.totalorder %s6763_s13, 0 }
  0xc7   : > { %p6940_p12 = por %p244_p3, %p58_p6  ;;  %s46_s21 = ssub.s32 %s6651_s11, %s8570_s19 }
  0xc8   : > { %p6936_p11 = por %p8488_p10, %p64_p5  ;;  %p250_p13 = scmp.eq.s32.totalorder %s4706_s15, 3 }
  0xc9   : > { %s8490_s8 = scalar_select %p6940_p12, 1, 0 }
  0xca   : > { %s48_s24 = sor.u32 %s47_s16, %s46_s21  ;;  %p6136_p0 = scmp.lt.s32.totalorder %s6655_s12, 4 }
  0xcb   : > { %p49_p2 = scmp.eq.s32.totalorder %s48_s24, 0  ;;  %p6947_p4 = por %p250_p13, %p64_p5 }
  0xcc   : > { %s6952_s2 = sand.u32 1, %s6635_s29   ;;  %s5047_s3 = sshll.u32 %s6647_s10, 4 }
  0xcd   : > { %s8491_s22 = scalar_select %p6947_p4, 1, 0 }
  0xce   : > { %s6956_s26 = scalar_select %p49_p2, %s6635_s29, %s51_s23  }
  0xcf   : > { %s4715_s9 = sshll.u32 %s6952_s2, 7  ;;  %s4718_s25 = sshll.u32 %s6651_s11, 5 }
  0xd0   : > { %8492 = sst [smem:[#allocation27_spill]] %s6956_s26  ;;  %s351_s4 = sadd.s32 %s5047_s3, %s4718_s25 }
  0xd1   : > { %s344_s15 = scalar_lea.vmem [#allocation2], %s4715_s9  ;;  %s4719_s6 = sshll.u32 %s351_s4, 7 }
  0xd2   : > { %s354_s5 = sshll.u32 %s344_s15, 4  ;;  %s8493_s0 = sld [smem:[#allocation34_spill]]  ;;  %s6960_s5 = int_to_ptr.vmem [resolvable:$true] %s354_s5 }
  0xd3   : > { %p6971_p7 = pnand %p6136_p0, %p6927_p1  ;;  %s341_s4 = scalar_lea.sflag [#allocation3], %s6952_s2 }
  0xd5   : > { %p6479_p8 = pneg %p6971_p7 }
  0xd8   : > { %s6965_s24 = scalar_lea.hbm %s8493_s0, %s4719_s6  ;;  %s6482_s17 = scalar_lea.hbm %s8493_s0, 8192 }
  0xd9   : > { %s6477_s9 = scalar_lea.hbm %s6965_s24, 2048  ;;  %p6483_p1 = scmp.lt.u32.totalorder %s6965_s24, %s8493_s0 }
  0xda   : > { %p6478_p6 = scmp.ne.s32.totalorder %s6965_s24, %s6477_s9  ;;  %p6484_p3 = scmp.lt.u32.totalorder %s6482_s17, %s6477_s9 }
  0xdb   : > { %p6486_p13 = scmp.lt.u32.totalorder %s6477_s9, %s6965_s24 }
  0xdc   : > { %p6480_p9 = pnand %p6479_p8, %p6478_p6  ;;  %p6485_p10 = por %p6484_p3, %p6483_p1 }
  0xde   : > { %p6481_p5 = pneg %p6480_p9  ;;  %p6487_p0 = por %p6486_p13, %p6485_p10 }
  0xe0   : > { %p6488_p2 = pnand %p6487_p0, %p6481_p5 }
  0xe2   : > { %6491 = shalt.err (!%p6488_p2)
}
  0xe3   : > { %s6492_s16 = scalar_lea.vmem %s6960_s5, 2048  ;;  %s6667_s21 = smov [#allocation2]  }
  0xe4   : > { %p6493_p6 = scmp.ne.s32.totalorder %s6960_s5, %s6492_s16  ;;  %s6497_s6 = sshll.u32 %s6667_s21, 4  ;;  %s6498_s6 = int_to_ptr.vmem [resolvable:$false] %s6497_s6 }
  0xe5   : > { %s6499_s25 = scalar_lea.vmem %s6498_s6, 4096  ;;  %p6500_p12 = scmp.lt.s32.totalorder %s6960_s5, %s6498_s6 }
  0xe6   : > { %p6495_p9 = pnand %p6493_p6, %p6479_p8  ;;  %p6501_p1 = scmp.lt.s32.totalorder %s6499_s25, %s6492_s16 }
  0xe8   : > { %p6496_p4 = pneg %p6495_p9  ;;  %p6502_p3 = por %p6501_p1, %p6500_p12 }
  0xea   : > { %p6503_p10 = pnand %p6502_p3, %p6496_p4 }
  0xec   : > { %6506 = shalt.err (!%p6503_p10)
}
  0xed   : > { %s6668_s9 = smov 128   ;;  %s6669_s17 = smov 8  }
  0xee   : > { %6122 = dma.hbm_to_vmem [thread:$0]  (!%p6971_p7), %s6965_s24, 2048, %s6960_s5, %s341_s4, %s6668_s9, %s6668_s9, %s6669_s17  }
  0xef   : > { %s364_s3 = sand.u32 1, %s6655_s12   ;;  %s6066_s15 = smul.u32 144, %s6952_s2 }
  0xf0   : > { %s6067_s16 = smul.u32 36, %s6647_s10  ;;  %s7014_s5 = scalar_lea.sflag [#allocation6], %s364_s3 }
  0xf1   : > { %s6068_s21 = smul.u32 72, %s6651_s11  ;;  %s368_s6 = scalar_lea.vmem [#allocation5], %s6066_s15 }
  0xf2   : > { %s377_s25 = sshll.u32 %s368_s6, 4  ;;  %s7007_s25 = int_to_ptr.vmem [resolvable:$true] %s377_s25 }
  0xf3   : > { %s374_s0 = sadd.s32 %s6068_s21, %s6067_s16 }
  0xf4   : > { %s4720_s7 = sshll.u32 %s374_s0, 6  ;;  %s6512_s0 = scalar_lea.hbm %s8440_s1, 9216 }
  0xf5   : > { %s7012_s26 = scalar_lea.hbm %s8440_s1, %s4720_s7 }
  0xf6   : > { %s6507_s2 = scalar_lea.hbm %s7012_s26, 2304  ;;  %p6513_p13 = scmp.lt.u32.totalorder %s7012_s26, %s8440_s1 }
  0xf7   : > { %p6508_p12 = scmp.ne.s32.totalorder %s7012_s26, %s6507_s2  ;;  %p6514_p0 = scmp.lt.u32.totalorder %s6512_s0, %s6507_s2 }
  0xf8   : > { %p6516_p6 = scmp.lt.u32.totalorder %s6507_s2, %s7012_s26 }
  0xf9   : > { %p6510_p4 = pnand %p6508_p12, %p6479_p8  ;;  %p6515_p2 = por %p6514_p0, %p6513_p13 }
  0xfb   : > { %p6511_p5 = pneg %p6510_p4  ;;  %p6517_p9 = por %p6516_p6, %p6515_p2 }
  0xfd   : > { %p6518_p1 = pnand %p6517_p9, %p6511_p5 }
  0xff   : > { %6521 = shalt.err (!%p6518_p1)
}
 0x100   : > { %s6522_s7 = scalar_lea.vmem %s7007_s25, 2304  ;;  %s6670_s19 = smov [#allocation5]  }
 0x101   : > { %p6523_p3 = scmp.ne.s32.totalorder %s7007_s25, %s6522_s7  ;;  %s6527_s17 = sshll.u32 %s6670_s19, 4  ;;  %s6528_s17 = int_to_ptr.vmem [resolvable:$false] %s6527_s17 }
 0x102   : > { %s6529_s3 = scalar_lea.vmem %s6528_s17, 4608  ;;  %p6530_p4 = scmp.lt.s32.totalorder %s7007_s25, %s6528_s17 }
 0x103   : > { %p6525_p10 = pnand %p6523_p3, %p6479_p8  ;;  %p6531_p13 = scmp.lt.s32.totalorder %s6529_s3, %s6522_s7 }
 0x105   : > { %p6526_p12 = pneg %p6525_p10  ;;  %p6532_p0 = por %p6531_p13, %p6530_p4 }
 0x107   : > { %p6533_p2 = pnand %p6532_p0, %p6526_p12 }
 0x109   : > { %6536 = shalt.err (!%p6533_p2)
}
 0x10a   : > { %s8495_s15 = smov 4   ;;  %s8496_s16 = smov 64  }
 0x10b   : > { %6125 = dma.hbm_to_vmem [thread:$0]  (!%p6971_p7), %s7012_s26, 2304, %s7007_s25, %s7014_s5, %s8496_s16, %s8496_s16, %s8495_s15  }
 0x10c   : > { %p8497_p8 = scmp.ne.s32.totalorder %s8476_s14, 0 }
 0x10e   : > { %389 = sbr.rel (%p8497_p8) target bundleno = 1466 (0x5ba), region = 52 }
 0x115   : > { %s7046_s21 = sand.u32 1, %s6631_s28  }
 0x116   : > { %s4722_s6 = sshll.u32 %s7046_s21, 7  ;;  %s392_s2 = scalar_lea.sflag [#allocation3], %s7046_s21 }
 0x117   : > { %s7052_s23 = scalar_lea.vmem [#allocation2], %s4722_s6 }
 0x118   : > { %6598 = dma.done.wait (%p6936_p11), %s392_s2, 2048  }
 0x119   : > { %6600 = vsyncadd (%p6936_p11), %s392_s2, 4294965248  ;;  %s400_s14 = sand.u32 1, %s6763_s13   ;;  %s6069_s26 = smul.u32 144, %s7046_s21 }
 0x11a   : > { %s401_s25 = scalar_lea.sflag [#allocation6], %s400_s14 }
 0x11b   : > { %s7060_s5 = scalar_lea.vmem [#allocation5], %s6069_s26 }
 0x11c   : > { %6602 = dma.done.wait (%p6936_p11), %s401_s25, 2304  }
 0x11d   : > { %6604 = vsyncadd (%p6936_p11), %s401_s25, 4294964992  ;;  %p8498_p7 = scmp.eq.s32.totalorder %s6763_s13, 0 }
 0x11f   : > { %6606 = dma.done.wait (%p8498_p7), [#allocation6], 16   ;;  %p8499_p5 = pmov %p8498_p7 }
 0x121   : > { %6608 = vsyncadd (%p8499_p5), [#allocation6], 4294967280  ;;  %p8500_p6 = pmov %p8499_p5 }
 0x122   : > { %p8501_p9 = pmov %p8499_p5 }
 0x123   : > { %6610 = dma.done.wait (%p8500_p6), [#allocation9], 304  }
 0x124   : > { %6612 = vsyncadd (%p8501_p9), [#allocation9], 4294966992  ;;  %p8502_p1 = pmov %p8499_p5 }
 0x126   : > { %6614 = dma.done.wait (%p8502_p1), [#allocation12], 9232   ;;  %p8503_p3 = pmov %p8502_p1 }
 0x127   : > { %p8504_p11 = pmov %p8502_p1 }
 0x128   : > { %6616 = vsyncadd (%p8503_p3), [#allocation12], 4294958064 }
 0x129   : > { %6618 = dma.done.wait (%p8504_p11), [#allocation15], 16   ;;  %p8505_p10 = pmov %p8502_p1 }
 0x12a   : > { %vm812_vm0 = vcmask 1040384   ;;  %vm813_vm1 = vcmask 1041408   ;;  %v6671_v0 = vmov 65535   ;;  %v505_v3 = vld [vmem:[#allocation10] sm:$0x3]  ;;  %vm781_vm2 = vcmask 23552  }
 0x12b   : > { %6620 = vsyncadd (%p8505_p10), [#allocation15], 4294967280  ;;  %v814_v1 = vsel %vm812_vm0, 4294967295, %v6671_v0  ;;  %v7086_v4 = vld [vmem:[%s7060_s5] sm:$0xf]  ;;  %vm1138_vm5 = vcmask 1042432  }
 0x12c   : > { %v7083_v2 = vsel %vm813_vm1, %v814_v1, 0  ;;  %8506 = vst [vmem:[#allocation28_spill] sm:$0xff] %v7086_v4  ;;  %v7089_v5 = vld [vmem:[%s7060_s5 + $0x4] sm:$0xf]  ;;  %v7093_v7 = vld [vmem:[%s7060_s5 + $0xc] sm:$0xf]  ;;  %vm8014_vm13 = vmneg %vm812_vm0 }
 0x12d   : > { %8507 = vst [vmem:[#allocation29_spill] sm:$0xff] %v7089_v5  ;;  %v1013_v6 = vand.u32 %v7083_v2, %v505_v3  ;;  %v4750_v8 = vcombine.low %v7086_v4, %v7089_v5  ;;  %v7098_v9 = vld [vmem:[%s7060_s5 + $0x10] sm:$0xf]  ;;  %v1212_v11 = vld [vmem:[#allocation10 + $0x4] sm:$0x3]  ;;  %v1143_v20 = vrot.slane %v7089_v5, 5 }
 0x12e   : > { %v7102_v10 = vcombine.low %v7093_v7, %v7098_v9  ;;  %v1274_v12 = vand.u32 %v1212_v11, %v7083_v2  ;;  %v7107_v13 = vld [vmem:[%s7060_s5 + $0x18] sm:$0xf]  ;;  %v7110_v14 = vld [vmem:[%s7060_s5 + $0x1c] sm:$0xf]  ;;  %vm506_vm3 = vsmask.f32 3328 }
 0x12f   : > { %5314 = vmatprep.subr.bf16.mxu0 %v1013_v6  ;;  %5316 = vmatprep.mubr.msk.bf16.mxu0 %vm781_vm2, %v4750_v8  ;;  %v558_v15 = vshrl.u32 %v7107_v13, 16  ;;  %v561_v16 = vshll.u32 %v7107_v13, 16  ;;  %v567_v17 = vshll.u32 %v7110_v14, 16  ;;  %v571_v18 = vshrl.u32 %v7110_v14, 16  ;;  %v7129_v26 = vld [vmem:[%s7060_s5 + $0x24] sm:$0xf] }
 0x130   : > { %5315 = vmatpush3.bf16.msra.mxu0 %v1013_v6  ;;  %v7118_v19 = vcombine.low %v7107_v13, %v7110_v14  ;;  %vm507_vm4 = vsmask.f32 7440  ;;  %v1150_v21 = vrot.slane %v7098_v9, 5  ;;  %v7132_v27 = vld [vmem:[%s7060_s5 + $0x28] sm:$0xf]  ;;  %v4770_v31 = vrot.slane %v7086_v4, 9 }
 0x131   : > { %5336 = vmatprep.subr.bf16.mxu0 %v1274_v12  ;;  %v560_v22 = vrot.slane %v558_v15, 4  ;;  %v563_v23 = vrot.slane %v561_v16, 5  ;;  %v7124_v24 = vrot.slane %v567_v17, 5  ;;  %v573_v25 = vrot.slane %v571_v18, 4  ;;  %v7135_v29 = vld [vmem:[%s7060_s5 + $0x30] sm:$0xf]  ;;  %vm7153_vm7 = vmor %vm506_vm3, %vm507_vm4 }
 0x132   : > { %v7138_v30 = vld [vmem:[%s7060_s5 + $0x34] sm:$0xf]  ;;  %vm1139_vm6 = vcmask 1046532   ;;  %v4771_v35 = vrot.slane %v7093_v7, 9  ;;  %v7149_v37 = vcombine.low %v7129_v26, %v7132_v27  ;;  %v7159_v39 = vrot.slane %v1143_v20, 4  ;;  %v6243_v61 = vld [vmem:[#allocation13 + $0x70] sm:$0xff]  }
 0x133   : > { %5317 = vmatmul.mubr.msk.bf16.vlgmr.msra.gmra.mrb[0].mxu0 %vm781_vm2, %v7102_v10  ;;  %v564_v28 = vor.u32 %v563_v23, %v560_v22  ;;  %v7163_v40 = vrot.slane %v1150_v21, 4  ;;  %v574_v41 = vor.u32 %v573_v25, %v7124_v24  ;;  %v7168_v42 = vcombine.low %v7135_v29, %v7138_v30  ;;  %v7175_v47 = vld [vmem:[%s7060_s5 + $0x3c] sm:$0xf]  ;;  %v7180_v50 = vld [vmem:[%s7060_s5 + $0x40] sm:$0xf]  ;;  %vm7206_vm8 = vmor %vm1138_vm5, %vm1139_vm6  ;;  %p2388_p12 = scmp.gt.s32.totalorder %s6639_s30, 0 }
 0x134   : > { %5337 = vmatpush3.bf16.msra.mxu0 %v1274_v12  ;;  %5320 = vmatprep.mubr.msk.bf16.mxu0 %vm781_vm2, %v7118_v19  ;;  %v7192_v55 = vld [vmem:[%s7060_s5 + $0x48] sm:$0xf]  ;;  %v7195_v56 = vld [vmem:[%s7060_s5 + $0x4c] sm:$0xf]  ;;  %v7211_v62 = vld [vmem:[%s7060_s5 + $0x54] sm:$0xf]  ;;  %v7227_v12 = vcombine.low %v7175_v47, %v7180_v50  ;;  %v7249_v25 = vsel %vm7206_vm8, %v4770_v31, %v1143_v20  ;;  %v1151_v20 = vsel %vm7206_vm8, %v4771_v35, %v1150_v21 }
 0x135   : > { %v7145_v36 = vrot.slane %v564_v28, 4  ;;  %8510 = vst [vmem:[#allocation30_spill] sm:$0xff] %v7168_v42  ;;  %v7197_v57 = vrot.slane %v574_v41, 4  ;;  %v7214_v63 = vld [vmem:[%s7060_s5 + $0x58] sm:$0xf]  ;;  %v4772_v11 = vrot.slane %v7107_v13, 9  ;;  %v7239_v22 = vcombine.low %v7192_v55, %v7195_v56 }
 0x136   : > { %v1410_v0 = vld [vmem:[#allocation10 + $0x6] sm:$0x3]  ;;  %v7219_v6 = vld [vmem:[%s7060_s5 + $0x60] sm:$0xf]  ;;  %8513 = vst [vmem:[#allocation31_spill] sm:$0xff] %v7227_v12  ;;  %v1157_v18 = vrot.slane %v7110_v14, 5  ;;  %v7256_v41 = vcombine.low %v7211_v62, %v7214_v63 }
 0x137   : > { %v7222_v8 = vand.u32 %v1410_v0, %v7083_v2  ;;  %v7231_v16 = vld [vmem:[%s7060_s5 + $0x8] sm:$0x1]  ;;  %v7234_v17 = vld [vmem:[%s7060_s5 + $0x14] sm:$0x1]  ;;  %8515 = vst [vmem:[#allocation33_spill] sm:$0xff] %v7239_v22  ;;  %v1164_v14 = vrot.slane %v7132_v27, 5 }
 0x138   : > { %8514 = vst [vmem:[#allocation32_spill] sm:$0xff] %v7231_v16  ;;  %v7242_v23 = vld [vmem:[%s7060_s5 + $0x64] sm:$0xf]  ;;  %v477_v28 = vld [vmem:[%s7060_s5 + $0x20] sm:$0x1]  ;;  %v1171_v13 = vrot.slane %v7138_v30, 5  ;;  %v1158_v52 = vsel %vm7206_vm8, %v4772_v11, %v1157_v18 }
 0x139   : > { %5358 = vmatprep.subr.bf16.mxu0 %v7222_v8  ;;  %v7260_v15 = vld [vmem:[%s7060_s5 + $0x6c] sm:$0xf]  ;;  %v1146_v60 = vrot.slane %v7231_v16, 5  ;;  %v1153_v0 = vrot.slane %v7234_v17, 5  ;;  %v7275_v59 = vld [vmem:[%s7060_s5 + $0x38] sm:$0x1]  ;;  %v7296_v43 = vcombine.low %v7219_v6, %v7242_v23 }
 0x13a   : > { %v7267_v31 = vld [vmem:[%s7060_s5 + $0x2c] sm:$0x1]  ;;  %v577_v58 = vshll.u32 %v477_v28, 16  ;;  %v1159_v21 = vrot.slane %v1157_v18, 4  ;;  %v1160_v35 = vrot.slane %v477_v28, 5  ;;  %v1178_v53 = vrot.slane %v7180_v50, 5 }
 0x13b   : > { %5321 = vmatmul.mubr.msk.bf16.gmra.mrb[4].mxu0 %vm781_vm2, %v7149_v37  ;;  %v7280_v54 = vld [vmem:[%s7060_s5 + $0x44] sm:$0x1]  ;;  %v4773_v1 = vrot.slane %v7129_v26, 9  ;;  %v1166_v3 = vrot.slane %v1164_v14, 4  ;;  %v1167_v51 = vrot.slane %v7267_v31, 5  ;;  %v1185_v48 = vrot.slane %v7195_v56, 5 }
 0x13c   : > { %5324 = vmatprep.mubr.msk.bf16.mxu0 %vm781_vm2, %v7168_v42  ;;  %v7288_v49 = vld [vmem:[%s7060_s5 + $0x50] sm:$0x1]  ;;  %v4774_v46 = vrot.slane %v7135_v29, 9  ;;  %v1173_v28 = vrot.slane %v1171_v13, 4  ;;  %v1174_v45 = vrot.slane %v7275_v59, 5  ;;  %v4775_v44 = vrot.slane %v7175_v47, 9 }
 0x13d   : > { %v1180_v34 = vrot.slane %v1178_v53, 4  ;;  %v1181_v33 = vrot.slane %v7280_v54, 5  ;;  %v7302_v32 = vld [vmem:[%s7060_s5 + $0x70] sm:$0xf]  ;;  %v1147_v16 = vsel %vm7206_vm8, %v7159_v39, %v1146_v60  ;;  %v1154_v5 = vsel %vm7206_vm8, %v7163_v40, %v1153_v0  ;;  %s2389_s13 = scalar_select %p2388_p12, 1, 0 }
 0x13e   : > { %v1161_v4 = vsel %vm7206_vm8, %v1159_v21, %v1160_v35  ;;  %v1165_v11 = vsel %vm7206_vm8, %v4773_v1, %v1164_v14  ;;  %v1168_v18 = vsel %vm7206_vm8, %v1166_v3, %v1167_v51  ;;  %v1188_v42 = vrot.slane %v7288_v49, 5  ;;  %v7333_v14 = vld [vmem:[%s7060_s5 + $0x5c] sm:$0x1]  ;;  %p2392_p4 = scmp.lt.s32.totalorder %s6639_s30, 1  ;;  %s6673_s24 = smov 124  }
 0x13f   : > { %v729_v39 = vshll.u32 %v7260_v15, 16  ;;  %v739_v60 = vshrl.u32 %v7302_v32, 16  ;;  %v1172_v40 = vsel %vm7206_vm8, %v4774_v46, %v1171_v13  ;;  %v1175_v0 = vsel %vm7206_vm8, %v1173_v28, %v1174_v45  ;;  %s8301_s4 = scalar_lea.vmem [#allocation16], %s4722_s6  ;;  %s8551_s0 = sld [smem:[#allocation24_spill]] }
 0x140   : > { %v7326_v21 = vcombine.low %v7260_v15, %v7302_v32  ;;  %v579_v1 = vrot.slane %v577_v58, 5  ;;  %v1179_v51 = vsel %vm7206_vm8, %v4775_v44, %v1178_v53  ;;  %v1182_v3 = vsel %vm7206_vm8, %v1180_v34, %v1181_v33  ;;  %v1580_v58 = vld [vmem:[#allocation10 + $0x8] sm:$0x3]  ;;  %s7782_s18 = scalar_select %p2392_p4, 1, 0 }
 0x141   : > { %v4780_v46 = vcombine.low %v7249_v25, %v1147_v16  ;;  %v7338_v13 = vcombine.low %v1151_v20, %v1154_v5  ;;  %v7340_v45 = vcombine.low %v1158_v52, %v1161_v4  ;;  %v7342_v35 = vcombine.low %v1165_v11, %v1168_v18  ;;  %s5048_s9 = sshll.u32 %s6639_s30, 4  ;;  %s4532_s7 = sshll.u32 %s8301_s4, 4  ;;  %s8376_s7 = int_to_ptr.vmem [resolvable:$true] %s4532_s7 }
 0x142   : > { %v7346_v44 = vcombine.low %v1172_v40, %v1175_v0  ;;  %v4777_v53 = vrot.slane %v7211_v62, 9  ;;  %v7353_v5 = vcombine.low %v1179_v51, %v1182_v3  ;;  %v1192_v4 = vrot.slane %v7214_v63, 5  ;;  %s8552_s15 = sld [smem:[#allocation41_spill]]  ;;  %s4516_s6 = scalar_lea.sflag [#allocation4], %s7046_s21 }
 0x143   : > { %5325 = vmatmul.mubr.msk.bf16.gmra.mrb[8].mxu0 %vm781_vm2, %v7227_v12  ;;  %v1187_v12 = vrot.slane %v1185_v48, 4  ;;  %v1195_v52 = vrot.slane %v7333_v14, 5  ;;  %v4778_v16 = vrot.slane %v7219_v6, 9  ;;  %v1199_v25 = vrot.slane %v7242_v23, 5  ;;  %s6537_s2 = scalar_lea.vmem %s8376_s7, 2048  ;;  %p8553_p0 = scmp.ne.s32.totalorder %s8490_s8, 0 }
 0x144   : > { %5328 = vmatprep.mubr.msk.bf16.mxu0 %vm781_vm2, %v7239_v22  ;;  %v4776_v22 = vrot.slane %v7192_v55, 9  ;;  %v8516_v20 = vshrl.u32 %v7093_v7, 16  ;;  %v8518_v11 = vshrl.u32 %v7098_v9, 16  ;;  %v553_v40 = vshll.u32 %v7234_v17, 16  ;;  %p6538_p13 = scmp.ne.s32.totalorder %s8376_s7, %s6537_s2 }
 0x145   : > { %v1189_v34 = vsel %vm7206_vm8, %v1187_v12, %v1188_v42  ;;  %v543_v42 = vshll.u32 %v7098_v9, 16  ;;  %v580_v0 = vsel %vm7153_vm7, %v7197_v57, %v579_v1  ;;  %v7373_v51 = vand.u32 %v1580_v58, %v7083_v2  ;;  %s5043_s20 = sshll.u32 %s8551_s0, 5 }
 0x146   : > { %v1186_v33 = vsel %vm7206_vm8, %v4776_v22, %v1185_v48  ;;  %v536_v28 = vrot.slane %v8516_v20, 4  ;;  %v8517_v48 = vshll.u32 %v7093_v7, 16  ;;  %v549_v18 = vrot.slane %v8518_v11, 4  ;;  %s4529_s30 = sadd.s32 %s5048_s9, %s5043_s20  ;;  %p6539_p2 = pnand %p6538_p13, %p8553_p0 }
 0x147   : > { %v7364_v12 = vcombine.low %v1186_v33, %v1189_v34  ;;  %v545_v20 = vrot.slane %v543_v42, 5  ;;  %v8519_v7 = vsel %vm7153_vm7, %v7145_v36, %v7124_v24  ;;  %v555_v9 = vrot.slane %v553_v40, 5  ;;  %s5044_s19 = sshll.u32 %s4529_s30, 7 }
 0x148   : > { %v539_v22 = vrot.slane %v8517_v48, 5  ;;  %v7380_v33 = vcombine.low %v8519_v7, %v580_v0  ;;  %v8520_v34 = vshrl.u32 %v7129_v26, 16  ;;  %v8521_v48 = vshll.u32 %v7129_v26, 16  ;;  %s8383_s16 = scalar_lea.hbm %s8552_s15, %s5044_s19  ;;  %p6540_p8 = pneg %p6539_p2 }
 0x149   : > { %v591_v57 = vshll.u32 %v7132_v27, 16  ;;  %v550_v58 = vor.u32 %v549_v18, %v545_v20  ;;  %v601_v42 = vshll.u32 %v7267_v31, 16  ;;  %v8523_v40 = vshrl.u32 %v7135_v29, 16 }
 0x14a   : > { %v540_v3 = vor.u32 %v539_v22, %v536_v28  ;;  %v584_v17 = vrot.slane %v8520_v34, 4  ;;  %v587_v11 = vrot.slane %v8521_v48, 5  ;;  %v8522_v28 = vshrl.u32 %v7132_v27, 16 }
 0x14b   : > { %5329 = vmatmul.mubr.msk.bf16.gmra.mrb[12].mxu0 %vm781_vm2, %v7256_v41  ;;  %v593_v36 = vrot.slane %v591_v57, 5  ;;  %v608_v0 = vrot.slane %v8523_v40, 4  ;;  %v8524_v26 = vshll.u32 %v7135_v29, 16  ;;  %v551_v27 = vrot.slane %v550_v58, 4 }
 0x14c   : > { %5332 = vmatprep.mubr.msk.bf16.mxu0 %vm781_vm2, %v7296_v43  ;;  %v541_v1 = vrot.slane %v540_v3, 4  ;;  %v597_v22 = vrot.slane %v8522_v28, 4  ;;  %v588_v24 = vor.u32 %v587_v11, %v584_v17  ;;  %v603_v3 = vrot.slane %v601_v42, 5 }
 0x14d   : > { %v611_v7 = vrot.slane %v8524_v26, 5  ;;  %v615_v31 = vshll.u32 %v7138_v30, 16  ;;  %v8525_v17 = vshrl.u32 %v7138_v30, 16  ;;  %v556_v57 = vsel %vm7153_vm7, %v551_v27, %v555_v9 }
 0x14e   : > { %v546_v18 = vsel %vm7153_vm7, %v541_v1, %v545_v20  ;;  %v589_v34 = vrot.slane %v588_v24, 4  ;;  %v598_v48 = vor.u32 %v597_v22, %v593_v36  ;;  %v625_v40 = vshll.u32 %v7275_v59, 16 }
 0x14f   : > { %v612_v28 = vor.u32 %v611_v7, %v608_v0  ;;  %v621_v11 = vrot.slane %v8525_v17, 4  ;;  %v617_v29 = vrot.slane %v615_v31, 5  ;;  %v7407_v20 = vcombine.low %v546_v18, %v556_v57 }
 0x150   : > { %v594_v1 = vsel %vm7153_vm7, %v589_v34, %v593_v36  ;;  %v599_v58 = vrot.slane %v598_v48, 4  ;;  %v627_v24 = vrot.slane %v625_v40, 5  ;;  %v8527_v30 = vshll.u32 %v7175_v47, 16 }
 0x151   : > { %v613_v22 = vrot.slane %v612_v28, 4  ;;  %v622_v42 = vor.u32 %v621_v11, %v617_v29  ;;  %v639_v9 = vshll.u32 %v7180_v50, 16  ;;  %v8528_v18 = vshrl.u32 %v7180_v50, 16 }
 0x152   : > { %v635_v0 = vrot.slane %v8527_v30, 5  ;;  %v604_v59 = vsel %vm7153_vm7, %v599_v58, %v603_v3  ;;  %v649_v36 = vshll.u32 %v7280_v54, 16  ;;  %v8529_v17 = vshrl.u32 %v7192_v55, 16 }
 0x153   : > { %5333 = vmatmul.mubr.msk.bf16.gmra.mrb[16].mxu0 %vm781_vm2, %v7326_v21  ;;  %v618_v7 = vsel %vm7153_vm7, %v613_v22, %v617_v29  ;;  %v645_v27 = vrot.slane %v8528_v18, 4  ;;  %v7421_v31 = vcombine.low %v594_v1, %v604_v59  ;;  %v623_v34 = vrot.slane %v622_v42, 4 }
 0x154   : > { %5338 = vmatprep.mubr.msk.bf16.mxu0 %vm781_vm2, %v4780_v46  ;;  %v8526_v46 = vshrl.u32 %v7175_v47, 16  ;;  %v641_v28 = vrot.slane %v639_v9, 5  ;;  %v651_v47 = vrot.slane %v649_v36, 5  ;;  %v656_v3 = vrot.slane %v8529_v17, 4 }
 0x155   : > { %v8530_v11 = vshll.u32 %v7192_v55, 16  ;;  %v663_v50 = vshll.u32 %v7195_v56, 16  ;;  %v628_v54 = vsel %vm7153_vm7, %v623_v34, %v627_v24  ;;  %v8532_v24 = vshrl.u32 %v7211_v62, 16 }
 0x156   : > { %v632_v26 = vrot.slane %v8526_v46, 4  ;;  %v646_v40 = vor.u32 %v645_v27, %v641_v28  ;;  %v8531_v46 = vshrl.u32 %v7195_v56, 16  ;;  %v7438_v1 = vcombine.low %v618_v7, %v628_v54 }
 0x157   : > { %v659_v57 = vrot.slane %v8530_v11, 5  ;;  %v665_v58 = vrot.slane %v663_v50, 5  ;;  %v680_v30 = vrot.slane %v8532_v24, 4  ;;  %v687_v7 = vshll.u32 %v7214_v63, 16 }
 0x158   : > { %v636_v48 = vor.u32 %v635_v0, %v632_v26  ;;  %v669_v26 = vrot.slane %v8531_v46, 4  ;;  %v647_v42 = vrot.slane %v646_v40, 4  ;;  %v8533_v0 = vshll.u32 %v7211_v62, 16 }
 0x159   : > { %v660_v55 = vor.u32 %v659_v57, %v656_v3  ;;  %v689_v57 = vrot.slane %v687_v7, 5  ;;  %v8536_v40 = vshll.u32 %v7219_v6, 16  ;;  %vm2556_vm10 = vsmask.f32 7424 }
 0x15a   : > { %v637_v29 = vrot.slane %v636_v48, 4  ;;  %v683_v56 = vrot.slane %v8533_v0, 5  ;;  %v670_v59 = vor.u32 %v669_v26, %v665_v58  ;;  %v652_v27 = vsel %vm7153_vm7, %v647_v42, %v651_v47  ;;  %v498_v42 = vld [vmem:[%s7060_s5 + $0x74] sm:$0x1] }
 0x15b   : > { %5339 = vmatmul.mubr.msk.bf16.vlgmr.msra.gmra.mrb[0].mxu0 %vm781_vm2, %v7338_v13  ;;  %v661_v9 = vrot.slane %v660_v55, 4  ;;  %v697_v48 = vshll.u32 %v7333_v14, 16  ;;  %v707_v46 = vrot.slane %v8536_v40, 5  ;;  %vm2984_vm12 = vcmask 1046528  }
 0x15c   : > { %5359 = vmatpush3.bf16.msra.mxu0 %v7222_v8  ;;  %5342 = vmatprep.mubr.msk.bf16.mxu0 %vm781_vm2, %v7340_v45  ;;  %v673_v8 = vshll.u32 %v7288_v49, 16  ;;  %v642_v22 = vsel %vm7153_vm7, %v637_v29, %v641_v28  ;;  %v684_v36 = vor.u32 %v683_v56, %v680_v30  ;;  %v8534_v49 = vshrl.u32 %v7214_v63, 16  ;;  %v495_v28 = vld [vmem:[%s7060_s5 + $0x68] sm:$0x1] }
 0x15d   : > { %5380 = vmatprep.subr.bf16.mxu0 %v7373_v51  ;;  %v7454_v17 = vcombine.low %v642_v22, %v652_v27  ;;  %v666_v3 = vsel %vm7153_vm7, %v661_v9, %v665_v58  ;;  %v671_v11 = vrot.slane %v670_v59, 4  ;;  %v699_v54 = vrot.slane %v697_v48, 5 }
 0x15e   : > { %v675_v18 = vrot.slane %v673_v8, 5  ;;  %v693_v34 = vrot.slane %v8534_v49, 4  ;;  %v685_v50 = vrot.slane %v684_v36, 4  ;;  %v8535_v29 = vshrl.u32 %v7219_v6, 16 }
 0x15f   : > { %v711_v8 = vshll.u32 %v7242_v23, 16  ;;  %v8537_v58 = vshrl.u32 %v7242_v23, 16  ;;  %v721_v56 = vshll.u32 %v495_v28, 16  ;;  %v731_v27 = vrot.slane %v729_v39, 5 }
 0x160   : > { %v704_v47 = vrot.slane %v8535_v29, 4  ;;  %v676_v26 = vsel %vm7153_vm7, %v671_v11, %v675_v18  ;;  %v694_v55 = vor.u32 %v693_v34, %v689_v57  ;;  %v690_v30 = vsel %vm7153_vm7, %v685_v50, %v689_v57 }
 0x161   : > { %v717_v22 = vrot.slane %v8537_v58, 4  ;;  %v7472_v24 = vcombine.low %v666_v3, %v676_v26  ;;  %v713_v59 = vrot.slane %v711_v8, 5  ;;  %v8538_v18 = vshrl.u32 %v7260_v15, 16  ;;  %v7495_v8 = vld [vmem:[%s7060_s5 + $0x78] sm:$0xf] }
 0x162   : > { %v708_v0 = vor.u32 %v707_v46, %v704_v47  ;;  %v695_v9 = vrot.slane %v694_v55, 4  ;;  %v723_v49 = vrot.slane %v721_v56, 5  ;;  %v735_v34 = vshll.u32 %v7302_v32, 16  ;;  %v7498_v58 = vld [vmem:[%s7060_s5 + $0x7c] sm:$0xf] }
 0x163   : > { %5343 = vmatmul.mubr.msk.bf16.gmra.mrb[4].mxu0 %vm781_vm2, %v7342_v35  ;;  %v728_v7 = vrot.slane %v8538_v18, 4  ;;  %v741_v48 = vrot.slane %v739_v60, 4  ;;  %v718_v11 = vor.u32 %v717_v22, %v713_v59  ;;  %v745_v50 = vshll.u32 %v498_v42, 16 }
 0x164   : > { %5346 = vmatprep.mubr.msk.bf16.mxu0 %vm781_vm2, %v7346_v44  ;;  %v709_v36 = vrot.slane %v708_v0, 4  ;;  %v700_v3 = vsel %vm7153_vm7, %v695_v9, %v699_v54  ;;  %v1194_v29 = vrot.slane %v1192_v4, 4  ;;  %v737_v40 = vrot.slane %v735_v34, 5 }
 0x165   : > { %v732_v57 = vor.u32 %v731_v27, %v728_v7  ;;  %v7487_v47 = vcombine.low %v690_v30, %v700_v3  ;;  %v1201_v46 = vrot.slane %v1199_v25, 4  ;;  %v1202_v26 = vrot.slane %v495_v28, 5 }
 0x166   : > { %v714_v39 = vsel %vm7153_vm7, %v709_v36, %v713_v59  ;;  %v719_v60 = vrot.slane %v718_v11, 4  ;;  %v4779_v54 = vrot.slane %v7260_v15, 9  ;;  %v742_v22 = vor.u32 %v741_v48, %v737_v40 }
 0x167   : > { %v733_v55 = vrot.slane %v732_v57, 4  ;;  %v747_v30 = vrot.slane %v745_v50, 5  ;;  %v1193_v28 = vsel %vm7206_vm8, %v4777_v53, %v1192_v4  ;;  %v1200_v15 = vsel %vm7206_vm8, %v4778_v16, %v1199_v25  ;;  %v7528_v53 = vld [vmem:[%s7060_s5 + $0x80] sm:$0x1] }
 0x168   : > { %v724_v0 = vsel %vm7153_vm7, %v719_v60, %v723_v49  ;;  %v1196_v62 = vsel %vm7206_vm8, %v1194_v29, %v1195_v52  ;;  %v1206_v63 = vrot.slane %v7302_v32, 5  ;;  %v743_v23 = vrot.slane %v742_v22, 4  ;;  %v8539_v50 = vld [vmem:[#allocation30_spill] sm:$0xff]  ;;  %v8540_v29 = vld [vmem:[#allocation31_spill] sm:$0xff] }
 0x169   : > { %v738_v56 = vsel %vm7153_vm7, %v733_v55, %v737_v40  ;;  %v7525_v6 = vcombine.low %v714_v39, %v724_v0  ;;  %v1203_v4 = vsel %vm7206_vm8, %v1201_v46, %v1202_v26  ;;  %v4822_v16 = vrot.slane %v7495_v8, 9  ;;  %v8541_v39 = vld [vmem:[#allocation33_spill] sm:$0xff] }
 0x16a   : > { %v1726_v25 = vrot.slane %v7498_v58, 5  ;;  %v1729_v9 = vrot.slane %v7528_v53, 5  ;;  %v748_v14 = vsel %vm7153_vm7, %v743_v23, %v747_v30  ;;  %v7537_v52 = vcombine.low %v1193_v28, %v1196_v62  ;;  %v8543_v62 = vld [vmem:[#allocation29_spill] sm:$0xff] }
 0x16b   : > { %5347 = vmatmul.mubr.msk.bf16.gmra.mrb[8].mxu0 %vm781_vm2, %v7353_v5  ;;  %v7539_v32 = vcombine.low %v738_v56, %v748_v14  ;;  %v7543_v7 = vcombine.low %v1200_v15, %v1203_v4  ;;  %v1208_v27 = vrot.slane %v1206_v63, 4  ;;  %v1209_v36 = vrot.slane %v498_v42, 5  ;;  %v1732_v42 = vld [vmem:[#allocation10 + $0xa] sm:$0x3]  ;;  %v8542_v15 = vld [vmem:[#allocation28_spill] sm:$0xff] }
 0x16c   : > { %5350 = vmatprep.mubr.msk.bf16.mxu0 %vm781_vm2, %v7364_v12  ;;  %v1727_v59 = vsel %vm7206_vm8, %v4822_v16, %v1726_v25  ;;  %v1728_v18 = vrot.slane %v1726_v25, 4  ;;  %v1207_v48 = vsel %vm7206_vm8, %v4779_v54, %v1206_v63  ;;  %v1740_v57 = vand.u32 %v1732_v42, %v7083_v2 }
 0x16d   : > { %v1210_v3 = vsel %vm7206_vm8, %v1208_v27, %v1209_v36  ;;  %v1556_v46 = vshrl.u32 %v7495_v8, 16  ;;  %v1559_v26 = vshll.u32 %v7495_v8, 16  ;;  %v1569_v60 = vshrl.u32 %v7498_v58, 16  ;;  %v8544_v36 = vld [vmem:[#allocation32_spill] sm:$0xff] }
 0x16e   : > { %v1730_v49 = vsel %vm7206_vm8, %v1728_v18, %v1729_v9  ;;  %v7557_v11 = vcombine.low %v1207_v48, %v1210_v3  ;;  %v1565_v55 = vshll.u32 %v7498_v58, 16  ;;  %v510_v0 = vshrl.u32 %v8542_v15, 16  ;;  %v750_v48 = vld [vmem:[#allocation10 + $0x2] sm:$0x3] }
 0x16f   : > { %v7547_v34 = vcombine.low %v1727_v59, %v1730_v49  ;;  %v1558_v54 = vrot.slane %v1556_v46, 4  ;;  %v1561_v22 = vrot.slane %v1559_v26, 5  ;;  %v1571_v28 = vrot.slane %v1569_v60, 4 }
 0x170   : > { %v1567_v30 = vrot.slane %v1565_v55, 5  ;;  %v513_v56 = vshll.u32 %v8542_v15, 16  ;;  %v523_v63 = vshrl.u32 %v8543_v62, 16  ;;  %v519_v4 = vshll.u32 %v8543_v62, 16 }
 0x171   : > { %v512_v16 = vrot.slane %v510_v0, 4  ;;  %v529_v49 = vshll.u32 %v8544_v36, 16  ;;  %v2198_v0 = vld [vmem:[#allocation10 + $0x10] sm:$0x3]  ;;  %vm6672_vm14 = vmmov 1  }
 0x172   : > { %v1572_v23 = vor.u32 %v1571_v28, %v1567_v30  ;;  %v515_v25 = vrot.slane %v513_v56, 5  ;;  %v521_v9 = vrot.slane %v519_v4, 5  ;;  %v525_v14 = vrot.slane %v523_v63, 4  ;;  %v504_v63 = vld [vmem:[%s7060_s5 + $0x8c] sm:$0x1]  ;;  %vm8045_vm15 = vmpackc.low %vm6672_vm14, %vm8014_vm13 }
 0x173   : > { %5351 = vmatmul.mubr.msk.bf16.gmra.mrb[12].mxu0 %vm781_vm2, %v7537_v52  ;;  %v2206_v56 = vand.u32 %v2198_v0, %v7083_v2 }
 0x174   : > { %5354 = vmatprep.mubr.msk.bf16.mxu0 %vm781_vm2, %v7543_v7  ;;  %v1573_v18 = vrot.slane %v1572_v23, 4  ;;  %v516_v3 = vor.u32 %v515_v25, %v512_v16  ;;  %v526_v42 = vor.u32 %v525_v14, %v521_v9  ;;  %v6241_v25 = vld [vmem:[#allocation13 + $0x60] sm:$0xff]  }
 0x176   : > { %v527_v46 = vrot.slane %v526_v42, 4 }
 0x17b   : > { %5355 = vmatmul.mubr.msk.bf16.gmra.mrb[16].mxu0 %vm781_vm2, %v7557_v11 }
 0x17c   : > { %5360 = vmatprep.mubr.msk.bf16.mxu0 %vm781_vm2, %v7102_v10  ;;  %v7583_v10 = vcombine.low %v7495_v8, %v7498_v58  ;;  %v1562_v8 = vor.u32 %v1561_v22, %v1558_v54  ;;  %v1575_v58 = vshll.u32 %v7528_v53, 16  ;;  %v517_v53 = vrot.slane %v516_v3, 4 }
 0x17e   : > { %v1563_v59 = vrot.slane %v1562_v8, 4  ;;  %v1577_v27 = vrot.slane %v1575_v58, 5  ;;  %v522_v55 = vsel %vm7153_vm7, %v517_v53, %v521_v9 }
 0x180   : > { %v1568_v26 = vsel %vm7153_vm7, %v1563_v59, %v1567_v30  ;;  %v1578_v60 = vsel %vm7153_vm7, %v1573_v18, %v1577_v27  ;;  %v2046_v30 = vld [vmem:[#allocation10 + $0xe] sm:$0x3]  ;;  %v6242_v59 = vld [vmem:[#allocation13 + $0x68] sm:$0xff]  }
 0x181   : > { %v7625_v28 = vcombine.low %v1568_v26, %v1578_v60  ;;  %v2054_v15 = vand.u32 %v2046_v30, %v7083_v2 }
 0x183   : > { %5361 = vmatmul.mubr.msk.bf16.vlgmr.msra.gmra.mrb[0].mxu0 %vm781_vm2, %v7118_v19 }
 0x184   : > { %5381 = vmatpush3.bf16.msra.mxu0 %v7373_v51  ;;  %5364 = vmatprep.mubr.msk.bf16.mxu0 %vm781_vm2, %v7149_v37  ;;  %v1876_v51 = vld [vmem:[#allocation10 + $0xc] sm:$0x3] }
 0x185   : > { %5402 = vmatprep.subr.bf16.mxu0 %v1740_v57  ;;  %v1886_v40 = vand.u32 %v1876_v51, %v7083_v2  ;;  %v531_v51 = vrot.slane %v529_v49, 5 }
 0x187   : > { %v532_v54 = vsel %vm7153_vm7, %v527_v46, %v531_v51 }
 0x188   : > { %v4730_v22 = vcombine.low %v522_v55, %v532_v54 }
 0x18a   : > { %5294 = vmatprep.mubr.msk.bf16.mxu1 %vm781_vm2, %v4730_v22  ;;  %v7770_v22 = vld [vmem:[#allocation11] ss:$0 sm:$0xff] }
 0x18b   : > { %5365 = vmatmul.mubr.msk.bf16.gmra.mrb[4].mxu0 %vm781_vm2, %v8539_v50 }
 0x18c   : > { %5368 = vmatprep.mubr.msk.bf16.mxu0 %vm781_vm2, %v8540_v29 }
 0x193   : > { %5369 = vmatmul.mubr.msk.bf16.gmra.mrb[8].mxu0 %vm781_vm2, %v8541_v39 }
 0x194   : > { %5372 = vmatprep.mubr.msk.bf16.mxu0 %vm781_vm2, %v7256_v41 }
 0x19b   : > { %5373 = vmatmul.mubr.msk.bf16.gmra.mrb[12].mxu0 %vm781_vm2, %v7296_v43 }
 0x19c   : > { %5376 = vmatprep.mubr.msk.bf16.mxu0 %vm781_vm2, %v7326_v21 }
 0x1a3   : > { %5377 = vmatmul.mubr.msk.bf16.gmra.mrb[16].mxu0 %vm781_vm2, %v7583_v10 }
 0x1a4   : > { %5382 = vmatprep.mubr.msk.bf16.mxu0 %vm781_vm2, %v7407_v20 }
 0x1ab   : > { %5383 = vmatmul.mubr.msk.bf16.vlgmr.msra.gmra.mrb[0].mxu0 %vm781_vm2, %v7380_v33 }
 0x1ac   : > { %5403 = vmatpush3.bf16.msra.mxu0 %v1740_v57  ;;  %5386 = vmatprep.mubr.msk.bf16.mxu0 %vm781_vm2, %v7421_v31  ;;  %v817_v57 = vand.u32 %v7083_v2, %v750_v48  ;;  %v502_v2 = vld [vmem:[%s7060_s5 + $0x84] sm:$0xf] }
 0x1ad   : > { %5424 = vmatprep.subr.bf16.mxu0 %v1886_v40  ;;  %v6244_v48 = vld [vmem:[#allocation13 + $0x78] sm:$0xff]  }
 0x1ae   : > { %5292 = vmatprep.subr.bf16.mxu1 %v817_v57 }
 0x1af   : > { %5293 = vmatpush3.bf16.msra.mxu1 %v817_v57  ;;  %v7754_v57 = vld [vmem:[#allocation13] sm:$0xff]  }
 0x1b2   : > { %5295 = vmatmul.mubr.msk.bf16.vlgmr.msra.gmra.mrb[0].mxu1 %vm781_vm2, %v7407_v20  ;;  %v6238_v20 = vld [vmem:[#allocation13 + $0x48] sm:$0xff]  }
 0x1b3   : > { %5387 = vmatmul.mubr.msk.bf16.gmra.mrb[4].mxu0 %vm781_vm2, %v7438_v1  ;;  %5298 = vmatprep.mubr.msk.bf16.mxu1 %vm781_vm2, %v7380_v33 }
 0x1b4   : > { %5390 = vmatprep.mubr.msk.bf16.mxu0 %vm781_vm2, %v7454_v17 }
 0x1ba   : > { %5299 = vmatmul.mubr.msk.bf16.gmra.mrb[4].mxu1 %vm781_vm2, %v7421_v31 }
 0x1bb   : > { %5391 = vmatmul.mubr.msk.bf16.gmra.mrb[8].mxu0 %vm781_vm2, %v7472_v24  ;;  %5302 = vmatprep.mubr.msk.bf16.mxu1 %vm781_vm2, %v7438_v1 }
 0x1bc   : > { %5394 = vmatprep.mubr.msk.bf16.mxu0 %vm781_vm2, %v7487_v47 }
 0x1c2   : > { %5303 = vmatmul.mubr.msk.bf16.gmra.mrb[8].mxu1 %vm781_vm2, %v7454_v17 }
 0x1c3   : > { %5395 = vmatmul.mubr.msk.bf16.gmra.mrb[12].mxu0 %vm781_vm2, %v7525_v6  ;;  %5306 = vmatprep.mubr.msk.bf16.mxu1 %vm781_vm2, %v7472_v24 }
 0x1c4   : > { %5398 = vmatprep.mubr.msk.bf16.mxu0 %vm781_vm2, %v7539_v32 }
 0x1ca   : > { %5307 = vmatmul.mubr.msk.bf16.gmra.mrb[12].mxu1 %vm781_vm2, %v7487_v47 }
 0x1cb   : > { %5399 = vmatmul.mubr.msk.bf16.gmra.mrb[16].mxu0 %vm781_vm2, %v7625_v28  ;;  %5310 = vmatprep.mubr.msk.bf16.mxu1 %vm781_vm2, %v7525_v6 }
 0x1cc   : > { %5404 = vmatprep.mubr.msk.bf16.mxu0 %vm781_vm2, %v7338_v13  ;;  %v6237_v13 = vld [vmem:[#allocation13 + $0x40] sm:$0xff]  }
 0x1cd   : > { %5490 = vmatprep.subr.bf16.mxu1 %v6237_v13 }
 0x1ce   : > { %5491 = vmatpush3.bf16.msra.mxu1 %v6237_v13  ;;  %v2390_v13 = vstv %s2389_s13 }
 0x1cf   : > { %5492 = vmatprep.subr.bf16.mxu1 %v6238_v20  ;;  %vm2391_vm9 = vcmp.eq.s32.totalorder %v2390_v13, 1 }
 0x1d2   : > { %5311 = vmatmul.mubr.msk.bf16.gmra.mrb[16].mxu1 %vm781_vm2, %v7539_v32 }
 0x1d3   : > { %5405 = vmatmul.mubr.msk.bf16.vlgmr.msra.gmra.mrb[0].mxu0 %vm781_vm2, %v7340_v45  ;;  %5493 = vmatpush3.bf16.msra.mxu1 %v6238_v20 }
 0x1d4   : > { %5425 = vmatpush3.bf16.msra.mxu0 %v1886_v40  ;;  %5408 = vmatprep.mubr.msk.bf16.mxu0 %vm781_vm2, %v7342_v35  ;;  %v6239_v40 = vld [vmem:[#allocation13 + $0x50] sm:$0xff]  }
 0x1d5   : > { %5446 = vmatprep.subr.bf16.mxu0 %v2054_v15  ;;  %5494 = vmatprep.subr.bf16.mxu1 %v6239_v40 }
 0x1d7   : > { %5495 = vmatpush3.bf16.msra.mxu1 %v6239_v40 }
 0x1db   : > { %5409 = vmatmul.mubr.msk.bf16.gmra.mrb[4].mxu0 %vm781_vm2, %v7346_v44 }
 0x1dc   : > { %5412 = vmatprep.mubr.msk.bf16.mxu0 %vm781_vm2, %v7353_v5 }
 0x1e3   : > { %5413 = vmatmul.mubr.msk.bf16.gmra.mrb[8].mxu0 %vm781_vm2, %v7364_v12 }
 0x1e4   : > { %5416 = vmatprep.mubr.msk.bf16.mxu0 %vm781_vm2, %v7537_v52 }
 0x1eb   : > { %5417 = vmatmul.mubr.msk.bf16.gmra.mrb[12].mxu0 %vm781_vm2, %v7543_v7 }
 0x1ec   : > { %5420 = vmatprep.mubr.msk.bf16.mxu0 %vm781_vm2, %v7557_v11 }
 0x1f3   : > { %5421 = vmatmul.mubr.msk.bf16.gmra.mrb[16].mxu0 %vm781_vm2, %v7547_v34 }
 0x1f4   : > { %5426 = vmatprep.mubr.msk.bf16.mxu0 %vm781_vm2, %v7118_v19  ;;  %v503_v19 = vld [vmem:[%s7060_s5 + $0x88] sm:$0xf] }
 0x1f5   : > { %v2192_v38 = vrot.slane %v503_v19, 5 }
 0x1fb   : > { %5427 = vmatmul.mubr.msk.bf16.vlgmr.msra.gmra.mrb[0].mxu0 %vm781_vm2, %v7149_v37  ;;  %v4834_v37 = vcombine.low %v502_v2, %v503_v19 }
 0x1fc   : > { %5447 = vmatpush3.bf16.msra.mxu0 %v2054_v15  ;;  %5430 = vmatprep.mubr.msk.bf16.mxu0 %vm781_vm2, %v8539_v50  ;;  %v6240_v50 = vld [vmem:[#allocation13 + $0x58] sm:$0xff]  }
 0x1fd   : > { %5468 = vmatprep.subr.bf16.mxu0 %v2206_v56  ;;  %5496 = vmatprep.subr.bf16.mxu1 %v6240_v50 }
 0x1fe   : > { %5497 = vmatpush3.bf16.msra.mxu1 %v6240_v50 }
 0x1ff   : > { %5498 = vmatprep.subr.bf16.mxu1 %v6241_v25 }
 0x202   : > { %5499 = vmatpush3.bf16.msra.mxu1 %v6241_v25 }
 0x203   : > { %5431 = vmatmul.mubr.msk.bf16.gmra.mrb[4].mxu0 %vm781_vm2, %v8540_v29  ;;  %5500 = vmatprep.subr.bf16.mxu1 %v6242_v59 }
 0x204   : > { %5434 = vmatprep.mubr.msk.bf16.mxu0 %vm781_vm2, %v8541_v39 }
 0x206   : > { %5501 = vmatpush3.bf16.msra.mxu1 %v6242_v59 }
 0x207   : > { %5502 = vmatprep.subr.bf16.mxu1 %v6243_v61 }
 0x20a   : > { %5503 = vmatpush3.bf16.msra.mxu1 %v6243_v61 }
 0x20b   : > { %5435 = vmatmul.mubr.msk.bf16.gmra.mrb[8].mxu0 %vm781_vm2, %v7256_v41  ;;  %v2025_v41 = vshll.u32 %v502_v2, 16  ;;  %5504 = vmatprep.subr.bf16.mxu1 %v6244_v48 }
 0x20c   : > { %5438 = vmatprep.mubr.msk.bf16.mxu0 %vm781_vm2, %v7296_v43  ;;  %v2022_v43 = vshrl.u32 %v502_v2, 16 }
 0x20d   : > { %v2027_v39 = vrot.slane %v2025_v41, 5 }
 0x20e   : > { %v2024_v29 = vrot.slane %v2022_v43, 4  ;;  %5505 = vmatpush3.bf16.msra.mxu1 %v6244_v48 }
 0x20f   : > { %5522 = vmatprep.subr.bf16.mxu1 %v7754_v57 }
 0x213   : > { %5439 = vmatmul.mubr.msk.bf16.gmra.mrb[12].mxu0 %vm781_vm2, %v7326_v21  ;;  %v2035_v21 = vshrl.u32 %v503_v19, 16 }
 0x214   : > { %5442 = vmatprep.mubr.msk.bf16.mxu0 %vm781_vm2, %v7583_v10 }
 0x215   : > { %v2037_v62 = vrot.slane %v2035_v21, 4 }
 0x21b   : > { %5443 = vmatmul.mubr.msk.bf16.gmra.mrb[16].mxu0 %vm781_vm2, %v4834_v37 }
 0x21c   : > { %5448 = vmatprep.mubr.msk.bf16.mxu0 %vm781_vm2, %v7380_v33  ;;  %v2031_v33 = vshll.u32 %v503_v19, 16 }
 0x21e   : > { %v2033_v10 = vrot.slane %v2031_v33, 5 }
 0x223   : > { %5449 = vmatmul.mubr.msk.bf16.vlgmr.msra.gmra.mrb[0].mxu0 %vm781_vm2, %v7421_v31  ;;  %v2028_v31 = vor.u32 %v2027_v39, %v2024_v29 }
 0x224   : > { %5469 = vmatpush3.bf16.msra.mxu0 %v2206_v56  ;;  %5452 = vmatprep.mubr.msk.bf16.mxu0 %vm781_vm2, %v7438_v1  ;;  %v2038_v1 = vor.u32 %v2037_v62, %v2033_v10 }
 0x225   : > { %v2029_v8 = vrot.slane %v2028_v31, 4 }
 0x226   : > { %v2039_v23 = vrot.slane %v2038_v1, 4 }
 0x22b   : > { %5453 = vmatmul.mubr.msk.bf16.gmra.mrb[4].mxu0 %vm781_vm2, %v7454_v17  ;;  %v2041_v17 = vshll.u32 %v504_v63, 16 }
 0x22c   : > { %5456 = vmatprep.mubr.msk.bf16.mxu0 %vm781_vm2, %v7472_v24  ;;  %v2034_v24 = vsel %vm7153_vm7, %v2029_v8, %v2033_v10 }
 0x22d   : > { %v2043_v58 = vrot.slane %v2041_v17, 5 }
 0x233   : > { %5457 = vmatmul.mubr.msk.bf16.gmra.mrb[8].mxu0 %vm781_vm2, %v7487_v47  ;;  %v2044_v47 = vsel %vm7153_vm7, %v2039_v23, %v2043_v58 }
 0x234   : > { %5460 = vmatprep.mubr.msk.bf16.mxu0 %vm781_vm2, %v7525_v6  ;;  %v4845_v4 = vcombine.low %v2034_v24, %v2044_v47  ;;  %v2194_v6 = vrot.slane %v2192_v38, 4 }
 0x23b   : > { %5461 = vmatmul.mubr.msk.bf16.gmra.mrb[12].mxu0 %vm781_vm2, %v7539_v32  ;;  %v2195_v32 = vrot.slane %v504_v63, 5 }
 0x23c   : > { %5464 = vmatprep.mubr.msk.bf16.mxu0 %vm781_vm2, %v7625_v28 }
 0x243   : > { %5465 = vmatmul.mubr.msk.bf16.gmra.mrb[16].mxu0 %vm781_vm2, %v4845_v4 }
 0x244   : > { %5470 = vmatprep.mubr.msk.bf16.mxu0 %vm781_vm2, %v7340_v45  ;;  %v4856_v45 = vrot.slane %v502_v2, 9 }
 0x24b   : > { %5471 = vmatmul.mubr.msk.bf16.vlgmr.msra.gmra.mrb[0].mxu0 %vm781_vm2, %v7342_v35  ;;  %v2193_v35 = vsel %vm7206_vm8, %v4856_v45, %v2192_v38 }
 0x24c   : > { %5474 = vmatprep.mubr.msk.bf16.mxu0 %vm781_vm2, %v7346_v44  ;;  %v2196_v44 = vsel %vm7206_vm8, %v2194_v6, %v2195_v32 }
 0x253   : > { %5475 = vmatmul.mubr.msk.bf16.gmra.mrb[4].mxu0 %vm781_vm2, %v7353_v5  ;;  %v4857_v5 = vcombine.low %v2193_v35, %v2196_v44 }
 0x254   : > { %5478 = vmatprep.mubr.msk.bf16.mxu0 %vm781_vm2, %v7364_v12 }
 0x25b   : > { %5479 = vmatmul.mubr.msk.bf16.gmra.mrb[8].mxu0 %vm781_vm2, %v7537_v52 }
 0x25c   : > { %5482 = vmatprep.mubr.msk.bf16.mxu0 %vm781_vm2, %v7543_v7 }
 0x263   : > { %5483 = vmatmul.mubr.msk.bf16.gmra.mrb[12].mxu0 %vm781_vm2, %v7557_v11 }
 0x264   : > { %5486 = vmatprep.mubr.msk.bf16.mxu0 %vm781_vm2, %v7547_v34 }
 0x26b   : > { %5487 = vmatmul.mubr.msk.bf16.gmra.mrb[16].mxu0 %vm781_vm2, %v4857_v5 }
 0x285   : > { %v5296_v12 = vpop.f32.mrb[0].mxu1 }
 0x286   : > { %v853_v52 = vpop.f32.mrb[1].mxu1 }
 0x287   : > { %v5297_v7 = vpop.f32.mrb[2].mxu1 }
 0x288   : > { %v856_v16 = vpop.f32.mrb[3].mxu1 }
 0x28d   : > { %v5300_v9 = vpop.f32.mrb[4].mxu1 }
 0x28e   : > { %v869_v14 = vpop.f32.mrb[5].mxu1 }
 0x28f   : > { %v7738_v11 = vpop.f32.mrb[6].mxu1 }
 0x290   : > { %v7740_v34 = vpop.f32.mrb[7].mxu1 }
 0x295   : > { %v7742_v18 = vpop.f32.mrb[8].mxu1 }
 0x296   : > { %v7744_v27 = vpop.f32.mrb[9].mxu1 }
 0x297   : > { %v7746_v36 = vpop.f32.mrb[10].mxu1 }
 0x298   : > { %v7748_v49 = vpop.f32.mrb[11].mxu1 }
 0x29d   : > { %v7750_v3 = vpop.f32.mrb[12].mxu1 }
 0x29e   : > { %v7752_v42 = vpop.f32.mrb[13].mxu1 }
 0x29f   : > { %v7756_v51 = vpop.f32.mrb[14].mxu1 }
 0x2a0   : > { %v7759_v53 = vpop.f32.mrb[15].mxu1 }
 0x2a5   : > { %v7761_v46 = vpop.f32.mrb[16].mxu1 }
 0x2a6   : > { %v7763_v26 = vpop.f32.mrb[17].mxu1 }
 0x2a7   : > { %v7765_v60 = vpop.f32.mrb[18].mxu1 }
 0x2a8   : > { %v7767_v55 = vpop.f32.mrb[19].mxu1 }
 0x31e   : > { %v5472_v54 = vpop.f32.mrb[0].mxu0 }
 0x31f   : > { %v5778_v28 = vadd.f32 %v5472_v54, %v5296_v12  ;;  %v2242_v30 = vpop.f32.mrb[1].mxu0 }
 0x320   : > { %v5779_v15 = vadd.f32 %v2242_v30, %v853_v52  ;;  %v5473_v20 = vpop.f32.mrb[2].mxu0 }
 0x321   : > { %v2350_v40 = vadd.f32 %v5778_v28, %v7770_v22  ;;  %v5780_v0 = vadd.f32 %v5473_v20, %v5297_v7  ;;  %v2245_v56 = vpop.f32.mrb[3].mxu0 }
 0x322   : > { %v2348_v2 = vadd.f32 %v5779_v15, %v7770_v22  ;;  %v5781_v19 = vadd.f32 %v2245_v56, %v856_v16 }
 0x323   : > { %v2370_v37 = vmax.f32 %v2350_v40, 0.0  ;;  %v2351_v50 = vadd.f32 %v5780_v0, %v7770_v22 }
 0x324   : > { %v2368_v43 = vmax.f32 %v2348_v2, 0.0  ;;  %v2349_v41 = vadd.f32 %v5781_v19, %v7770_v22 }
 0x325   : > { %v2443_v21 = vrot.slane %v2370_v37, 7  ;;  %v2371_v33 = vmax.f32 %v2351_v50, 0.0 }
 0x326   : > { %v2400_v29 = vsel %vm2391_vm9, %v2368_v43, 0.0  ;;  %v2369_v39 = vmax.f32 %v2349_v41, 0.0  ;;  %v5476_v10 = vpop.f32.mrb[4].mxu0 }
 0x327   : > { %v7777_v62 = vrot.slane %v2400_v29, 7  ;;  %v2444_v63 = vrot.slane %v2371_v33, 7  ;;  %v5782_v31 = vadd.f32 %v5476_v10, %v5300_v9  ;;  %v2258_v1 = vpop.f32.mrb[5].mxu0  ;;  %v2501_v17 = vsel %vm812_vm0, 0.0, %v2443_v21 }
 0x328   : > { %v2401_v8 = vsel %vm2391_vm9, %v2369_v39, 0.0  ;;  %v5783_v23 = vadd.f32 %v2258_v1, %v869_v14  ;;  %v5477_v58 = vpop.f32.mrb[6].mxu0  ;;  %v2394_v9 = vstv %s7782_s18 }
 0x329   : > { %v2500_v24 = vsel %vm812_vm0, 0.0, %v7777_v62  ;;  %v2445_v47 = vsel %vm812_vm0, %v2443_v21, %v2444_v63  ;;  %v2511_v4 = vsel %vm812_vm0, %v2444_v63, 0.0  ;;  %v2441_v38 = vrot.slane %v2401_v8, 7  ;;  %v2261_v45 = vpop.f32.mrb[7].mxu0 }
 0x32a   : > { %v7788_v6 = vpack.c.bf16 %v2445_v47, %v2501_v17  ;;  %v7790_v32 = vpack.c.bf16 %v2511_v4, %v2511_v4  ;;  %v7792_v35 = vpack.c.bf16 %v2445_v47, %v2443_v21  ;;  %v2354_v44 = vadd.f32 %v5782_v31, %v7770_v22 }
 0x32b   : > { %v7797_v5 = vsel %vm812_vm0, %v7777_v62, %v2441_v38  ;;  %v2510_v12 = vsel %vm812_vm0, %v2441_v38, 0.0  ;;  %v2352_v52 = vadd.f32 %v5783_v23, %v7770_v22  ;;  %v5784_v7 = vadd.f32 %v5477_v58, %v7738_v11 }
 0x32c   : > { %v7803_v16 = vpack.c.bf16 %v7797_v5, %v2500_v24  ;;  %v7805_v25 = vpack.c.bf16 %v2510_v12, %v2510_v12  ;;  %v2374_v14 = vmax.f32 %v2354_v44, 0.0  ;;  %v5785_v48 = vadd.f32 %v2261_v45, %v7740_v34 }
 0x32d   : > { %v2372_v59 = vmax.f32 %v2352_v52, 0.0  ;;  %v2355_v61 = vadd.f32 %v5784_v7, %v7770_v22  ;;  %v2577_v54 = vshll.u32 %v7790_v32, 16  ;;  %v2989_v28 = vrot.slane %v7790_v32, 1 }
 0x32e   : > { %v5480_v30 = vpop.f32.mrb[8].mxu0  ;;  %v2560_v11 = vshll.u32 %v7803_v16, 16  ;;  %v2565_v15 = vshll.u32 %v7805_v25, 16  ;;  %v7814_v13 = vrot.slane %v2374_v14, 7  ;;  %v2353_v0 = vadd.f32 %v5785_v48, %v7770_v22 }
 0x32f   : > { %v7816_v20 = vrot.slane %v2372_v59, 7  ;;  %v2375_v40 = vmax.f32 %v2355_v61, 0.0  ;;  %v2274_v56 = vpop.f32.mrb[9].mxu0  ;;  %v5786_v34 = vadd.f32 %v5480_v30, %v7742_v18  ;;  %v2558_v37 = vshrl.u32 %v7803_v16, 16 }
 0x330   : > { %v5787_v2 = vadd.f32 %v2274_v56, %v7744_v27  ;;  %v5481_v19 = vpop.f32.mrb[10].mxu0  ;;  %v2562_v50 = vrot.slane %v2560_v11, 1  ;;  %v2503_v43 = vsel %vm812_vm0, 0.0, %v7814_v13  ;;  %v2373_v21 = vmax.f32 %v2353_v0, 0.0 }
 0x331   : > { %v2450_v41 = vrot.slane %v2375_v40, 7  ;;  %v2277_v33 = vpop.f32.mrb[11].mxu0  ;;  %v2567_v29 = vrot.slane %v2565_v15, 1  ;;  %v2358_v39 = vadd.f32 %v5786_v34, %v7770_v22  ;;  %v5788_v63 = vadd.f32 %v5481_v19, %v7746_v36 }
 0x332   : > { %v2356_v10 = vadd.f32 %v5787_v2, %v7770_v22  ;;  %v5789_v18 = vadd.f32 %v2277_v33, %v7748_v49  ;;  %v2502_v27 = vsel %vm812_vm0, 0.0, %v7816_v20  ;;  %v2447_v1 = vrot.slane %v2373_v21, 7 }
 0x333   : > { %v7832_v31 = vsel %vm812_vm0, %v7814_v13, %v2450_v41  ;;  %v2563_v17 = vor.u32 %v2562_v50, %v2558_v37  ;;  %v2513_v8 = vsel %vm812_vm0, %v2450_v41, 0.0  ;;  %v2378_v58 = vmax.f32 %v2358_v39, 0.0 }
 0x334   : > { %v7836_v23 = vpack.c.bf16 %v7832_v31, %v2503_v43  ;;  %v2376_v24 = vmax.f32 %v2356_v10, 0.0  ;;  %v7840_v36 = vsel %vm812_vm0, %v7816_v20, %v2447_v1  ;;  %v2512_v49 = vsel %vm812_vm0, %v2447_v1, 0.0 }
 0x335   : > { %v2359_v47 = vadd.f32 %v5788_v63, %v7770_v22  ;;  %v2357_v4 = vadd.f32 %v5789_v18, %v7770_v22  ;;  %v2579_v38 = vrot.slane %v2577_v54, 1  ;;  %v7846_v45 = vpack.c.bf16 %v7840_v36, %v2502_v27 }
 0x336   : > { %v7848_v44 = vrot.slane %v2378_v58, 7  ;;  %v7850_v12 = vrot.slane %v2376_v24, 7  ;;  %v5484_v52 = vpop.f32.mrb[12].mxu0  ;;  %v2568_v59 = vsel %vm2556_vm10, %v2563_v17, %v2567_v29  ;;  %v7854_v30 = vpack.c.bf16 %v2513_v8, %v2513_v8  ;;  %v6246_v58 = vld [vmem:[#allocation13 + $0x8] sm:$0xff]  }
 0x337   : > { %v2379_v7 = vmax.f32 %v2359_v47, 0.0  ;;  %v2377_v14 = vmax.f32 %v2357_v4, 0.0  ;;  %v5790_v61 = vadd.f32 %v5484_v52, %v7750_v3  ;;  %v2290_v48 = vpop.f32.mrb[13].mxu0  ;;  %v7856_v11 = vpack.c.bf16 %v2512_v49, %v2512_v49  ;;  %5506 = vmatprep.mubr.bf16.mxu1 %v2568_v59 }
 0x338   : > { %v2505_v54 = vsel %vm812_vm0, 0.0, %v7848_v44  ;;  %v2572_v15 = vshll.u32 %v7788_v6, 16  ;;  %v5485_v40 = vpop.f32.mrb[14].mxu0  ;;  %v5791_v2 = vadd.f32 %v2290_v48, %v7752_v42  ;;  %v2504_v19 = vsel %vm812_vm0, 0.0, %v7850_v12 }
 0x339   : > { %v2456_v0 = vrot.slane %v2379_v7, 7  ;;  %v2453_v56 = vrot.slane %v2377_v14, 7  ;;  %v2362_v34 = vadd.f32 %v5790_v61, %v7770_v22  ;;  %v2293_v3 = vpop.f32.mrb[15].mxu0  ;;  %v5792_v50 = vadd.f32 %v5485_v40, %v7756_v51 }
 0x33a   : > { %v2574_v37 = vrot.slane %v2572_v15, 1  ;;  %v5793_v43 = vadd.f32 %v2293_v3, %v7759_v53  ;;  %v2570_v42 = vshrl.u32 %v7788_v6, 16  ;;  %v2582_v53 = vshrl.u32 %v7846_v45, 16 }
 0x33b   : > { %v7869_v41 = vsel %vm812_vm0, %v7848_v44, %v2456_v0  ;;  %v2515_v21 = vsel %vm812_vm0, %v2456_v0, 0.0  ;;  %v7874_v33 = vsel %vm812_vm0, %v7850_v12, %v2453_v56  ;;  %v2514_v39 = vsel %vm812_vm0, %v2453_v56, 0.0 }
 0x33c   : > { %v7878_v29 = vpack.c.bf16 %v7869_v41, %v2505_v54  ;;  %v7882_v51 = vpack.c.bf16 %v7874_v33, %v2504_v19  ;;  %vm7887_vm11 = vcmp.eq.s32.totalorder %v2394_v9, 1  ;;  %v2382_v63 = vmax.f32 %v2362_v34, 0.0 }
 0x33d   : > { %v2575_v18 = vor.u32 %v2574_v37, %v2570_v42  ;;  %v2360_v27 = vadd.f32 %v5791_v2, %v7770_v22  ;;  %v2363_v1 = vadd.f32 %v5792_v50, %v7770_v22  ;;  %v7893_v17 = vpack.c.bf16 %v2515_v21, %v2515_v21  ;;  %v6247_v50 = vld [vmem:[#allocation13 + $0x10] sm:$0xff]  }
 0x33e   : > { %v2361_v8 = vadd.f32 %v5793_v43, %v7770_v22  ;;  %v2584_v24 = vshll.u32 %v7846_v45, 16  ;;  %v2589_v49 = vshll.u32 %v7856_v11, 16  ;;  %v5488_v47 = vpop.f32.mrb[16].mxu0  ;;  %v7898_v9 = vrot.slane %v2382_v63, 7 }
 0x33f   : > { %v7901_v4 = vsel %vm2556_vm10, %v2575_v18, %v2579_v38  ;;  %v2380_v52 = vmax.f32 %v2360_v27, 0.0  ;;  %v2383_v7 = vmax.f32 %v2363_v1, 0.0  ;;  %v2306_v14 = vpop.f32.mrb[17].mxu0  ;;  %v7903_v59 = vpack.c.bf16 %v2514_v39, %v2514_v39 }
 0x340   : > { %5507 = vmatmul.mubr.bf16.vlgmr.msra.gmra.mrb[20].mxu1 %v7901_v4  ;;  %v2381_v61 = vmax.f32 %v2361_v8, 0.0  ;;  %v2586_v48 = vrot.slane %v2584_v24, 1  ;;  %v5794_v54 = vadd.f32 %v5488_v47, %v7761_v46  ;;  %v5489_v15 = vpop.f32.mrb[18].mxu0  ;;  %v2594_v38 = vshrl.u32 %v7836_v23, 16 }
 0x341   : > { %v7907_v40 = vrot.slane %v2380_v52, 7  ;;  %5523 = vmatpush3.bf16.msra.mxu1 %v7754_v57  ;;  %v2462_v0 = vrot.slane %v2383_v7, 7  ;;  %v2596_v56 = vshll.u32 %v7836_v23, 16  ;;  %v2309_v34 = vpop.f32.mrb[19].mxu0  ;;  %v2601_v37 = vshll.u32 %v7854_v30, 16 }
 0x342   : > { %v2459_v2 = vrot.slane %v2381_v61, 7  ;;  %5524 = vmatprep.subr.bf16.mxu1 %v6246_v58  ;;  %v2587_v3 = vor.u32 %v2586_v48, %v2582_v53  ;;  %v2366_v19 = vadd.f32 %v5794_v54, %v7770_v22  ;;  %v2507_v46 = vsel %vm812_vm0, 0.0, %v7898_v9  ;;  %v6248_v48 = vld [vmem:[#allocation13 + $0x18] sm:$0xff]  }
 0x343   : > { %v7918_v57 = vsel %vm812_vm0, %v7898_v9, %v2462_v0  ;;  %v2591_v43 = vrot.slane %v2589_v49, 1  ;;  %v2598_v21 = vrot.slane %v2596_v56, 1  ;;  %v2506_v42 = vsel %vm812_vm0, 0.0, %v7907_v40 }
 0x344   : > { %v2517_v39 = vsel %vm812_vm0, %v2462_v0, 0.0  ;;  %v7924_v53 = vpack.c.bf16 %v7918_v57, %v2507_v46  ;;  %v7928_v63 = vsel %vm812_vm0, %v7907_v40, %v2459_v2  ;;  %v2516_v18 = vsel %vm812_vm0, %v2459_v2, 0.0 }
 0x345   : > { %v7932_v27 = vpack.c.bf16 %v7928_v63, %v2506_v42  ;;  %5525 = vmatpush3.bf16.msra.mxu1 %v6246_v58  ;;  %v7935_v1 = vsel %vm2556_vm10, %v2587_v3, %v2591_v43  ;;  %v2386_v8 = vmax.f32 %v2366_v19, 0.0  ;;  %v2599_v24 = vor.u32 %v2598_v21, %v2594_v38  ;;  %v6249_v42 = vld [vmem:[#allocation13 + $0x20] sm:$0xff]  }
 0x346   : > { %5510 = vmatprep.mubr.bf16.mxu1 %v7935_v1  ;;  %v2603_v49 = vrot.slane %v2601_v37, 1  ;;  %5526 = vmatprep.subr.bf16.mxu1 %v6247_v50  ;;  %v5795_v47 = vadd.f32 %v2306_v14, %v7763_v26  ;;  %v5796_v52 = vadd.f32 %v5489_v15, %v7765_v60  ;;  %v7940_v7 = vpack.c.bf16 %v2517_v39, %v2517_v39 }
 0x347   : > { %v2418_v61 = vsel %vm7887_vm11, %v2386_v8, 0.0  ;;  %v5797_v58 = vadd.f32 %v2309_v34, %v7767_v55  ;;  %v2608_v54 = vshll.u32 %v7882_v51, 16  ;;  %v7946_v0 = vpack.c.bf16 %v2516_v18, %v2516_v18 }
 0x348   : > { %v7949_v38 = vsel %vm2556_vm10, %v2599_v24, %v2603_v49  ;;  %v2364_v56 = vadd.f32 %v5795_v47, %v7770_v22  ;;  %v2367_v26 = vadd.f32 %v5796_v52, %v7770_v22  ;;  %v2606_v14 = vshrl.u32 %v7882_v51, 16 }
 0x349   : > { %5511 = vmatmul.mubr.bf16.gmra.mrb[24].mxu1 %v7949_v38  ;;  %v2365_v60 = vadd.f32 %v5797_v58, %v7770_v22  ;;  %v2610_v15 = vrot.slane %v2608_v54, 1  ;;  %v2613_v55 = vshll.u32 %v7903_v59, 16  ;;  %v7957_v34 = vrot.slane %v2418_v61, 7 }
 0x34a   : > { %v2384_v2 = vmax.f32 %v2364_v56, 0.0  ;;  %5527 = vmatpush3.bf16.msra.mxu1 %v6247_v50  ;;  %v2387_v3 = vmax.f32 %v2367_v26, 0.0  ;;  %v2620_v19 = vshll.u32 %v7878_v29, 16  ;;  %v2625_v21 = vshll.u32 %v7893_v17, 16 }
 0x34b   : > { %v2385_v37 = vmax.f32 %v2365_v60, 0.0  ;;  %5528 = vmatprep.subr.bf16.mxu1 %v6248_v48  ;;  %v2611_v46 = vor.u32 %v2610_v15, %v2606_v14  ;;  %v2615_v43 = vrot.slane %v2613_v55, 1  ;;  %v2618_v18 = vshrl.u32 %v7878_v29, 16  ;;  %v6250_v60 = vld [vmem:[#allocation13 + $0x28] sm:$0xff]  }
 0x34c   : > { %v7961_v22 = vrot.slane %v2384_v2, 7  ;;  %v7965_v39 = vsel %vm7887_vm11, %v2387_v3, 0.0  ;;  %v2622_v8 = vrot.slane %v2620_v19, 1  ;;  %v2630_v47 = vshrl.u32 %v7932_v27, 16 }
 0x34d   : > { %v2468_v50 = vrot.slane %v7965_v39, 7  ;;  %v2465_v24 = vrot.slane %v2385_v37, 7  ;;  %v7970_v49 = vsel %vm2556_vm10, %v2611_v46, %v2615_v43  ;;  %v2627_v61 = vrot.slane %v2625_v21, 1  ;;  %v6254_v39 = vld [vmem:[#allocation13 + $0x88] sm:$0xff]  }
 0x34e   : > { %5529 = vmatpush3.bf16.msra.mxu1 %v6248_v48  ;;  %5514 = vmatprep.mubr.bf16.mxu1 %v7970_v49  ;;  %v2623_v52 = vor.u32 %v2622_v8, %v2618_v18  ;;  %v2632_v10 = vshll.u32 %v7932_v27, 16  ;;  %v2637_v58 = vshll.u32 %v7946_v0, 16  ;;  %v2508_v54 = vsel %vm812_vm0, 0.0, %v7961_v22 }
 0x34f   : > { %v2519_v56 = vsel %vm812_vm0, %v2468_v50, 0.0  ;;  %v2466_v26 = vsel %vm812_vm0, %v7961_v22, %v2465_v24  ;;  %v2518_v48 = vsel %vm812_vm0, %v2465_v24, 0.0  ;;  %5530 = vmatprep.subr.bf16.mxu1 %v6249_v42  ;;  %v2642_v2 = vshrl.u32 %v7924_v53, 16 }
 0x350   : > { %v7984_v14 = vpack.c.bf16 %v2466_v26, %v2508_v54  ;;  %v7986_v15 = vpack.c.bf16 %v2518_v48, %v2518_v48  ;;  %v7989_v55 = vsel %vm2556_vm10, %v2623_v52, %v2627_v61  ;;  %v2634_v3 = vrot.slane %v2632_v10, 1 }
 0x351   : > { %5515 = vmatmul.mubr.bf16.gmra.mrb[28].mxu1 %v7989_v55  ;;  %v2639_v19 = vrot.slane %v2637_v58, 1  ;;  %v2644_v37 = vshll.u32 %v7924_v53, 16  ;;  %v2649_v46 = vshll.u32 %v7940_v7, 16  ;;  %v4887_v43 = vpack.c.bf16 %v7797_v5, %v7777_v62 }
 0x352   : > { %5531 = vmatpush3.bf16.msra.mxu1 %v6249_v42  ;;  %v7999_v21 = vpack.c.bf16 %v7840_v36, %v7816_v20  ;;  %v8003_v18 = vpack.c.bf16 %v7832_v31, %v7814_v13  ;;  %v8007_v8 = vpack.c.bf16 %v7874_v33, %v7850_v12  ;;  %v2635_v24 = vor.u32 %v2634_v3, %v2630_v47  ;;  %v6251_v42 = vld [vmem:[#allocation13 + $0x30] sm:$0xff]  }
 0x353   : > { %5532 = vmatprep.subr.bf16.mxu1 %v6250_v60  ;;  %v2646_v52 = vrot.slane %v2644_v37, 1  ;;  %v2651_v61 = vrot.slane %v2649_v46, 1  ;;  %v8011_v62 = vpack.c.bf16 %v7869_v41, %v7848_v44  ;;  %v8020_v13 = vpack.c.bf16 %v7928_v63, %v7907_v40 }
 0x354   : > { %v8024_v20 = vpack.c.bf16 %v7918_v57, %v7898_v9  ;;  %v2985_v31 = vrot.slane %v7803_v16, 1  ;;  %v2986_v36 = vrot.slane %v7805_v25, 1  ;;  %v8029_v44 = vsel %vm2556_vm10, %v2635_v24, %v2639_v19 }
 0x355   : > { %v2647_v12 = vor.u32 %v2646_v52, %v2642_v2  ;;  %v2988_v41 = vrot.slane %v7788_v6, 1  ;;  %v2991_v33 = vrot.slane %v7846_v45, 1  ;;  %5518 = vmatprep.mubr.bf16.mxu1 %v8029_v44  ;;  %v2992_v9 = vrot.slane %v7856_v11, 1  ;;  %v6252_v45 = vld [vmem:[#allocation13 + $0x38] sm:$0xff]   ;;  %v6306_v6 = vld [vmem:[#allocation13 + $0x228] sm:$0xff]  }
 0x356   : > { %5533 = vmatpush3.bf16.msra.mxu1 %v6250_v60  ;;  %v8035_v40 = vsel %vm2984_vm12, %v2985_v31, %v2986_v36  ;;  %v2994_v16 = vrot.slane %v7836_v23, 1  ;;  %v2995_v25 = vrot.slane %v7854_v30, 1  ;;  %v2997_v23 = vrot.slane %v7882_v51, 1  ;;  %v6253_v60 = vld [vmem:[#allocation13 + $0x80] sm:$0xff]  }
 0x357   : > { %v8041_v57 = vsel %vm2556_vm10, %v2647_v12, %v2651_v61  ;;  %5534 = vmatprep.subr.bf16.mxu1 %v6251_v42  ;;  %v8052_v11 = vsel %vm2984_vm12, %v2988_v41, %v2989_v28  ;;  %v2998_v30 = vrot.slane %v7903_v59, 1  ;;  %v8057_v63 = vsel %vm2984_vm12, %v2991_v33, %v2992_v9  ;;  %v6255_v12 = vld [vmem:[#allocation13 + $0x90] sm:$0xff]  }
 0x358   : > { %v8060_v47 = vsel %vm2984_vm12, %v2994_v16, %v2995_v25  ;;  %v3000_v10 = vrot.slane %v7878_v29, 1  ;;  %v3001_v58 = vrot.slane %v7893_v17, 1  ;;  %v3003_v28 = vrot.slane %v7932_v27, 1  ;;  %v6256_v16 = vld [vmem:[#allocation13 + $0x98] sm:$0xff]   ;;  %v6257_v25 = vld [vmem:[#allocation13 + $0xa0] sm:$0xff]  }
 0x359   : > { %5519 = vmatmul.mubr.bf16.gmra.mrb[32].mxu1 %v8041_v57  ;;  %v8066_v32 = vsel %vm2984_vm12, %v2997_v23, %v2998_v30  ;;  %v3004_v51 = vrot.slane %v7946_v0, 1  ;;  %v3006_v59 = vrot.slane %v7924_v53, 1  ;;  %v2539_v54 = vpack.c.bf16 %v2519_v56, %v2519_v56  ;;  %v6259_v23 = vld [vmem:[#allocation13 + $0xb0] sm:$0xff]   ;;  %v6260_v30 = vld [vmem:[#allocation13 + $0xb8] sm:$0xff]  }
 0x35a   : > { %5535 = vmatpush3.bf16.msra.mxu1 %v6251_v42  ;;  %5538 = vmatprep.mubr.msk.bf16.mxu1 %vm8045_vm15, %v4887_v43  ;;  %v8074_v29 = vsel %vm2984_vm12, %v3000_v10, %v3001_v58  ;;  %v3007_v17 = vrot.slane %v7940_v7, 1  ;;  %v8078_v48 = vpack.c.bf16 %v2466_v26, %v7961_v22  ;;  %v3376_v53 = vshll.u32 %v7984_v14, 16  ;;  %v6261_v10 = vld [vmem:[#allocation13 + $0xc0] sm:$0xff]   ;;  %v6262_v58 = vld [vmem:[#allocation13 + $0xc8] sm:$0xff]  }
 0x35b   : > { %5536 = vmatprep.subr.bf16.mxu1 %v6252_v45  ;;  %v8081_v27 = vsel %vm2984_vm12, %v3003_v28, %v3004_v51  ;;  %v3381_v0 = vshll.u32 %v7986_v15, 16  ;;  %v3566_v56 = vrot.slane %v7984_v14, 1  ;;  %v2509_v2 = vsel %vm812_vm0, 0.0, %v7957_v34  ;;  %v6263_v28 = vld [vmem:[#allocation13 + $0xd0] sm:$0xff]   ;;  %v6264_v51 = vld [vmem:[#allocation13 + $0xd8] sm:$0xff]  }
 0x35c   : > { %v8089_v3 = vsel %vm2984_vm12, %v3006_v59, %v3007_v17  ;;  %v3567_v7 = vrot.slane %v7986_v15, 1  ;;  %v8096_v22 = vsel %vm812_vm0, %v7957_v34, %v2468_v50  ;;  %v3374_v26 = vshrl.u32 %v7984_v14, 16  ;;  %v6266_v59 = vld [vmem:[#allocation13 + $0xe8] sm:$0xff]   ;;  %v6268_v17 = vld [vmem:[#allocation13 + $0xf8] sm:$0xff]  }
 0x35d   : > { %v3378_v19 = vrot.slane %v3376_v53, 1  ;;  %v2538_v37 = vpack.c.bf16 %v8096_v22, %v2509_v2  ;;  %v5019_v46 = vpack.c.bf16 %v8096_v22, %v7957_v34  ;;  %v3934_v24 = vshll.u32 %v2539_v54, 16  ;;  %v6270_v53 = vld [vmem:[#allocation13 + $0x108] sm:$0xff]   ;;  %v6304_v34 = vld [vmem:[#allocation13 + $0x218] sm:$0xff]  }
 0x35e   : > { %5537 = vmatpush3.bf16.msra.mxu1 %v6252_v45  ;;  %v8103_v43 = vsel %vm2984_vm12, %v3566_v56, %v3567_v7  ;;  %v4120_v15 = vrot.slane %v2539_v54, 1  ;;  %v3383_v61 = vrot.slane %v3381_v0, 1  ;;  %v6258_v45 = vld [vmem:[#allocation13 + $0xa8] sm:$0xff]   ;;  %v6267_v54 = vld [vmem:[#allocation13 + $0xf0] sm:$0xff]   ;;  %v6272_v56 = vld [vmem:[#allocation13 + $0x118] sm:$0xff]   ;;  %vm4498_vm0 = vcmask 31744  }
 0x35f   : > { %5554 = vmatprep.subr.bf16.mxu1 %v6253_v60  ;;  %v3379_v52 = vor.u32 %v3378_v19, %v3374_v26  ;;  %v3929_v50 = vshll.u32 %v2538_v37, 16  ;;  %v4119_v42 = vrot.slane %v2538_v37, 1  ;;  %v3927_v5 = vshrl.u32 %v2538_v37, 16  ;;  %v6271_v0 = vld [vmem:[#allocation13 + $0x110] sm:$0xff]   ;;  %v6274_v2 = vld [vmem:[#allocation13 + $0x128] sm:$0xff]   ;;  %v6276_v26 = vld [vmem:[#allocation13 + $0x138] sm:$0xff]  }
 0x360   : > { %v3936_v33 = vrot.slane %v3934_v24, 1  ;;  %v6275_v7 = vld [vmem:[#allocation13 + $0x130] sm:$0xff]   ;;  %v6277_v19 = vld [vmem:[#allocation13 + $0x140] sm:$0xff]   ;;  %v6278_v37 = vld [vmem:[#allocation13 + $0x148] sm:$0xff]  }
 0x361   : > { %5539 = vmatmul.mubr.msk.bf16.vlgmr.msra.gmra.mrb[20].mxu1 %vm8045_vm15, %v7792_v35  ;;  %v8109_v14 = vsel %vm2556_vm10, %v3379_v52, %v3383_v61  ;;  %v3931_v31 = vrot.slane %v3929_v50, 1  ;;  %v8112_v36 = vsel %vm2984_vm12, %v4119_v42, %v4120_v15  ;;  %v6279_v24 = vld [vmem:[#allocation13 + $0x150] sm:$0xff]   ;;  %v6280_v15 = vld [vmem:[#allocation13 + $0x158] sm:$0xff]   ;;  %v6285_v50 = vld [vmem:[#allocation13 + $0x180] sm:$0xff]  }
 0x362   : > { %5542 = vmatprep.mubr.msk.bf16.mxu1 %vm8045_vm15, %v7999_v21  ;;  %5555 = vmatpush3.bf16.msra.mxu1 %v6253_v60  ;;  %v6269_v60 = vld [vmem:[#allocation13 + $0x100] sm:$0xff]   ;;  %v6283_v52 = vld [vmem:[#allocation13 + $0x170] sm:$0xff]   ;;  %v6284_v61 = vld [vmem:[#allocation13 + $0x178] sm:$0xff]  }
 0x363   : > { %5556 = vmatprep.subr.bf16.mxu1 %v6254_v39  ;;  %v3932_v41 = vor.u32 %v3931_v31, %v3927_v5  ;;  %v6286_v42 = vld [vmem:[#allocation13 + $0x188] sm:$0xff]   ;;  %v6287_v5 = vld [vmem:[#allocation13 + $0x190] sm:$0xff]   ;;  %v6288_v31 = vld [vmem:[#allocation13 + $0x198] sm:$0xff]  }
 0x365   : > { %v8118_v9 = vsel %vm2556_vm10, %v3932_v41, %v3936_v33  ;;  %v6291_v41 = vld [vmem:[#allocation13 + $0x1b0] sm:$0xff]   ;;  %v6292_v33 = vld [vmem:[#allocation13 + $0x1b8] sm:$0xff]  }
 0x366   : > { %5557 = vmatpush3.bf16.msra.mxu1 %v6254_v39  ;;  %v6282_v39 = vld [vmem:[#allocation13 + $0x168] sm:$0xff]  }
 0x367   : > { %5558 = vmatprep.subr.bf16.mxu1 %v6255_v12 }
 0x369   : > { %5543 = vmatmul.mubr.msk.bf16.gmra.mrb[24].mxu1 %vm8045_vm15, %v8003_v18 }
 0x36a   : > { %5546 = vmatprep.mubr.msk.bf16.mxu1 %vm8045_vm15, %v8007_v8  ;;  %5559 = vmatpush3.bf16.msra.mxu1 %v6255_v12  ;;  %v6290_v12 = vld [vmem:[#allocation13 + $0x1a8] sm:$0xff]  }
 0x36b   : > { %5560 = vmatprep.subr.bf16.mxu1 %v6256_v16 }
 0x36e   : > { %5561 = vmatpush3.bf16.msra.mxu1 %v6256_v16  ;;  %v6293_v16 = vld [vmem:[#allocation13 + $0x1c0] sm:$0xff]  }
 0x36f   : > { %5562 = vmatprep.subr.bf16.mxu1 %v6257_v25 }
 0x371   : > { %5547 = vmatmul.mubr.msk.bf16.gmra.mrb[28].mxu1 %vm8045_vm15, %v8011_v62 }
 0x372   : > { %5550 = vmatprep.mubr.msk.bf16.mxu1 %vm8045_vm15, %v8020_v13  ;;  %5563 = vmatpush3.bf16.msra.mxu1 %v6257_v25  ;;  %v6294_v25 = vld [vmem:[#allocation13 + $0x1c8] sm:$0xff]  }
 0x373   : > { %5564 = vmatprep.subr.bf16.mxu1 %v6258_v45 }
 0x376   : > { %5565 = vmatpush3.bf16.msra.mxu1 %v6258_v45  ;;  %v6295_v45 = vld [vmem:[#allocation13 + $0x1d0] sm:$0xff]  }
 0x377   : > { %5566 = vmatprep.subr.bf16.mxu1 %v6259_v23 }
 0x379   : > { %5551 = vmatmul.mubr.msk.bf16.gmra.mrb[32].mxu1 %vm8045_vm15, %v8024_v20 }
 0x37a   : > { %5567 = vmatpush3.bf16.msra.mxu1 %v6259_v23  ;;  %5570 = vmatprep.mubr.bf16.mxu1 %v8035_v40  ;;  %v6265_v40 = vld [vmem:[#allocation13 + $0xe0] sm:$0xff]   ;;  %v6296_v23 = vld [vmem:[#allocation13 + $0x1d8] sm:$0xff]  }
 0x37b   : > { %5568 = vmatprep.subr.bf16.mxu1 %v6260_v30 }
 0x37e   : > { %5569 = vmatpush3.bf16.msra.mxu1 %v6260_v30 }
 0x37f   : > { %5586 = vmatprep.subr.bf16.mxu1 %v6261_v10 }
 0x381   : > { %5571 = vmatmul.mubr.bf16.vlgmr.msra.gmra.mrb[20].mxu1 %v8052_v11 }
 0x382   : > { %5574 = vmatprep.mubr.bf16.mxu1 %v8057_v63  ;;  %5587 = vmatpush3.bf16.msra.mxu1 %v6261_v10 }
 0x383   : > { %5588 = vmatprep.subr.bf16.mxu1 %v6262_v58 }
 0x386   : > { %5589 = vmatpush3.bf16.msra.mxu1 %v6262_v58 }
 0x387   : > { %5590 = vmatprep.subr.bf16.mxu1 %v6263_v28 }
 0x389   : > { %5575 = vmatmul.mubr.bf16.gmra.mrb[24].mxu1 %v8060_v47 }
 0x38a   : > { %5578 = vmatprep.mubr.bf16.mxu1 %v8066_v32  ;;  %5591 = vmatpush3.bf16.msra.mxu1 %v6263_v28 }
 0x38b   : > { %5592 = vmatprep.subr.bf16.mxu1 %v6264_v51 }
 0x38e   : > { %5593 = vmatpush3.bf16.msra.mxu1 %v6264_v51 }
 0x38f   : > { %5594 = vmatprep.subr.bf16.mxu1 %v6265_v40 }
 0x391   : > { %5579 = vmatmul.mubr.bf16.gmra.mrb[28].mxu1 %v8074_v29 }
 0x392   : > { %5582 = vmatprep.mubr.bf16.mxu1 %v8081_v27  ;;  %5595 = vmatpush3.bf16.msra.mxu1 %v6265_v40 }
 0x393   : > { %5596 = vmatprep.subr.bf16.mxu1 %v6266_v59 }
 0x396   : > { %5597 = vmatpush3.bf16.msra.mxu1 %v6266_v59 }
 0x397   : > { %5598 = vmatprep.subr.bf16.mxu1 %v6267_v54 }
 0x399   : > { %5583 = vmatmul.mubr.bf16.gmra.mrb[32].mxu1 %v8089_v3 }
 0x39a   : > { %5599 = vmatpush3.bf16.msra.mxu1 %v6267_v54  ;;  %5602 = vmatprep.mubr.msk.bf16.mxu1 %vm8045_vm15, %v7792_v35  ;;  %v6273_v35 = vld [vmem:[#allocation13 + $0x120] sm:$0xff]  }
 0x39b   : > { %5600 = vmatprep.subr.bf16.mxu1 %v6268_v17 }
 0x39e   : > { %5601 = vmatpush3.bf16.msra.mxu1 %v6268_v17 }
 0x39f   : > { %5618 = vmatprep.subr.bf16.mxu1 %v6269_v60 }
 0x3a1   : > { %5603 = vmatmul.mubr.msk.bf16.vlgmr.msra.gmra.mrb[20].mxu1 %vm8045_vm15, %v7999_v21 }
 0x3a2   : > { %5606 = vmatprep.mubr.msk.bf16.mxu1 %vm8045_vm15, %v8003_v18  ;;  %5619 = vmatpush3.bf16.msra.mxu1 %v6269_v60 }
 0x3a3   : > { %5620 = vmatprep.subr.bf16.mxu1 %v6270_v53 }
 0x3a6   : > { %5621 = vmatpush3.bf16.msra.mxu1 %v6270_v53 }
 0x3a7   : > { %5622 = vmatprep.subr.bf16.mxu1 %v6271_v0 }
 0x3a9   : > { %5607 = vmatmul.mubr.msk.bf16.gmra.mrb[24].mxu1 %vm8045_vm15, %v8007_v8 }
 0x3aa   : > { %5610 = vmatprep.mubr.msk.bf16.mxu1 %vm8045_vm15, %v8011_v62  ;;  %5623 = vmatpush3.bf16.msra.mxu1 %v6271_v0 }
 0x3ab   : > { %5624 = vmatprep.subr.bf16.mxu1 %v6272_v56 }
 0x3ae   : > { %5625 = vmatpush3.bf16.msra.mxu1 %v6272_v56 }
 0x3af   : > { %5626 = vmatprep.subr.bf16.mxu1 %v6273_v35 }
 0x3b1   : > { %5611 = vmatmul.mubr.msk.bf16.gmra.mrb[28].mxu1 %vm8045_vm15, %v8020_v13 }
 0x3b2   : > { %5614 = vmatprep.mubr.msk.bf16.mxu1 %vm8045_vm15, %v8024_v20  ;;  %5627 = vmatpush3.bf16.msra.mxu1 %v6273_v35 }
 0x3b3   : > { %5628 = vmatprep.subr.bf16.mxu1 %v6274_v2 }
 0x3b6   : > { %5629 = vmatpush3.bf16.msra.mxu1 %v6274_v2 }
 0x3b7   : > { %5630 = vmatprep.subr.bf16.mxu1 %v6275_v7 }
 0x3b9   : > { %5615 = vmatmul.mubr.msk.bf16.gmra.mrb[32].mxu1 %vm8045_vm15, %v8078_v48 }
 0x3ba   : > { %5631 = vmatpush3.bf16.msra.mxu1 %v6275_v7  ;;  %5634 = vmatprep.mubr.bf16.mxu1 %v7901_v4  ;;  %v6281_v4 = vld [vmem:[#allocation13 + $0x160] sm:$0xff]  }
 0x3bb   : > { %5632 = vmatprep.subr.bf16.mxu1 %v6276_v26 }
 0x3be   : > { %5633 = vmatpush3.bf16.msra.mxu1 %v6276_v26 }
 0x3bf   : > { %5650 = vmatprep.subr.bf16.mxu1 %v6277_v19 }
 0x3c1   : > { %5635 = vmatmul.mubr.bf16.vlgmr.msra.gmra.mrb[20].mxu1 %v7935_v1 }
 0x3c2   : > { %5638 = vmatprep.mubr.bf16.mxu1 %v7949_v38  ;;  %5651 = vmatpush3.bf16.msra.mxu1 %v6277_v19 }
 0x3c3   : > { %5652 = vmatprep.subr.bf16.mxu1 %v6278_v37 }
 0x3c6   : > { %5653 = vmatpush3.bf16.msra.mxu1 %v6278_v37  ;;  %v4326_v37 = vld [vmem:[%s7052_s23 + $0x10] sm:$0xff] }
 0x3c7   : > { %5654 = vmatprep.subr.bf16.mxu1 %v6279_v24 }
 0x3c9   : > { %5639 = vmatmul.mubr.bf16.gmra.mrb[24].mxu1 %v7970_v49 }
 0x3ca   : > { %5642 = vmatprep.mubr.bf16.mxu1 %v7989_v55  ;;  %5655 = vmatpush3.bf16.msra.mxu1 %v6279_v24  ;;  %v8278_v24 = vld [vmem:[#allocation7] ss:$0 sm:$0xff] }
 0x3cb   : > { %5656 = vmatprep.subr.bf16.mxu1 %v6280_v15 }
 0x3ce   : > { %5657 = vmatpush3.bf16.msra.mxu1 %v6280_v15  ;;  %v4324_v15 = vld [vmem:[%s7052_s23] sm:$0xff] }
 0x3cf   : > { %5658 = vmatprep.subr.bf16.mxu1 %v6281_v4 }
 0x3d1   : > { %5643 = vmatmul.mubr.bf16.gmra.mrb[28].mxu1 %v8029_v44 }
 0x3d2   : > { %5646 = vmatprep.mubr.bf16.mxu1 %v8041_v57  ;;  %5659 = vmatpush3.bf16.msra.mxu1 %v6281_v4  ;;  %v4349_v4 = vsub.f32 %v4326_v37, %v8278_v24 }
 0x3d3   : > { %5660 = vmatprep.subr.bf16.mxu1 %v6282_v39 }
 0x3d6   : > { %5661 = vmatpush3.bf16.msra.mxu1 %v6282_v39  ;;  %v8282_v39 = vld [vmem:[#allocation8] ss:$0 sm:$0xff] }
 0x3d7   : > { %5662 = vmatprep.subr.bf16.mxu1 %v6283_v52 }
 0x3d9   : > { %5647 = vmatmul.mubr.bf16.gmra.mrb[32].mxu1 %v8109_v14 }
 0x3da   : > { %5663 = vmatpush3.bf16.msra.mxu1 %v6283_v52  ;;  %5666 = vmatprep.mubr.bf16.mxu1 %v8052_v11  ;;  %v6289_v11 = vld [vmem:[#allocation13 + $0x1a0] sm:$0xff]   ;;  %v4347_v52 = vsub.f32 %v4324_v15, %v8278_v24  ;;  %v4333_v15 = vld [vmem:[%s7052_s23 + $0x48] sm:$0xff] }
 0x3db   : > { %5664 = vmatprep.subr.bf16.mxu1 %v6284_v61 }
 0x3de   : > { %5665 = vmatpush3.bf16.msra.mxu1 %v6284_v61  ;;  %v4327_v61 = vld [vmem:[%s7052_s23 + $0x18] sm:$0xff] }
 0x3df   : > { %5682 = vmatprep.subr.bf16.mxu1 %v6285_v50 }
 0x3e1   : > { %5667 = vmatmul.mubr.bf16.vlgmr.msra.gmra.mrb[20].mxu1 %v8057_v63 }
 0x3e2   : > { %5670 = vmatprep.mubr.bf16.mxu1 %v8060_v47  ;;  %5683 = vmatpush3.bf16.msra.mxu1 %v6285_v50  ;;  %v4325_v50 = vld [vmem:[%s7052_s23 + $0x8] sm:$0xff] }
 0x3e3   : > { %5684 = vmatprep.subr.bf16.mxu1 %v6286_v42 }
 0x3e6   : > { %5685 = vmatpush3.bf16.msra.mxu1 %v6286_v42 }
 0x3e7   : > { %5686 = vmatprep.subr.bf16.mxu1 %v6287_v5 }
 0x3e9   : > { %5671 = vmatmul.mubr.bf16.gmra.mrb[24].mxu1 %v8066_v32 }
 0x3ea   : > { %5674 = vmatprep.mubr.bf16.mxu1 %v8074_v29  ;;  %5687 = vmatpush3.bf16.msra.mxu1 %v6287_v5  ;;  %v4372_v5 = vmul.f32 %v8282_v39, %v4349_v4 }
 0x3eb   : > { %5688 = vmatprep.subr.bf16.mxu1 %v6288_v31 }
 0x3ee   : > { %5689 = vmatpush3.bf16.msra.mxu1 %v6288_v31  ;;  %v4350_v31 = vsub.f32 %v4327_v61, %v8278_v24 }
 0x3ef   : > { %5690 = vmatprep.subr.bf16.mxu1 %v6289_v11 }
 0x3f1   : > { %5675 = vmatmul.mubr.bf16.gmra.mrb[28].mxu1 %v8081_v27 }
 0x3f2   : > { %5678 = vmatprep.mubr.bf16.mxu1 %v8089_v3  ;;  %5691 = vmatpush3.bf16.msra.mxu1 %v6289_v11 }
 0x3f3   : > { %5692 = vmatprep.subr.bf16.mxu1 %v6290_v12 }
 0x3f6   : > { %5693 = vmatpush3.bf16.msra.mxu1 %v6290_v12  ;;  %v4370_v12 = vmul.f32 %v8282_v39, %v4347_v52 }
 0x3f7   : > { %5694 = vmatprep.subr.bf16.mxu1 %v6291_v41 }
 0x3f9   : > { %5679 = vmatmul.mubr.bf16.gmra.mrb[32].mxu1 %v8103_v43 }
 0x3fa   : > { %5695 = vmatpush3.bf16.msra.mxu1 %v6291_v41  ;;  %5698 = vmatprep.mubr.msk.bf16.mxu1 %vm8045_vm15, %v7999_v21  ;;  %v6297_v21 = vld [vmem:[#allocation13 + $0x1e0] sm:$0xff]   ;;  %v4348_v41 = vsub.f32 %v4325_v50, %v8278_v24 }
 0x3fb   : > { %5696 = vmatprep.subr.bf16.mxu1 %v6292_v33 }
 0x3fe   : > { %5697 = vmatpush3.bf16.msra.mxu1 %v6292_v33  ;;  %v4330_v33 = vld [vmem:[%s7052_s23 + $0x30] sm:$0xff] }
 0x3ff   : > { %5714 = vmatprep.subr.bf16.mxu1 %v6293_v16 }
 0x401   : > { %5699 = vmatmul.mubr.msk.bf16.vlgmr.msra.gmra.mrb[20].mxu1 %vm8045_vm15, %v8003_v18  ;;  %v6298_v18 = vld [vmem:[#allocation13 + $0x1e8] sm:$0xff]  }
 0x402   : > { %5702 = vmatprep.mubr.msk.bf16.mxu1 %vm8045_vm15, %v8007_v8  ;;  %5715 = vmatpush3.bf16.msra.mxu1 %v6293_v16  ;;  %v6299_v8 = vld [vmem:[#allocation13 + $0x1f0] sm:$0xff]   ;;  %v4331_v16 = vld [vmem:[%s7052_s23 + $0x38] sm:$0xff] }
 0x403   : > { %5716 = vmatprep.subr.bf16.mxu1 %v6294_v25 }
 0x406   : > { %5717 = vmatpush3.bf16.msra.mxu1 %v6294_v25 }
 0x407   : > { %5718 = vmatprep.subr.bf16.mxu1 %v6295_v45 }
 0x409   : > { %5703 = vmatmul.mubr.msk.bf16.gmra.mrb[24].mxu1 %vm8045_vm15, %v8011_v62  ;;  %v6300_v62 = vld [vmem:[#allocation13 + $0x1f8] sm:$0xff]  }
 0x40a   : > { %5706 = vmatprep.mubr.msk.bf16.mxu1 %vm8045_vm15, %v8020_v13  ;;  %5719 = vmatpush3.bf16.msra.mxu1 %v6295_v45  ;;  %v6301_v13 = vld [vmem:[#allocation13 + $0x200] sm:$0xff]  }
 0x40b   : > { %5720 = vmatprep.subr.bf16.mxu1 %v6296_v23 }
 0x40e   : > { %5721 = vmatpush3.bf16.msra.mxu1 %v6296_v23  ;;  %v4373_v23 = vmul.f32 %v8282_v39, %v4350_v31 }
 0x40f   : > { %5722 = vmatprep.subr.bf16.mxu1 %v6297_v21 }
 0x411   : > { %5707 = vmatmul.mubr.msk.bf16.gmra.mrb[28].mxu1 %vm8045_vm15, %v8024_v20  ;;  %v6302_v20 = vld [vmem:[#allocation13 + $0x208] sm:$0xff]  }
 0x412   : > { %5710 = vmatprep.mubr.msk.bf16.mxu1 %vm8045_vm15, %v8078_v48  ;;  %5723 = vmatpush3.bf16.msra.mxu1 %v6297_v21  ;;  %v6303_v48 = vld [vmem:[#allocation13 + $0x210] sm:$0xff]  }
 0x413   : > { %5724 = vmatprep.subr.bf16.mxu1 %v6298_v18 }
 0x416   : > { %5725 = vmatpush3.bf16.msra.mxu1 %v6298_v18 }
 0x417   : > { %5726 = vmatprep.subr.bf16.mxu1 %v6299_v8 }
 0x419   : > { %5711 = vmatmul.mubr.msk.bf16.gmra.mrb[32].mxu1 %vm8045_vm15, %v5019_v46 }
 0x41a   : > { %5727 = vmatpush3.bf16.msra.mxu1 %v6299_v8  ;;  %5730 = vmatprep.mubr.bf16.mxu1 %v7935_v1  ;;  %v6305_v1 = vld [vmem:[#allocation13 + $0x220] sm:$0xff]  }
 0x41b   : > { %5728 = vmatprep.subr.bf16.mxu1 %v6300_v62 }
 0x41e   : > { %5729 = vmatpush3.bf16.msra.mxu1 %v6300_v62  ;;  %v4371_v62 = vmul.f32 %v8282_v39, %v4348_v41 }
 0x41f   : > { %5746 = vmatprep.subr.bf16.mxu1 %v6301_v13 }
 0x421   : > { %5731 = vmatmul.mubr.bf16.vlgmr.msra.gmra.mrb[20].mxu1 %v7949_v38  ;;  %v6307_v38 = vld [vmem:[#allocation13 + $0x230] sm:$0xff]  }
 0x422   : > { %5734 = vmatprep.mubr.bf16.mxu1 %v7970_v49  ;;  %5747 = vmatpush3.bf16.msra.mxu1 %v6301_v13  ;;  %v6308_v49 = vld [vmem:[#allocation13 + $0x238] sm:$0xff]   ;;  %v4353_v13 = vsub.f32 %v4330_v33, %v8278_v24 }
 0x423   : > { %5748 = vmatprep.subr.bf16.mxu1 %v6302_v20 }
 0x426   : > { %5749 = vmatpush3.bf16.msra.mxu1 %v6302_v20 }
 0x427   : > { %5750 = vmatprep.subr.bf16.mxu1 %v6303_v48 }
 0x429   : > { %5735 = vmatmul.mubr.bf16.gmra.mrb[24].mxu1 %v7989_v55  ;;  %v5037_v55 = vld [vmem:[#allocation14] ss:$0 sm:$0xff] }
 0x42a   : > { %5738 = vmatprep.mubr.bf16.mxu1 %v8029_v44  ;;  %5751 = vmatpush3.bf16.msra.mxu1 %v6303_v48 }
 0x42b   : > { %5752 = vmatprep.subr.bf16.mxu1 %v6304_v34 }
 0x42e   : > { %5753 = vmatpush3.bf16.msra.mxu1 %v6304_v34  ;;  %v4354_v34 = vsub.f32 %v4331_v16, %v8278_v24 }
 0x42f   : > { %5754 = vmatprep.subr.bf16.mxu1 %v6305_v1 }
 0x431   : > { %5739 = vmatmul.mubr.bf16.gmra.mrb[28].mxu1 %v8041_v57 }
 0x432   : > { %5742 = vmatprep.mubr.bf16.mxu1 %v8109_v14  ;;  %5755 = vmatpush3.bf16.msra.mxu1 %v6305_v1  ;;  %v4328_v1 = vld [vmem:[%s7052_s23 + $0x20] sm:$0xff] }
 0x433   : > { %5756 = vmatprep.subr.bf16.mxu1 %v6306_v6 }
 0x436   : > { %5757 = vmatpush3.bf16.msra.mxu1 %v6306_v6 }
 0x437   : > { %5758 = vmatprep.subr.bf16.mxu1 %v6307_v38 }
 0x439   : > { %5743 = vmatmul.mubr.bf16.gmra.mrb[32].mxu1 %v8118_v9 }
 0x43a   : > { %5759 = vmatpush3.bf16.msra.mxu1 %v6307_v38  ;;  %5762 = vmatprep.mubr.bf16.mxu1 %v8057_v63  ;;  %v4329_v38 = vld [vmem:[%s7052_s23 + $0x28] sm:$0xff] }
 0x43b   : > { %5760 = vmatprep.subr.bf16.mxu1 %v6308_v49 }
 0x43e   : > { %5761 = vmatpush3.bf16.msra.mxu1 %v6308_v49 }
 0x441   : > { %5763 = vmatmul.mubr.bf16.vlgmr.msra.gmra.mrb[20].mxu1 %v8060_v47 }
 0x442   : > { %5766 = vmatprep.mubr.bf16.mxu1 %v8066_v32 }
 0x449   : > { %5767 = vmatmul.mubr.bf16.gmra.mrb[24].mxu1 %v8074_v29 }
 0x44a   : > { %5770 = vmatprep.mubr.bf16.mxu1 %v8081_v27 }
 0x451   : > { %5771 = vmatmul.mubr.bf16.gmra.mrb[28].mxu1 %v8089_v3 }
 0x452   : > { %5774 = vmatprep.mubr.bf16.mxu1 %v8103_v43 }
 0x459   : > { %5775 = vmatmul.mubr.bf16.gmra.mrb[32].mxu1 %v8112_v36 }
 0x514   : > { %v5764_v44 = vpop.f32.mrb[20].mxu1 }
 0x515   : > { %v4310_v57 = vadd.f32 %v5764_v44, %v5037_v55  ;;  %v4222_v63 = vpop.f32.mrb[21].mxu1 }
 0x516   : > { %v4308_v22 = vadd.f32 %v5037_v55, %v4222_v63  ;;  %v5765_v46 = vpop.f32.mrb[22].mxu1  ;;  %v4376_v63 = vmul.f32 %v8282_v39, %v4353_v13 }
 0x517   : > { %4438 = vrot.lane.b32.xlu1 %v4310_v57, %s6673_s24  ;;  %v4225_v47 = vpop.f32.mrb[23].mxu1  ;;  %v4311_v32 = vadd.f32 %v5765_v46, %v5037_v55  ;;  %v4388_v42 = vadd.f32 1.0, %v4310_v57 }
 0x518   : > { %4434 = vrot.lane.b32.xlu0 %v4308_v22, %s6673_s24  ;;  %v4309_v29 = vadd.f32 %v5037_v55, %v4225_v47  ;;  %v4386_v11 = vadd.f32 1.0, %v4308_v22  ;;  %v4351_v22 = vsub.f32 %v4328_v1, %v8278_v24 }
 0x519   : > { %v4389_v25 = vadd.f32 1.0, %v4311_v32  ;;  %v4404_v45 = vmul.f32 %v4388_v42, %v4372_v5 }
 0x51a   : > { %v4387_v21 = vadd.f32 1.0, %v4309_v29  ;;  %v4402_v8 = vmul.f32 %v4386_v11, %v4370_v12  ;;  %v4356_v12 = vsub.f32 %v4333_v15, %v8278_v24 }
 0x51b   : > { %4440 = vrot.lane.b32.xlu1 %v4311_v32, %s6673_s24  ;;  %v4405_v49 = vmul.f32 %v4389_v25, %v4373_v23  ;;  %v4337_v25 = vld [vmem:[%s7052_s23 + $0x68] sm:$0xff] }
 0x51c   : > { %4436 = vrot.lane.b32.xlu0 %v4309_v29, %s6673_s24  ;;  %v5768_v27 = vpop.f32.mrb[24].mxu1  ;;  %v4403_v57 = vmul.f32 %v4387_v21, %v4371_v62  ;;  %v4377_v29 = vmul.f32 %v8282_v39, %v4354_v34  ;;  %v4379_v13 = vmul.f32 %v8282_v39, %v4356_v12  ;;  %v4360_v34 = vsub.f32 %v4337_v25, %v8278_v24 }
 0x51d   : > { %v8229_v3 = vadd.f32 %v5768_v27, %v5037_v55  ;;  %v4238_v43 = vpop.f32.mrb[25].mxu1  ;;  %v4352_v27 = vsub.f32 %v4329_v38, %v8278_v24 }
 0x51e   : > { %v5769_v14 = vpop.f32.mrb[26].mxu1  ;;  %v8237_v30 = vadd.f32 %v5037_v55, %v4238_v43  ;;  %v4334_v43 = vld [vmem:[%s7052_s23 + $0x50] sm:$0xff] }
 0x51f   : > { %v8231_v36 = vadd.f32 %v5769_v14, %v5037_v55  ;;  %v4241_v9 = vpop.f32.mrb[27].mxu1  ;;  %v4335_v14 = vld [vmem:[%s7052_s23 + $0x58] sm:$0xff] }
 0x520   : > { %4446 = vrot.lane.b32.xlu0 %v8229_v3, %s6673_s24  ;;  %v8239_v10 = vadd.f32 %v5037_v55, %v4241_v9  ;;  %v4390_v9 = vadd.f32 1.0, %v8237_v30 }
 0x521   : > { %4448 = vrot.lane.b32.xlu1 %v8231_v36, %s6673_s24  ;;  %v4393_v46 = vadd.f32 1.0, %v8231_v36  ;;  %v4374_v36 = vmul.f32 %v8282_v39, %v4351_v22 }
 0x524   : > { %4442 = vrot.lane.b32.xlu0 %v8237_v30, %s6673_s24  ;;  %v5772_v58 = vpop.f32.mrb[28].mxu1 }
 0x525   : > { %v8243_v28 = vadd.f32 %v5772_v58, %v5037_v55  ;;  %4444 = vrot.lane.b32.xlu1 %v8239_v10, %s6673_s24  ;;  %v4254_v51 = vpop.f32.mrb[29].mxu1 }
 0x526   : > { %v5773_v40 = vpop.f32.mrb[30].mxu1  ;;  %v8253_v17 = vadd.f32 %v5037_v55, %v4254_v51  ;;  %v4357_v51 = vsub.f32 %v4334_v43, %v8278_v24 }
 0x527   : > { %v8247_v59 = vadd.f32 %v5773_v40, %v5037_v55  ;;  %v4257_v54 = vpop.f32.mrb[31].mxu1  ;;  %v4391_v40 = vadd.f32 1.0, %v8239_v10  ;;  %v4396_v52 = vadd.f32 1.0, %v8243_v28  ;;  %v4406_v10 = vmul.f32 %v4390_v9, %v4374_v36 }
 0x528   : > { %4454 = vrot.lane.b32.xlu0 %v8243_v28, %s6673_s24  ;;  %v8255_v60 = vadd.f32 %v5037_v55, %v4257_v54  ;;  %v4380_v61 = vmul.f32 %v8282_v39, %v4357_v51  ;;  %v4336_v28 = vld [vmem:[%s7052_s23 + $0x60] sm:$0xff] }
 0x529   : > { %4456 = vrot.lane.b32.xlu1 %v8247_v59, %s6673_s24  ;;  %v4397_v42 = vadd.f32 1.0, %v8247_v59  ;;  %v4359_v21 = vsub.f32 %v4336_v28, %v8278_v24 }
 0x52a   : > { %v4412_v59 = vmul.f32 %v4396_v52, %v4380_v61 }
 0x52c   : > { %4450 = vrot.lane.b32.xlu0 %v8253_v17, %s6673_s24  ;;  %v5776_v53 = vpop.f32.mrb[32].mxu1 }
 0x52d   : > { %4452 = vrot.lane.b32.xlu1 %v8255_v60, %s6673_s24  ;;  %v4270_v0 = vpop.f32.mrb[33].mxu1  ;;  %v8267_v26 = vadd.f32 %v5776_v53, %v5037_v55  ;;  %v4409_v53 = vmul.f32 %v4393_v46, %v4377_v29 }
 0x52e   : > { %v8261_v56 = vadd.f32 %v5037_v55, %v4270_v0  ;;  %v5777_v35 = vpop.f32.mrb[34].mxu1  ;;  %v4375_v0 = vmul.f32 %v8282_v39, %v4352_v27 }
 0x52f   : > { %v4273_v2 = vpop.f32.mrb[35].mxu1  ;;  %v8271_v19 = vadd.f32 %v5777_v35, %v5037_v55  ;;  %v4358_v35 = vsub.f32 %v4335_v14, %v8278_v24  ;;  %v4400_v29 = vadd.f32 1.0, %v8267_v26 }
 0x530   : > { %v8263_v7 = vadd.f32 %v5037_v55, %v4273_v2  ;;  %4458 = vrot.lane.b32.xlu0 %v8261_v56, %s6673_s24  ;;  %v4392_v55 = vadd.f32 1.0, %v8229_v3  ;;  %v4332_v2 = vld [vmem:[%s7052_s23 + $0x40] sm:$0xff]  ;;  %v4407_v31 = vmul.f32 %v4391_v40, %v4375_v0  ;;  %v4398_v38 = vadd.f32 1.0, %v8261_v56 }
 0x531   : > { %v4355_v50 = vsub.f32 %v4332_v2, %v8278_v24  ;;  %v4381_v11 = vmul.f32 %v8282_v39, %v4358_v35 }
 0x532   : > { %4460 = vrot.lane.b32.xlu1 %v8263_v7, %s6673_s24  ;;  %v4408_v58 = vmul.f32 %v4392_v55, %v4376_v63  ;;  %v4399_v63 = vadd.f32 1.0, %v8263_v7 }
 0x533   : > { %v4378_v23 = vmul.f32 %v8282_v39, %v4355_v50  ;;  %v4413_v62 = vmul.f32 %v4397_v42, %v4381_v11 }
 0x534   : > { %4462 = vrot.lane.b32.xlu0 %v8267_v26, %s6673_s24 }
 0x536   : > { %4464 = vrot.lane.b32.xlu1 %v8271_v19, %s6673_s24 }
 0x589   : > { %v4439_v18 = vpop.permute.xlu1 %4438 }
 0x58a   : > { %v4484_v20 = vadd.f32 %v4439_v18, %v4404_v45  ;;  %v4435_v48 = vpop.permute.xlu0 %4434  ;;  %v4394_v45 = vadd.f32 1.0, %v8253_v17  ;;  %v4395_v18 = vadd.f32 1.0, %v8255_v60 }
 0x58b   : > { %v4482_v6 = vadd.f32 %v4435_v48, %v4402_v8 }
 0x58c   : > { %4501 = vst.msk [vmem:[%s8301_s4 + $0x10] sm:$0xff] %vm4498_vm0, %v4484_v20  ;;  %v4338_v20 = vld [vmem:[%s7052_s23 + $0x70] sm:$0xff]  ;;  %v4410_v60 = vmul.f32 %v4394_v45, %v4378_v23 }
 0x58d   : > { %4499 = vst.msk [vmem:[%s8301_s4] sm:$0xff] %vm4498_vm0, %v4482_v6  ;;  %v4441_v44 = vpop.permute.xlu1 %4440  ;;  %v4339_v6 = vld [vmem:[%s7052_s23 + $0x78] sm:$0xff]  ;;  %v4361_v55 = vsub.f32 %v4338_v20, %v8278_v24  ;;  %s6674_s23 = smov [#allocation16]  }
 0x58e   : > { %v4485_v47 = vadd.f32 %v4441_v44, %v4405_v49  ;;  %v4437_v32 = vpop.permute.xlu0 %4436  ;;  %v4382_v49 = vmul.f32 %v8282_v39, %v4359_v21  ;;  %v4362_v56 = vsub.f32 %v4339_v6, %v8278_v24  ;;  %s6541_s14 = sshll.u32 %s6674_s23, 4  ;;  %s6542_s14 = int_to_ptr.vmem [resolvable:$false] %s6541_s14 }
 0x58f   : > { %v4483_v3 = vadd.f32 %v4437_v32, %v4403_v57  ;;  %v4411_v57 = vmul.f32 %v4395_v18, %v4379_v13  ;;  %v4384_v43 = vmul.f32 %v8282_v39, %v4361_v55  ;;  %s6543_s26 = scalar_lea.vmem %s6542_s14, 4096  ;;  %p6544_p7 = scmp.lt.s32.totalorder %s8376_s7, %s6542_s14 }
 0x590   : > { %4502 = vst.msk [vmem:[%s8301_s4 + $0x18] sm:$0xff] %vm4498_vm0, %v4485_v47  ;;  %v4383_v47 = vmul.f32 %v8282_v39, %v4360_v34  ;;  %v4414_v27 = vmul.f32 %v4398_v38, %v4382_v49  ;;  %v4385_v9 = vmul.f32 %v8282_v39, %v4362_v56  ;;  %p6545_p5 = scmp.lt.s32.totalorder %s6543_s26, %s6537_s2 }
 0x591   : > { %4500 = vst.msk [vmem:[%s8301_s4 + $0x8] sm:$0xff] %vm4498_vm0, %v4483_v3  ;;  %v4401_v3 = vadd.f32 1.0, %v8271_v19  ;;  %v4416_v36 = vmul.f32 %v4400_v29, %v4384_v43 }
 0x592   : > { %v4447_v54 = vpop.permute.xlu0 %4446  ;;  %v4415_v24 = vmul.f32 %v4399_v63, %v4383_v47  ;;  %p6546_p6 = por %p6545_p5, %p6544_p7 }
 0x593   : > { %v4488_v30 = vadd.f32 %v4447_v54, %v4408_v58  ;;  %v4449_v37 = vpop.permute.xlu1 %4448  ;;  %v4417_v40 = vmul.f32 %v4401_v3, %v4385_v9 }
 0x594   : > { %v4489_v4 = vadd.f32 %v4449_v37, %v4409_v53  ;;  %p6547_p9 = pnand %p6546_p6, %p6540_p8 }
 0x595   : > { %4505 = vst.msk [vmem:[%s8301_s4 + $0x30] sm:$0xff] %vm4498_vm0, %v4488_v30 }
 0x596   : > { %4506 = vst.msk [vmem:[%s8301_s4 + $0x38] sm:$0xff] %vm4498_vm0, %v4489_v4  ;;  %v4443_v5 = vpop.permute.xlu0 %4442 }
 0x597   : > { %v4486_v41 = vadd.f32 %v4443_v5, %v4406_v10  ;;  %v4445_v33 = vpop.permute.xlu1 %4444 }
 0x598   : > { %v4487_v16 = vadd.f32 %v4445_v33, %v4407_v31 }
 0x599   : > { %4503 = vst.msk [vmem:[%s8301_s4 + $0x20] sm:$0xff] %vm4498_vm0, %v4486_v41 }
 0x59a   : > { %4504 = vst.msk [vmem:[%s8301_s4 + $0x28] sm:$0xff] %vm4498_vm0, %v4487_v16  ;;  %v4455_v8 = vpop.permute.xlu0 %4454 }
 0x59b   : > { %v4492_v48 = vadd.f32 %v4455_v8, %v4412_v59  ;;  %v4457_v17 = vpop.permute.xlu1 %4456 }
 0x59c   : > { %v4493_v1 = vadd.f32 %v4457_v17, %v4413_v62 }
 0x59d   : > { %4509 = vst.msk [vmem:[%s8301_s4 + $0x50] sm:$0xff] %vm4498_vm0, %v4492_v48 }
 0x59e   : > { %4510 = vst.msk [vmem:[%s8301_s4 + $0x58] sm:$0xff] %vm4498_vm0, %v4493_v1  ;;  %v4451_v44 = vpop.permute.xlu0 %4450 }
 0x59f   : > { %v4490_v22 = vadd.f32 %v4451_v44, %v4410_v60  ;;  %v4453_v46 = vpop.permute.xlu1 %4452 }
 0x5a0   : > { %v4491_v32 = vadd.f32 %v4453_v46, %v4411_v57 }
 0x5a1   : > { %4507 = vst.msk [vmem:[%s8301_s4 + $0x40] sm:$0xff] %vm4498_vm0, %v4490_v22 }
 0x5a2   : > { %4508 = vst.msk [vmem:[%s8301_s4 + $0x48] sm:$0xff] %vm4498_vm0, %v4491_v32  ;;  %v4459_v7 = vpop.permute.xlu0 %4458 }
 0x5a3   : > { %v4494_v14 = vadd.f32 %v4459_v7, %v4414_v27 }
 0x5a4   : > { %v4461_v58 = vpop.permute.xlu1 %4460 }
 0x5a5   : > { %4511 = vst.msk [vmem:[%s8301_s4 + $0x60] sm:$0xff] %vm4498_vm0, %v4494_v14  ;;  %v4495_v26 = vadd.f32 %v4461_v58, %v4415_v24 }
 0x5a6   : > { %v4463_v51 = vpop.permute.xlu0 %4462 }
 0x5a7   : > { %4512 = vst.msk [vmem:[%s8301_s4 + $0x68] sm:$0xff] %vm4498_vm0, %v4495_v26  ;;  %v4496_v19 = vadd.f32 %v4463_v51, %v4416_v36 }
 0x5a8   : > { %v4465_v54 = vpop.permute.xlu1 %4464 }
 0x5a9   : > { %4513 = vst.msk [vmem:[%s8301_s4 + $0x70] sm:$0xff] %vm4498_vm0, %v4496_v19  ;;  %v4497_v39 = vadd.f32 %v4465_v54, %v4417_v40 }
 0x5ab   : > { %4514 = vst.msk [vmem:[%s8301_s4 + $0x78] sm:$0xff] %vm4498_vm0, %v4497_v39 }
 0x5ac   : > { %6550 = shalt.err (!%p6547_p9)
}
 0x5ad   : > { %s6551_s25 = scalar_lea.hbm %s8383_s16, 2048  ;;  %s6555_s18 = scalar_lea.hbm %s8552_s15, 8192 }
 0x5ae   : > { %p6552_p1 = scmp.ne.s32.totalorder %s8383_s16, %s6551_s25  ;;  %p6556_p10 = scmp.lt.u32.totalorder %s8383_s16, %s8552_s15 }
 0x5af   : > { %p6557_p12 = scmp.lt.u32.totalorder %s6555_s18, %s6551_s25  ;;  %p6559_p13 = scmp.lt.u32.totalorder %s6551_s25, %s8383_s16 }
 0x5b0   : > { %p6553_p3 = pnand %p6552_p1, %p8553_p0 }
 0x5b1   : > { %p6558_p4 = por %p6557_p12, %p6556_p10 }
 0x5b2   : > { %p6554_p11 = pneg %p6553_p3 }
 0x5b3   : > { %p6560_p2 = por %p6559_p13, %p6558_p4 }
 0x5b5   : > { %p6561_p8 = pnand %p6560_p2, %p6554_p11 }
 0x5b7   : > { %6564 = shalt.err (!%p6561_p8)
}
 0x5b8   : > { %s6675_s0 = smov 128   ;;  %s6676_s9 = smov 8  }
 0x5b9   : > { %6098 = dma.vmem_to_hbm [thread:$0]  (%p8553_p0), %s8376_s7, 2048, %s8383_s16, %s4516_s6, %s6675_s0, %s6675_s0, %s6676_s9  }
 0x5ba PF: > { %p6143_p7 = scmp.ge.s32.totalorder %s6655_s12, 2  ;;  %s4547_s20 = sand.u32 1, %s6627_s27  }
 0x5bb   : > { %p8554_p5 = scmp.ne.s32.totalorder %s8491_s22, 0  ;;  %s4548_s30 = scalar_lea.sflag [#allocation4], %s4547_s20 }
 0x5bd   : > { %p6127_p6 = pnand %p6143_p7, %p8554_p5 }
 0x5bf   : > { %6622 = dma.done.wait (!%p6127_p6), %s4548_s30, 2048  }
 0x5c0   : > { %6624 = vsyncadd (!%p6127_p6), %s4548_s30, 4294965248  ;;  %s30_s12 = sadd.s32 1, %s6655_s12   ;;  %s8555_s19 = sld [smem:[#allocation27_spill]] }
 0x5c1   : > { %p27_p9 = scmp.ge.s32.totalorder %s30_s12, 6   ;;  %s8556_s8 = sld [smem:[#allocation25_spill]] }
 0x5c2   : > { %s8557_s21 = sld [smem:[#allocation26_spill]]  ;;  %s8558_s27 = smov %s6631_s28 }
 0x5c3   : > { %s8559_s28 = smov %s6635_s29  ;;  %s8561_s30 = smov %s6647_s10 }
 0x5c4   : > { %s8562_s9 = smov %s6651_s11  ;;  %29 = sbr.rel (!%p27_p9) target bundleno = 21 (0x15), region = 150 }
 0x5c6   : > { %s8560_s29 = smov %s8555_s19 }
 0x5c7   : > { %s8563_s10 = smov %s8556_s8 }
 0x5c8   : > { %s8564_s11 = smov %s8557_s21 }
 0x5cb   :  { %4553 = vsyncpa [#allocation3], 1 }
 0x5cc   :  { %4555 = vsyncpa [#allocation3 + $0x1], 1 }
 0x5cd   :  { %4556 = vsyncpa [#allocation6], 1 }
 0x5ce   :  { %4558 = vsyncpa [#allocation6 + $0x1], 1 }
 0x5cf   :  { %4559 = vsyncpa [#allocation9], 1 }
 0x5d0   :  { %4560 = vsyncpa [#allocation12], 1 }
 0x5d1   :  { %4561 = vsyncpa [#allocation15], 1 }
 0x5d2   :  { %4562 = vsyncpa [#allocation4], 1 }
 0x5d3   :  { %4564 = vsyncpa [#allocation4 + $0x1], 1 }

</bundles_post_ra>
